<compile_context>
chip_gen: v6e
topology: v6e:2x2x1
jax: 0.10.0
libtpu: 0.0.40
codegen_flags: <defaults>
</compile_context>

<pallas_src>
import math
import jax
import jax.numpy as jnp
from jax import lax
from jax.experimental import pallas as pl
from jax.experimental.pallas import tpu as pltpu

D_MODEL = 32
N_HEAD = 4
DIM_FF = 64
NUM_LAYERS = 2

# Row layout of the per-layer packed (16, D_MODEL) bias / LayerNorm slab.
ROW_S_BIAS = 0            # rows 0..3 : self-attn  bq, bk, bv, bo
ROW_C_BIAS = 4            # rows 4..7 : cross-attn bq, bk, bv, bo
ROW_B2 = 8                # FFN second bias
ROW_G1, ROW_BE1 = 9, 10   # norm1 gamma / beta
ROW_G2, ROW_BE2 = 11, 12  # norm2 gamma / beta
ROW_G3, ROW_BE3 = 13, 14  # norm3 gamma / beta
VEC_ROWS = 16             # padded to a full sublane group


# ---------------- in-kernel helpers (traced inside the Pallas kernel) ----------------

def _layer_norm(x, gamma, beta, eps=1e-5):
    mu = jnp.mean(x, axis=-1, keepdims=True)
    var = jnp.mean((x - mu) ** 2, axis=-1, keepdims=True)
    return (x - mu) * lax.rsqrt(var + eps) * gamma + beta


def _mha_flat(q_in, k_in, v_in, w_pack, bias4, mask, fuse_qk=False):
    """Multi-head attention on batch-flattened tokens (eval mode, no dropout).

    q_in: (Tq, D); k_in / v_in: (Tk, D)
    w_pack: (D, 4*D) packed [wq | wk | wv | wo]
    bias4 : (4, D) rows [bq, bk, bv, bo]
    mask  : (Tq, Tk) additive batch mask (0 same batch, -1e30 otherwise)
    fuse_qk: if q_in is k_in, project Q and K with a single MXU matmul.
    """
    D = q_in.shape[-1]
    dh = D // N_HEAD
    scale = 1.0 / math.sqrt(dh)

    if fuse_qk:
        qk = jnp.dot(q_in, w_pack[:, 0:2 * D], preferred_element_type=jnp.float32)
        Q = (qk[:, 0:D] + bias4[0:1, :]) * scale
        K = qk[:, D:2 * D] + bias4[1:2, :]
    else:
        Q = (jnp.dot(q_in, w_pack[:, 0:D], preferred_element_type=jnp.float32)
             + bias4[0:1, :]) * scale
        K = jnp.dot(k_in, w_pack[:, D:2 * D],
                    preferred_element_type=jnp.float32) + bias4[1:2, :]
    V = jnp.dot(v_in, w_pack[:, 2 * D:3 * D],
                preferred_element_type=jnp.float32) + bias4[2:3, :]

    out = None
    for h in range(N_HEAD):  # small static loop; accumulate through wo rows (no concat)
        lo, hi = h * dh, (h + 1) * dh
        s = lax.dot_general(Q[:, lo:hi], K[:, lo:hi], (((1,), (1,)), ((), ())),
                            preferred_element_type=jnp.float32) + mask
        s = s - jnp.max(s, axis=-1, keepdims=True)
        p = jnp.exp(s)
        p = p * pl.reciprocal(jnp.sum(p, axis=-1, keepdims=True), approx=True)
        hv = jnp.dot(p, V[:, lo:hi], preferred_element_type=jnp.float32)          # (Tq, dh)
        contrib = jnp.dot(hv, w_pack[lo:hi, 3 * D:4 * D],
                          preferred_element_type=jnp.float32)                      # (Tq, D)
        out = contrib if out is None else out + contrib
    return out + bias4[3:4, :]


# ---------------- fused Pallas kernel (whole decoder stack + final norm) ----------------

def decoder_stack_kernel(tgt_ref, mem_ref, qpos_ref, pos_ref,
                         smask_ref, cmask_ref,
                         s_w_ref, c_w_ref, w1_ref, b1_ref, w2_ref,
                         vec_ref, norm_ref, out_ref):
    # TODO(synk): tgt_mask / memory_mask / key_padding masks are None in this
    # synthetic setup and are not applied (the masks below only separate batches).
    x = tgt_ref[...]                     # (L*N, D) batch-interleaved residual stream
    qpos = qpos_ref[...]                 # (L*N, D) constant across layers
    mem = mem_ref[...]                   # (S*N, D)
    mem_pos = mem + pos_ref[...]         # cross-attn key input, constant across layers
    smask = smask_ref[...]               # (L*N, L*N)
    cmask = cmask_ref[...]               # (L*N, S*N)

    for layer in range(NUM_LAYERS):      # static unroll; weights stay VMEM-resident
        s_w = s_w_ref[layer]             # (D, 4D)   self-attn  [wq|wk|wv|wo]
        c_w = c_w_ref[layer]             # (D, 4D)   cross-attn [wq|wk|wv|wo]
        w1 = w1_ref[layer]               # (D, FF)
        b1 = b1_ref[layer]               # (1, FF)
        w2 = w2_ref[layer]               # (FF, D)
        vec = vec_ref[layer]             # (16, D)   biases + LN params

        # --- self attention (q = k = tgt + query_pos, value = tgt), post-norm ---
        q = x + qpos
        t2 = _mha_flat(q, q, x, s_w, vec[ROW_S_BIAS:ROW_S_BIAS + 4, :], smask,
                       fuse_qk=True)
        x = _layer_norm(x + t2, vec[ROW_G1:ROW_G1 + 1, :], vec[ROW_BE1:ROW_BE1 + 1, :])

        # --- cross attention (q = tgt + query_pos, k = memory + pos, v = memory) ---
        t2 = _mha_flat(x + qpos, mem_pos, mem, c_w,
                       vec[ROW_C_BIAS:ROW_C_BIAS + 4, :], cmask)
        x = _layer_norm(x + t2, vec[ROW_G2:ROW_G2 + 1, :], vec[ROW_BE2:ROW_BE2 + 1, :])

        # --- FFN: linear2(relu(linear1(x))) ---
        h = jnp.maximum(jnp.dot(x, w1, preferred_element_type=jnp.float32) + b1, 0.0)
        t2 = jnp.dot(h, w2, preferred_element_type=jnp.float32) + vec[ROW_B2:ROW_B2 + 1, :]
        x = _layer_norm(x + t2, vec[ROW_G3:ROW_G3 + 1, :], vec[ROW_BE3:ROW_BE3 + 1, :])

    # final LayerNorm of the decoder stack
    x = _layer_norm(x, norm_ref[0:1, :], norm_ref[1:2, :])
    out_ref[...] = x.astype(out_ref.dtype)


# ---------------- wrapper (glue; single pallas_call, no grid) ----------------

def _batch_mask(rows, cols, batch):
    """Additive mask: 0 where query/key belong to the same batch, -1e30 otherwise.
    Row r belongs to batch r % batch (batch-interleaved flattening of (seq, batch, D))."""
    r = jnp.arange(rows, dtype=jnp.int32) % batch
    c = jnp.arange(cols, dtype=jnp.int32) % batch
    return jnp.where(r[:, None] == c[None, :], jnp.float32(0.0), jnp.float32(-1e30))


def transformer_decoder_forward(tgt, memory, pos, query_pos, packed):
    """tgt: (L, N, D); memory/pos: (S, N, D); query_pos: (L, N, D).
    Returns (1, L, N, D)  (== output.unsqueeze(0), return_intermediate=False)."""
    L, N, D = tgt.shape
    S = memory.shape[0]
    TQ, TK = L * N, S * N

    # Metadata-only reshapes: row-major (seq, batch, D) flattens exactly to
    # (seq*batch, D) with row = s*N + n  -> no transposes anywhere.
    tgt2 = tgt.reshape(TQ, D)
    mem2 = memory.reshape(TK, D)
    pos2 = pos.reshape(TK, D)
    qpos2 = query_pos.reshape(TQ, D)

    smask = _batch_mask(TQ, TQ, N)
    cmask = _batch_mask(TQ, TK, N)

    vmem = pl.BlockSpec(memory_space=pltpu.MemorySpace.VMEM)
    out2 = pl.pallas_call(
        decoder_stack_kernel,
        out_shape=jax.ShapeDtypeStruct((TQ, D), jnp.float32),
        in_specs=[vmem] * 13,
        out_specs=vmem,
    )(tgt2, mem2, qpos2, pos2, smask, cmask,
      packed["s_w"], packed["c_w"], packed["w1"], packed["b1"], packed["w2"],
      packed["vec"], packed["norm"])

    return out2.reshape(L, N, D)[None]   # unsqueeze(0)


# ---------------- deterministic parameter init (pre-packed, lane-dense) ----------------

def init_params(key, num_layers=NUM_LAYERS):
    keys = jax.random.split(key, num_layers)
    s_w_l, c_w_l, w1_l, b1_l, w2_l, vec_l = [], [], [], [], [], []

    for i in range(num_layers):
        ks = jax.random.split(keys[i], 10)
        w = lambda k, shape: jax.random.normal(k, shape, jnp.float32) * 0.02

        s_wq, s_wk, s_wv, s_wo = (w(ks[j], (D_MODEL, D_MODEL)) for j in range(4))
        c_wq, c_wk, c_wv, c_wo = (w(ks[4 + j], (D_MODEL, D_MODEL)) for j in range(4))
        w1 = w(ks[8], (D_MODEL, DIM_FF))
        w2 = w(ks[9], (DIM_FF, D_MODEL))

        s_w_l.append(jnp.concatenate([s_wq, s_wk, s_wv, s_wo], axis=1))   # (D, 4D) = (32, 128)
        c_w_l.append(jnp.concatenate([c_wq, c_wk, c_wv, c_wo], axis=1))
        w1_l.append(w1)
        w2_l.append(w2)
        b1_l.append(jnp.zeros((1, DIM_FF), jnp.float32))

        z = jnp.zeros((1, D_MODEL), jnp.float32)
        one = jnp.ones((1, D_MODEL), jnp.float32)
        # rows: s_bq s_bk s_bv s_bo | c_bq c_bk c_bv c_bo | b2 | g1 be1 g2 be2 g3 be3 | pad
        vec = jnp.concatenate([z, z, z, z, z, z, z, z, z,
                               one, z, one, z, one, z, z], axis=0)        # (16, D)
        vec_l.append(vec)

    packed = {
        "s_w": jnp.stack(s_w_l),                       # (NL, 32, 128)
        "c_w": jnp.stack(c_w_l),                       # (NL, 32, 128)
        "w1": jnp.stack(w1_l),                         # (NL, 32, 64)
        "b1": jnp.stack(b1_l),                         # (NL, 1, 64)
        "w2": jnp.stack(w2_l),                         # (NL, 64, 32)
        "vec": jnp.stack(vec_l),                       # (NL, 16, 32)
        "norm": jnp.concatenate([jnp.ones((1, D_MODEL), jnp.float32),
                                 jnp.zeros((1, D_MODEL), jnp.float32)], axis=0),  # (2, 32)
    }
    return packed


# ---------------- main ----------------

if __name__ == "__main__":
    key = jax.random.PRNGKey(0)
    k_tgt, k_mem, k_pos, k_qpos, k_par = jax.random.split(key, 5)

    L, S, N = 8, 16, 2  # num queries, memory tokens (e.g. 4x4 feature map), batch
    tgt = jax.random.normal(k_tgt, (L, N, D_MODEL), jnp.float32)
    memory = jax.random.normal(k_mem, (S, N, D_MODEL), jnp.float32)
    pos = jax.random.normal(k_pos, (S, N, D_MODEL), jnp.float32)
    query_pos = jax.random.normal(k_qpos, (L, N, D_MODEL), jnp.float32)

    packed = init_params(k_par)

    fwd = jax.jit(transformer_decoder_forward)
    out = jax.block_until_ready(fwd(tgt, memory, pos, query_pos, packed))

    assert out.shape == (1, L, N, D_MODEL), out.shape
    assert bool(jnp.all(jnp.isfinite(out)))
    print("KERNEL_OK")
</pallas_src>

<mosaic_0001>
module attributes {stable_mosaic.version = 11 : i64} {
  func.func @decoder_stack_kernel(%arg0: memref<16x32xf32, #tpu.memory_space<vmem>>, %arg1: memref<32x32xf32, #tpu.memory_space<vmem>>, %arg2: memref<16x32xf32, #tpu.memory_space<vmem>>, %arg3: memref<32x32xf32, #tpu.memory_space<vmem>>, %arg4: memref<16x16xf32, #tpu.memory_space<vmem>>, %arg5: memref<16x32xf32, #tpu.memory_space<vmem>>, %arg6: memref<2x32x128xf32, #tpu.memory_space<vmem>>, %arg7: memref<2x32x128xf32, #tpu.memory_space<vmem>>, %arg8: memref<2x32x64xf32, #tpu.memory_space<vmem>>, %arg9: memref<2x1x64xf32, #tpu.memory_space<vmem>>, %arg10: memref<2x64x32xf32, #tpu.memory_space<vmem>>, %arg11: memref<2x16x32xf32, #tpu.memory_space<vmem>>, %arg12: memref<2x32xf32, #tpu.memory_space<vmem>>, %arg13: memref<16x32xf32, #tpu.memory_space<vmem>>) attributes {dimension_semantics = [], scalar_prefetch = 0 : i64, scratch_operands = 0 : i64, tpu.core_type = #tpu.core_type<tc>} {
    %c0 = arith.constant 0 : index
    %c0_0 = arith.constant 0 : index
    %0 = vector.load %arg0[%c0, %c0_0] : memref<16x32xf32, #tpu.memory_space<vmem>>, vector<16x32xf32>
    %c0_1 = arith.constant 0 : index
    %c0_2 = arith.constant 0 : index
    %1 = vector.load %arg2[%c0_1, %c0_2] : memref<16x32xf32, #tpu.memory_space<vmem>>, vector<16x32xf32>
    %c0_3 = arith.constant 0 : index
    %c0_4 = arith.constant 0 : index
    %2 = vector.load %arg1[%c0_3, %c0_4] : memref<32x32xf32, #tpu.memory_space<vmem>>, vector<32x32xf32>
    %c0_5 = arith.constant 0 : index
    %c0_6 = arith.constant 0 : index
    %3 = vector.load %arg3[%c0_5, %c0_6] : memref<32x32xf32, #tpu.memory_space<vmem>>, vector<32x32xf32>
    %4 = arith.addf %2, %3 : vector<32x32xf32>
    %c0_7 = arith.constant 0 : index
    %c0_8 = arith.constant 0 : index
    %5 = vector.load %arg4[%c0_7, %c0_8] : memref<16x16xf32, #tpu.memory_space<vmem>>, vector<16x16xf32>
    %c0_9 = arith.constant 0 : index
    %c0_10 = arith.constant 0 : index
    %6 = vector.load %arg5[%c0_9, %c0_10] : memref<16x32xf32, #tpu.memory_space<vmem>>, vector<16x32xf32>
    %c0_11 = arith.constant 0 : index
    %c0_12 = arith.constant 0 : index
    %c0_13 = arith.constant 0 : index
    %7 = vector.load %arg6[%c0_11, %c0_12, %c0_13] : memref<2x32x128xf32, #tpu.memory_space<vmem>>, vector<1x32x128xf32>
    %8 = vector.shape_cast %7 : vector<1x32x128xf32> to vector<32x128xf32>
    %c0_14 = arith.constant 0 : index
    %c0_15 = arith.constant 0 : index
    %c0_16 = arith.constant 0 : index
    %9 = vector.load %arg7[%c0_14, %c0_15, %c0_16] : memref<2x32x128xf32, #tpu.memory_space<vmem>>, vector<1x32x128xf32>
    %10 = vector.shape_cast %9 : vector<1x32x128xf32> to vector<32x128xf32>
    %c0_17 = arith.constant 0 : index
    %c0_18 = arith.constant 0 : index
    %c0_19 = arith.constant 0 : index
    %11 = vector.load %arg8[%c0_17, %c0_18, %c0_19] : memref<2x32x64xf32, #tpu.memory_space<vmem>>, vector<1x32x64xf32>
    %12 = vector.shape_cast %11 : vector<1x32x64xf32> to vector<32x64xf32>
    %c0_20 = arith.constant 0 : index
    %c0_21 = arith.constant 0 : index
    %c0_22 = arith.constant 0 : index
    %13 = vector.load %arg9[%c0_20, %c0_21, %c0_22] : memref<2x1x64xf32, #tpu.memory_space<vmem>>, vector<1x1x64xf32>
    %14 = vector.shape_cast %13 : vector<1x1x64xf32> to vector<1x64xf32>
    %c0_23 = arith.constant 0 : index
    %c0_24 = arith.constant 0 : index
    %c0_25 = arith.constant 0 : index
    %15 = vector.load %arg10[%c0_23, %c0_24, %c0_25] : memref<2x64x32xf32, #tpu.memory_space<vmem>>, vector<1x64x32xf32>
    %16 = vector.shape_cast %15 : vector<1x64x32xf32> to vector<64x32xf32>
    %c0_26 = arith.constant 0 : index
    %c0_27 = arith.constant 0 : index
    %c0_28 = arith.constant 0 : index
    %17 = vector.load %arg11[%c0_26, %c0_27, %c0_28] : memref<2x16x32xf32, #tpu.memory_space<vmem>>, vector<1x16x32xf32>
    %18 = vector.shape_cast %17 : vector<1x16x32xf32> to vector<16x32xf32>
    %19 = arith.addf %0, %1 : vector<16x32xf32>
    %20 = vector.extract_strided_slice %18 {offsets = [0, 0], sizes = [4, 32], strides = [1, 1]} : vector<16x32xf32> to vector<4x32xf32>
    %21 = vector.extract_strided_slice %8 {offsets = [0, 0], sizes = [32, 64], strides = [1, 1]} : vector<32x128xf32> to vector<32x64xf32>
    %cst = arith.constant dense<0.000000e+00> : vector<16x64xf32>
    %22 = tpu.matmul %19, %21, %cst {dimension_numbers = #tpu.dot_dimension_numbers<[1], [0], [0], [1], [0, 0, 1, 1], [], []>} : vector<16x32xf32>, vector<32x64xf32>, vector<16x64xf32> -> vector<16x64xf32>
    %23 = vector.extract_strided_slice %22 {offsets = [0, 0], sizes = [16, 32], strides = [1, 1]} : vector<16x64xf32> to vector<16x32xf32>
    %24 = vector.extract_strided_slice %20 {offsets = [0, 0], sizes = [1, 32], strides = [1, 1]} : vector<4x32xf32> to vector<1x32xf32>
    %25 = vector.broadcast %24 : vector<1x32xf32> to vector<16x32xf32>
    %26 = arith.addf %23, %25 : vector<16x32xf32>
    %cst_29 = arith.constant 0.353553385 : f32
    %27 = vector.broadcast %cst_29 : f32 to vector<16x32xf32>
    %28 = arith.mulf %26, %27 : vector<16x32xf32>
    %29 = vector.extract_strided_slice %22 {offsets = [0, 32], sizes = [16, 32], strides = [1, 1]} : vector<16x64xf32> to vector<16x32xf32>
    %30 = vector.extract_strided_slice %20 {offsets = [1, 0], sizes = [1, 32], strides = [1, 1]} : vector<4x32xf32> to vector<1x32xf32>
    %31 = vector.broadcast %30 : vector<1x32xf32> to vector<16x32xf32>
    %32 = arith.addf %29, %31 : vector<16x32xf32>
    %33 = vector.extract_strided_slice %8 {offsets = [0, 64], sizes = [32, 32], strides = [1, 1]} : vector<32x128xf32> to vector<32x32xf32>
    %cst_30 = arith.constant dense<0.000000e+00> : vector<16x32xf32>
    %34 = tpu.matmul %0, %33, %cst_30 {dimension_numbers = #tpu.dot_dimension_numbers<[1], [0], [0], [1], [0, 0, 1, 1], [], []>} : vector<16x32xf32>, vector<32x32xf32>, vector<16x32xf32> -> vector<16x32xf32>
    %35 = vector.extract_strided_slice %20 {offsets = [2, 0], sizes = [1, 32], strides = [1, 1]} : vector<4x32xf32> to vector<1x32xf32>
    %36 = vector.broadcast %35 : vector<1x32xf32> to vector<16x32xf32>
    %37 = arith.addf %34, %36 : vector<16x32xf32>
    %38 = vector.extract_strided_slice %28 {offsets = [0, 0], sizes = [16, 8], strides = [1, 1]} : vector<16x32xf32> to vector<16x8xf32>
    %39 = vector.extract_strided_slice %32 {offsets = [0, 0], sizes = [16, 8], strides = [1, 1]} : vector<16x32xf32> to vector<16x8xf32>
    %cst_31 = arith.constant dense<0.000000e+00> : vector<16x16xf32>
    %40 = tpu.matmul %38, %39, %cst_31 {dimension_numbers = #tpu.dot_dimension_numbers<[1], [1], [0], [0], [0, 0, 1, 0], [], []>} : vector<16x8xf32>, vector<16x8xf32>, vector<16x16xf32> -> vector<16x16xf32>
    %41 = arith.addf %40, %5 : vector<16x16xf32>
    %cst_32 = arith.constant dense<0xFF800000> : vector<16xf32>
    %42 = vector.multi_reduction <maximumf>, %41, %cst_32 [1] : vector<16x16xf32> to vector<16xf32>
    %43 = vector.shape_cast %42 : vector<16xf32> to vector<16x1xf32>
    %44 = vector.broadcast %43 : vector<16x1xf32> to vector<16x16xf32>
    %45 = arith.subf %41, %44 : vector<16x16xf32>
    %46 = math.exp %45 : vector<16x16xf32>
    %cst_33 = arith.constant dense<0.000000e+00> : vector<16xf32>
    %47 = vector.multi_reduction <add>, %46, %cst_33 [1] : vector<16x16xf32> to vector<16xf32>
    %48 = vector.shape_cast %47 : vector<16xf32> to vector<16x1xf32>
    %49 = tpu.reciprocal %48 {approx = true} : vector<16x1xf32> -> vector<16x1xf32>
    %50 = vector.broadcast %49 : vector<16x1xf32> to vector<16x16xf32>
    %51 = arith.mulf %46, %50 : vector<16x16xf32>
    %52 = vector.extract_strided_slice %37 {offsets = [0, 0], sizes = [16, 8], strides = [1, 1]} : vector<16x32xf32> to vector<16x8xf32>
    %cst_34 = arith.constant dense<0.000000e+00> : vector<16x8xf32>
    %53 = tpu.matmul %51, %52, %cst_34 {dimension_numbers = #tpu.dot_dimension_numbers<[1], [0], [0], [1], [0, 0, 1, 1], [], []>} : vector<16x16xf32>, vector<16x8xf32>, vector<16x8xf32> -> vector<16x8xf32>
    %54 = vector.extract_strided_slice %8 {offsets = [0, 96], sizes = [8, 32], strides = [1, 1]} : vector<32x128xf32> to vector<8x32xf32>
    %cst_35 = arith.constant dense<0.000000e+00> : vector<16x32xf32>
    %55 = tpu.matmul %53, %54, %cst_35 {dimension_numbers = #tpu.dot_dimension_numbers<[1], [0], [0], [1], [0, 0, 1, 1], [], []>} : vector<16x8xf32>, vector<8x32xf32>, vector<16x32xf32> -> vector<16x32xf32>
    %56 = vector.extract_strided_slice %28 {offsets = [0, 8], sizes = [16, 8], strides = [1, 1]} : vector<16x32xf32> to vector<16x8xf32>
    %57 = vector.extract_strided_slice %32 {offsets = [0, 8], sizes = [16, 8], strides = [1, 1]} : vector<16x32xf32> to vector<16x8xf32>
    %cst_36 = arith.constant dense<0.000000e+00> : vector<16x16xf32>
    %58 = tpu.matmul %56, %57, %cst_36 {dimension_numbers = #tpu.dot_dimension_numbers<[1], [1], [0], [0], [0, 0, 1, 0], [], []>} : vector<16x8xf32>, vector<16x8xf32>, vector<16x16xf32> -> vector<16x16xf32>
    %59 = arith.addf %58, %5 : vector<16x16xf32>
    %cst_37 = arith.constant dense<0xFF800000> : vector<16xf32>
    %60 = vector.multi_reduction <maximumf>, %59, %cst_37 [1] : vector<16x16xf32> to vector<16xf32>
    %61 = vector.shape_cast %60 : vector<16xf32> to vector<16x1xf32>
    %62 = vector.broadcast %61 : vector<16x1xf32> to vector<16x16xf32>
    %63 = arith.subf %59, %62 : vector<16x16xf32>
    %64 = math.exp %63 : vector<16x16xf32>
    %cst_38 = arith.constant dense<0.000000e+00> : vector<16xf32>
    %65 = vector.multi_reduction <add>, %64, %cst_38 [1] : vector<16x16xf32> to vector<16xf32>
    %66 = vector.shape_cast %65 : vector<16xf32> to vector<16x1xf32>
    %67 = tpu.reciprocal %66 {approx = true} : vector<16x1xf32> -> vector<16x1xf32>
    %68 = vector.broadcast %67 : vector<16x1xf32> to vector<16x16xf32>
    %69 = arith.mulf %64, %68 : vector<16x16xf32>
    %70 = vector.extract_strided_slice %37 {offsets = [0, 8], sizes = [16, 8], strides = [1, 1]} : vector<16x32xf32> to vector<16x8xf32>
    %cst_39 = arith.constant dense<0.000000e+00> : vector<16x8xf32>
    %71 = tpu.matmul %69, %70, %cst_39 {dimension_numbers = #tpu.dot_dimension_numbers<[1], [0], [0], [1], [0, 0, 1, 1], [], []>} : vector<16x16xf32>, vector<16x8xf32>, vector<16x8xf32> -> vector<16x8xf32>
    %72 = vector.extract_strided_slice %8 {offsets = [8, 96], sizes = [8, 32], strides = [1, 1]} : vector<32x128xf32> to vector<8x32xf32>
    %cst_40 = arith.constant dense<0.000000e+00> : vector<16x32xf32>
    %73 = tpu.matmul %71, %72, %cst_40 {dimension_numbers = #tpu.dot_dimension_numbers<[1], [0], [0], [1], [0, 0, 1, 1], [], []>} : vector<16x8xf32>, vector<8x32xf32>, vector<16x32xf32> -> vector<16x32xf32>
    %74 = arith.addf %55, %73 : vector<16x32xf32>
    %75 = vector.extract_strided_slice %28 {offsets = [0, 16], sizes = [16, 8], strides = [1, 1]} : vector<16x32xf32> to vector<16x8xf32>
    %76 = vector.extract_strided_slice %32 {offsets = [0, 16], sizes = [16, 8], strides = [1, 1]} : vector<16x32xf32> to vector<16x8xf32>
    %cst_41 = arith.constant dense<0.000000e+00> : vector<16x16xf32>
    %77 = tpu.matmul %75, %76, %cst_41 {dimension_numbers = #tpu.dot_dimension_numbers<[1], [1], [0], [0], [0, 0, 1, 0], [], []>} : vector<16x8xf32>, vector<16x8xf32>, vector<16x16xf32> -> vector<16x16xf32>
    %78 = arith.addf %77, %5 : vector<16x16xf32>
    %cst_42 = arith.constant dense<0xFF800000> : vector<16xf32>
    %79 = vector.multi_reduction <maximumf>, %78, %cst_42 [1] : vector<16x16xf32> to vector<16xf32>
    %80 = vector.shape_cast %79 : vector<16xf32> to vector<16x1xf32>
    %81 = vector.broadcast %80 : vector<16x1xf32> to vector<16x16xf32>
    %82 = arith.subf %78, %81 : vector<16x16xf32>
    %83 = math.exp %82 : vector<16x16xf32>
    %cst_43 = arith.constant dense<0.000000e+00> : vector<16xf32>
    %84 = vector.multi_reduction <add>, %83, %cst_43 [1] : vector<16x16xf32> to vector<16xf32>
    %85 = vector.shape_cast %84 : vector<16xf32> to vector<16x1xf32>
    %86 = tpu.reciprocal %85 {approx = true} : vector<16x1xf32> -> vector<16x1xf32>
    %87 = vector.broadcast %86 : vector<16x1xf32> to vector<16x16xf32>
    %88 = arith.mulf %83, %87 : vector<16x16xf32>
    %89 = vector.extract_strided_slice %37 {offsets = [0, 16], sizes = [16, 8], strides = [1, 1]} : vector<16x32xf32> to vector<16x8xf32>
    %cst_44 = arith.constant dense<0.000000e+00> : vector<16x8xf32>
    %90 = tpu.matmul %88, %89, %cst_44 {dimension_numbers = #tpu.dot_dimension_numbers<[1], [0], [0], [1], [0, 0, 1, 1], [], []>} : vector<16x16xf32>, vector<16x8xf32>, vector<16x8xf32> -> vector<16x8xf32>
    %91 = vector.extract_strided_slice %8 {offsets = [16, 96], sizes = [8, 32], strides = [1, 1]} : vector<32x128xf32> to vector<8x32xf32>
    %cst_45 = arith.constant dense<0.000000e+00> : vector<16x32xf32>
    %92 = tpu.matmul %90, %91, %cst_45 {dimension_numbers = #tpu.dot_dimension_numbers<[1], [0], [0], [1], [0, 0, 1, 1], [], []>} : vector<16x8xf32>, vector<8x32xf32>, vector<16x32xf32> -> vector<16x32xf32>
    %93 = arith.addf %74, %92 : vector<16x32xf32>
    %94 = vector.extract_strided_slice %28 {offsets = [0, 24], sizes = [16, 8], strides = [1, 1]} : vector<16x32xf32> to vector<16x8xf32>
    %95 = vector.extract_strided_slice %32 {offsets = [0, 24], sizes = [16, 8], strides = [1, 1]} : vector<16x32xf32> to vector<16x8xf32>
    %cst_46 = arith.constant dense<0.000000e+00> : vector<16x16xf32>
    %96 = tpu.matmul %94, %95, %cst_46 {dimension_numbers = #tpu.dot_dimension_numbers<[1], [1], [0], [0], [0, 0, 1, 0], [], []>} : vector<16x8xf32>, vector<16x8xf32>, vector<16x16xf32> -> vector<16x16xf32>
    %97 = arith.addf %96, %5 : vector<16x16xf32>
    %cst_47 = arith.constant dense<0xFF800000> : vector<16xf32>
    %98 = vector.multi_reduction <maximumf>, %97, %cst_47 [1] : vector<16x16xf32> to vector<16xf32>
    %99 = vector.shape_cast %98 : vector<16xf32> to vector<16x1xf32>
    %100 = vector.broadcast %99 : vector<16x1xf32> to vector<16x16xf32>
    %101 = arith.subf %97, %100 : vector<16x16xf32>
    %102 = math.exp %101 : vector<16x16xf32>
    %cst_48 = arith.constant dense<0.000000e+00> : vector<16xf32>
    %103 = vector.multi_reduction <add>, %102, %cst_48 [1] : vector<16x16xf32> to vector<16xf32>
    %104 = vector.shape_cast %103 : vector<16xf32> to vector<16x1xf32>
    %105 = tpu.reciprocal %104 {approx = true} : vector<16x1xf32> -> vector<16x1xf32>
    %106 = vector.broadcast %105 : vector<16x1xf32> to vector<16x16xf32>
    %107 = arith.mulf %102, %106 : vector<16x16xf32>
    %108 = vector.extract_strided_slice %37 {offsets = [0, 24], sizes = [16, 8], strides = [1, 1]} : vector<16x32xf32> to vector<16x8xf32>
    %cst_49 = arith.constant dense<0.000000e+00> : vector<16x8xf32>
    %109 = tpu.matmul %107, %108, %cst_49 {dimension_numbers = #tpu.dot_dimension_numbers<[1], [0], [0], [1], [0, 0, 1, 1], [], []>} : vector<16x16xf32>, vector<16x8xf32>, vector<16x8xf32> -> vector<16x8xf32>
    %110 = vector.extract_strided_slice %8 {offsets = [24, 96], sizes = [8, 32], strides = [1, 1]} : vector<32x128xf32> to vector<8x32xf32>
    %cst_50 = arith.constant dense<0.000000e+00> : vector<16x32xf32>
    %111 = tpu.matmul %109, %110, %cst_50 {dimension_numbers = #tpu.dot_dimension_numbers<[1], [0], [0], [1], [0, 0, 1, 1], [], []>} : vector<16x8xf32>, vector<8x32xf32>, vector<16x32xf32> -> vector<16x32xf32>
    %112 = arith.addf %93, %111 : vector<16x32xf32>
    %113 = vector.extract_strided_slice %20 {offsets = [3, 0], sizes = [1, 32], strides = [1, 1]} : vector<4x32xf32> to vector<1x32xf32>
    %114 = vector.broadcast %113 : vector<1x32xf32> to vector<16x32xf32>
    %115 = arith.addf %112, %114 : vector<16x32xf32>
    %116 = arith.addf %0, %115 : vector<16x32xf32>
    %117 = vector.extract_strided_slice %18 {offsets = [9, 0], sizes = [1, 32], strides = [1, 1]} : vector<16x32xf32> to vector<1x32xf32>
    %118 = vector.extract_strided_slice %18 {offsets = [10, 0], sizes = [1, 32], strides = [1, 1]} : vector<16x32xf32> to vector<1x32xf32>
    %cst_51 = arith.constant dense<0.000000e+00> : vector<16xf32>
    %119 = vector.multi_reduction <add>, %116, %cst_51 [1] : vector<16x32xf32> to vector<16xf32>
    %120 = vector.shape_cast %119 : vector<16xf32> to vector<16x1xf32>
    %cst_52 = arith.constant 3.200000e+01 : f32
    %121 = vector.broadcast %cst_52 : f32 to vector<16x1xf32>
    %122 = arith.divf %120, %121 : vector<16x1xf32>
    %123 = vector.broadcast %122 : vector<16x1xf32> to vector<16x32xf32>
    %124 = arith.subf %116, %123 : vector<16x32xf32>
    %125 = arith.mulf %124, %124 : vector<16x32xf32>
    %cst_53 = arith.constant dense<0.000000e+00> : vector<16xf32>
    %126 = vector.multi_reduction <add>, %125, %cst_53 [1] : vector<16x32xf32> to vector<16xf32>
    %127 = vector.shape_cast %126 : vector<16xf32> to vector<16x1xf32>
    %cst_54 = arith.constant 3.200000e+01 : f32
    %128 = vector.broadcast %cst_54 : f32 to vector<16x1xf32>
    %129 = arith.divf %127, %128 : vector<16x1xf32>
    %130 = vector.broadcast %122 : vector<16x1xf32> to vector<16x32xf32>
    %131 = arith.subf %116, %130 : vector<16x32xf32>
    %cst_55 = arith.constant 9.99999974E-6 : f32
    %132 = vector.broadcast %cst_55 : f32 to vector<16x1xf32>
    %133 = arith.addf %129, %132 : vector<16x1xf32>
    %134 = math.rsqrt %133 : vector<16x1xf32>
    %135 = vector.broadcast %134 : vector<16x1xf32> to vector<16x32xf32>
    %136 = arith.mulf %131, %135 : vector<16x32xf32>
    %137 = vector.broadcast %117 : vector<1x32xf32> to vector<16x32xf32>
    %138 = arith.mulf %136, %137 : vector<16x32xf32>
    %139 = vector.broadcast %118 : vector<1x32xf32> to vector<16x32xf32>
    %140 = arith.addf %138, %139 : vector<16x32xf32>
    %141 = arith.addf %140, %1 : vector<16x32xf32>
    %142 = vector.extract_strided_slice %18 {offsets = [4, 0], sizes = [4, 32], strides = [1, 1]} : vector<16x32xf32> to vector<4x32xf32>
    %143 = vector.extract_strided_slice %10 {offsets = [0, 0], sizes = [32, 32], strides = [1, 1]} : vector<32x128xf32> to vector<32x32xf32>
    %cst_56 = arith.constant dense<0.000000e+00> : vector<16x32xf32>
    %144 = tpu.matmul %141, %143, %cst_56 {dimension_numbers = #tpu.dot_dimension_numbers<[1], [0], [0], [1], [0, 0, 1, 1], [], []>} : vector<16x32xf32>, vector<32x32xf32>, vector<16x32xf32> -> vector<16x32xf32>
    %145 = vector.extract_strided_slice %142 {offsets = [0, 0], sizes = [1, 32], strides = [1, 1]} : vector<4x32xf32> to vector<1x32xf32>
    %146 = vector.broadcast %145 : vector<1x32xf32> to vector<16x32xf32>
    %147 = arith.addf %144, %146 : vector<16x32xf32>
    %cst_57 = arith.constant 0.353553385 : f32
    %148 = vector.broadcast %cst_57 : f32 to vector<16x32xf32>
    %149 = arith.mulf %147, %148 : vector<16x32xf32>
    %150 = vector.extract_strided_slice %10 {offsets = [0, 32], sizes = [32, 32], strides = [1, 1]} : vector<32x128xf32> to vector<32x32xf32>
    %cst_58 = arith.constant dense<0.000000e+00> : vector<32x32xf32>
    %151 = tpu.matmul %4, %150, %cst_58 {dimension_numbers = #tpu.dot_dimension_numbers<[1], [0], [0], [1], [0, 0, 1, 1], [], []>} : vector<32x32xf32>, vector<32x32xf32>, vector<32x32xf32> -> vector<32x32xf32>
    %152 = vector.extract_strided_slice %142 {offsets = [1, 0], sizes = [1, 32], strides = [1, 1]} : vector<4x32xf32> to vector<1x32xf32>
    %153 = vector.broadcast %152 : vector<1x32xf32> to vector<32x32xf32>
    %154 = arith.addf %151, %153 : vector<32x32xf32>
    %155 = vector.extract_strided_slice %10 {offsets = [0, 64], sizes = [32, 32], strides = [1, 1]} : vector<32x128xf32> to vector<32x32xf32>
    %cst_59 = arith.constant dense<0.000000e+00> : vector<32x32xf32>
    %156 = tpu.matmul %2, %155, %cst_59 {dimension_numbers = #tpu.dot_dimension_numbers<[1], [0], [0], [1], [0, 0, 1, 1], [], []>} : vector<32x32xf32>, vector<32x32xf32>, vector<32x32xf32> -> vector<32x32xf32>
    %157 = vector.extract_strided_slice %142 {offsets = [2, 0], sizes = [1, 32], strides = [1, 1]} : vector<4x32xf32> to vector<1x32xf32>
    %158 = vector.broadcast %157 : vector<1x32xf32> to vector<32x32xf32>
    %159 = arith.addf %156, %158 : vector<32x32xf32>
    %160 = vector.extract_strided_slice %149 {offsets = [0, 0], sizes = [16, 8], strides = [1, 1]} : vector<16x32xf32> to vector<16x8xf32>
    %161 = vector.extract_strided_slice %154 {offsets = [0, 0], sizes = [32, 8], strides = [1, 1]} : vector<32x32xf32> to vector<32x8xf32>
    %cst_60 = arith.constant dense<0.000000e+00> : vector<16x32xf32>
    %162 = tpu.matmul %160, %161, %cst_60 {dimension_numbers = #tpu.dot_dimension_numbers<[1], [1], [0], [0], [0, 0, 1, 0], [], []>} : vector<16x8xf32>, vector<32x8xf32>, vector<16x32xf32> -> vector<16x32xf32>
    %163 = arith.addf %162, %6 : vector<16x32xf32>
    %cst_61 = arith.constant dense<0xFF800000> : vector<16xf32>
    %164 = vector.multi_reduction <maximumf>, %163, %cst_61 [1] : vector<16x32xf32> to vector<16xf32>
    %165 = vector.shape_cast %164 : vector<16xf32> to vector<16x1xf32>
    %166 = vector.broadcast %165 : vector<16x1xf32> to vector<16x32xf32>
    %167 = arith.subf %163, %166 : vector<16x32xf32>
    %168 = math.exp %167 : vector<16x32xf32>
    %cst_62 = arith.constant dense<0.000000e+00> : vector<16xf32>
    %169 = vector.multi_reduction <add>, %168, %cst_62 [1] : vector<16x32xf32> to vector<16xf32>
    %170 = vector.shape_cast %169 : vector<16xf32> to vector<16x1xf32>
    %171 = tpu.reciprocal %170 {approx = true} : vector<16x1xf32> -> vector<16x1xf32>
    %172 = vector.broadcast %171 : vector<16x1xf32> to vector<16x32xf32>
    %173 = arith.mulf %168, %172 : vector<16x32xf32>
    %174 = vector.extract_strided_slice %159 {offsets = [0, 0], sizes = [32, 8], strides = [1, 1]} : vector<32x32xf32> to vector<32x8xf32>
    %cst_63 = arith.constant dense<0.000000e+00> : vector<16x8xf32>
    %175 = tpu.matmul %173, %174, %cst_63 {dimension_numbers = #tpu.dot_dimension_numbers<[1], [0], [0], [1], [0, 0, 1, 1], [], []>} : vector<16x32xf32>, vector<32x8xf32>, vector<16x8xf32> -> vector<16x8xf32>
    %176 = vector.extract_strided_slice %10 {offsets = [0, 96], sizes = [8, 32], strides = [1, 1]} : vector<32x128xf32> to vector<8x32xf32>
    %cst_64 = arith.constant dense<0.000000e+00> : vector<16x32xf32>
    %177 = tpu.matmul %175, %176, %cst_64 {dimension_numbers = #tpu.dot_dimension_numbers<[1], [0], [0], [1], [0, 0, 1, 1], [], []>} : vector<16x8xf32>, vector<8x32xf32>, vector<16x32xf32> -> vector<16x32xf32>
    %178 = vector.extract_strided_slice %149 {offsets = [0, 8], sizes = [16, 8], strides = [1, 1]} : vector<16x32xf32> to vector<16x8xf32>
    %179 = vector.extract_strided_slice %154 {offsets = [0, 8], sizes = [32, 8], strides = [1, 1]} : vector<32x32xf32> to vector<32x8xf32>
    %cst_65 = arith.constant dense<0.000000e+00> : vector<16x32xf32>
    %180 = tpu.matmul %178, %179, %cst_65 {dimension_numbers = #tpu.dot_dimension_numbers<[1], [1], [0], [0], [0, 0, 1, 0], [], []>} : vector<16x8xf32>, vector<32x8xf32>, vector<16x32xf32> -> vector<16x32xf32>
    %181 = arith.addf %180, %6 : vector<16x32xf32>
    %cst_66 = arith.constant dense<0xFF800000> : vector<16xf32>
    %182 = vector.multi_reduction <maximumf>, %181, %cst_66 [1] : vector<16x32xf32> to vector<16xf32>
    %183 = vector.shape_cast %182 : vector<16xf32> to vector<16x1xf32>
    %184 = vector.broadcast %183 : vector<16x1xf32> to vector<16x32xf32>
    %185 = arith.subf %181, %184 : vector<16x32xf32>
    %186 = math.exp %185 : vector<16x32xf32>
    %cst_67 = arith.constant dense<0.000000e+00> : vector<16xf32>
    %187 = vector.multi_reduction <add>, %186, %cst_67 [1] : vector<16x32xf32> to vector<16xf32>
    %188 = vector.shape_cast %187 : vector<16xf32> to vector<16x1xf32>
    %189 = tpu.reciprocal %188 {approx = true} : vector<16x1xf32> -> vector<16x1xf32>
    %190 = vector.broadcast %189 : vector<16x1xf32> to vector<16x32xf32>
    %191 = arith.mulf %186, %190 : vector<16x32xf32>
    %192 = vector.extract_strided_slice %159 {offsets = [0, 8], sizes = [32, 8], strides = [1, 1]} : vector<32x32xf32> to vector<32x8xf32>
    %cst_68 = arith.constant dense<0.000000e+00> : vector<16x8xf32>
    %193 = tpu.matmul %191, %192, %cst_68 {dimension_numbers = #tpu.dot_dimension_numbers<[1], [0], [0], [1], [0, 0, 1, 1], [], []>} : vector<16x32xf32>, vector<32x8xf32>, vector<16x8xf32> -> vector<16x8xf32>
    %194 = vector.extract_strided_slice %10 {offsets = [8, 96], sizes = [8, 32], strides = [1, 1]} : vector<32x128xf32> to vector<8x32xf32>
    %cst_69 = arith.constant dense<0.000000e+00> : vector<16x32xf32>
    %195 = tpu.matmul %193, %194, %cst_69 {dimension_numbers = #tpu.dot_dimension_numbers<[1], [0], [0], [1], [0, 0, 1, 1], [], []>} : vector<16x8xf32>, vector<8x32xf32>, vector<16x32xf32> -> vector<16x32xf32>
    %196 = arith.addf %177, %195 : vector<16x32xf32>
    %197 = vector.extract_strided_slice %149 {offsets = [0, 16], sizes = [16, 8], strides = [1, 1]} : vector<16x32xf32> to vector<16x8xf32>
    %198 = vector.extract_strided_slice %154 {offsets = [0, 16], sizes = [32, 8], strides = [1, 1]} : vector<32x32xf32> to vector<32x8xf32>
    %cst_70 = arith.constant dense<0.000000e+00> : vector<16x32xf32>
    %199 = tpu.matmul %197, %198, %cst_70 {dimension_numbers = #tpu.dot_dimension_numbers<[1], [1], [0], [0], [0, 0, 1, 0], [], []>} : vector<16x8xf32>, vector<32x8xf32>, vector<16x32xf32> -> vector<16x32xf32>
    %200 = arith.addf %199, %6 : vector<16x32xf32>
    %cst_71 = arith.constant dense<0xFF800000> : vector<16xf32>
    %201 = vector.multi_reduction <maximumf>, %200, %cst_71 [1] : vector<16x32xf32> to vector<16xf32>
    %202 = vector.shape_cast %201 : vector<16xf32> to vector<16x1xf32>
    %203 = vector.broadcast %202 : vector<16x1xf32> to vector<16x32xf32>
    %204 = arith.subf %200, %203 : vector<16x32xf32>
    %205 = math.exp %204 : vector<16x32xf32>
    %cst_72 = arith.constant dense<0.000000e+00> : vector<16xf32>
    %206 = vector.multi_reduction <add>, %205, %cst_72 [1] : vector<16x32xf32> to vector<16xf32>
    %207 = vector.shape_cast %206 : vector<16xf32> to vector<16x1xf32>
    %208 = tpu.reciprocal %207 {approx = true} : vector<16x1xf32> -> vector<16x1xf32>
    %209 = vector.broadcast %208 : vector<16x1xf32> to vector<16x32xf32>
    %210 = arith.mulf %205, %209 : vector<16x32xf32>
    %211 = vector.extract_strided_slice %159 {offsets = [0, 16], sizes = [32, 8], strides = [1, 1]} : vector<32x32xf32> to vector<32x8xf32>
    %cst_73 = arith.constant dense<0.000000e+00> : vector<16x8xf32>
    %212 = tpu.matmul %210, %211, %cst_73 {dimension_numbers = #tpu.dot_dimension_numbers<[1], [0], [0], [1], [0, 0, 1, 1], [], []>} : vector<16x32xf32>, vector<32x8xf32>, vector<16x8xf32> -> vector<16x8xf32>
    %213 = vector.extract_strided_slice %10 {offsets = [16, 96], sizes = [8, 32], strides = [1, 1]} : vector<32x128xf32> to vector<8x32xf32>
    %cst_74 = arith.constant dense<0.000000e+00> : vector<16x32xf32>
    %214 = tpu.matmul %212, %213, %cst_74 {dimension_numbers = #tpu.dot_dimension_numbers<[1], [0], [0], [1], [0, 0, 1, 1], [], []>} : vector<16x8xf32>, vector<8x32xf32>, vector<16x32xf32> -> vector<16x32xf32>
    %215 = arith.addf %196, %214 : vector<16x32xf32>
    %216 = vector.extract_strided_slice %149 {offsets = [0, 24], sizes = [16, 8], strides = [1, 1]} : vector<16x32xf32> to vector<16x8xf32>
    %217 = vector.extract_strided_slice %154 {offsets = [0, 24], sizes = [32, 8], strides = [1, 1]} : vector<32x32xf32> to vector<32x8xf32>
    %cst_75 = arith.constant dense<0.000000e+00> : vector<16x32xf32>
    %218 = tpu.matmul %216, %217, %cst_75 {dimension_numbers = #tpu.dot_dimension_numbers<[1], [1], [0], [0], [0, 0, 1, 0], [], []>} : vector<16x8xf32>, vector<32x8xf32>, vector<16x32xf32> -> vector<16x32xf32>
    %219 = arith.addf %218, %6 : vector<16x32xf32>
    %cst_76 = arith.constant dense<0xFF800000> : vector<16xf32>
    %220 = vector.multi_reduction <maximumf>, %219, %cst_76 [1] : vector<16x32xf32> to vector<16xf32>
    %221 = vector.shape_cast %220 : vector<16xf32> to vector<16x1xf32>
    %222 = vector.broadcast %221 : vector<16x1xf32> to vector<16x32xf32>
    %223 = arith.subf %219, %222 : vector<16x32xf32>
    %224 = math.exp %223 : vector<16x32xf32>
    %cst_77 = arith.constant dense<0.000000e+00> : vector<16xf32>
    %225 = vector.multi_reduction <add>, %224, %cst_77 [1] : vector<16x32xf32> to vector<16xf32>
    %226 = vector.shape_cast %225 : vector<16xf32> to vector<16x1xf32>
    %227 = tpu.reciprocal %226 {approx = true} : vector<16x1xf32> -> vector<16x1xf32>
    %228 = vector.broadcast %227 : vector<16x1xf32> to vector<16x32xf32>
    %229 = arith.mulf %224, %228 : vector<16x32xf32>
    %230 = vector.extract_strided_slice %159 {offsets = [0, 24], sizes = [32, 8], strides = [1, 1]} : vector<32x32xf32> to vector<32x8xf32>
    %cst_78 = arith.constant dense<0.000000e+00> : vector<16x8xf32>
    %231 = tpu.matmul %229, %230, %cst_78 {dimension_numbers = #tpu.dot_dimension_numbers<[1], [0], [0], [1], [0, 0, 1, 1], [], []>} : vector<16x32xf32>, vector<32x8xf32>, vector<16x8xf32> -> vector<16x8xf32>
    %232 = vector.extract_strided_slice %10 {offsets = [24, 96], sizes = [8, 32], strides = [1, 1]} : vector<32x128xf32> to vector<8x32xf32>
    %cst_79 = arith.constant dense<0.000000e+00> : vector<16x32xf32>
    %233 = tpu.matmul %231, %232, %cst_79 {dimension_numbers = #tpu.dot_dimension_numbers<[1], [0], [0], [1], [0, 0, 1, 1], [], []>} : vector<16x8xf32>, vector<8x32xf32>, vector<16x32xf32> -> vector<16x32xf32>
    %234 = arith.addf %215, %233 : vector<16x32xf32>
    %235 = vector.extract_strided_slice %142 {offsets = [3, 0], sizes = [1, 32], strides = [1, 1]} : vector<4x32xf32> to vector<1x32xf32>
    %236 = vector.broadcast %235 : vector<1x32xf32> to vector<16x32xf32>
    %237 = arith.addf %234, %236 : vector<16x32xf32>
    %238 = arith.addf %140, %237 : vector<16x32xf32>
    %239 = vector.extract_strided_slice %18 {offsets = [11, 0], sizes = [1, 32], strides = [1, 1]} : vector<16x32xf32> to vector<1x32xf32>
    %240 = vector.extract_strided_slice %18 {offsets = [12, 0], sizes = [1, 32], strides = [1, 1]} : vector<16x32xf32> to vector<1x32xf32>
    %cst_80 = arith.constant dense<0.000000e+00> : vector<16xf32>
    %241 = vector.multi_reduction <add>, %238, %cst_80 [1] : vector<16x32xf32> to vector<16xf32>
    %242 = vector.shape_cast %241 : vector<16xf32> to vector<16x1xf32>
    %cst_81 = arith.constant 3.200000e+01 : f32
    %243 = vector.broadcast %cst_81 : f32 to vector<16x1xf32>
    %244 = arith.divf %242, %243 : vector<16x1xf32>
    %245 = vector.broadcast %244 : vector<16x1xf32> to vector<16x32xf32>
    %246 = arith.subf %238, %245 : vector<16x32xf32>
    %247 = arith.mulf %246, %246 : vector<16x32xf32>
    %cst_82 = arith.constant dense<0.000000e+00> : vector<16xf32>
    %248 = vector.multi_reduction <add>, %247, %cst_82 [1] : vector<16x32xf32> to vector<16xf32>
    %249 = vector.shape_cast %248 : vector<16xf32> to vector<16x1xf32>
    %cst_83 = arith.constant 3.200000e+01 : f32
    %250 = vector.broadcast %cst_83 : f32 to vector<16x1xf32>
    %251 = arith.divf %249, %250 : vector<16x1xf32>
    %252 = vector.broadcast %244 : vector<16x1xf32> to vector<16x32xf32>
    %253 = arith.subf %238, %252 : vector<16x32xf32>
    %cst_84 = arith.constant 9.99999974E-6 : f32
    %254 = vector.broadcast %cst_84 : f32 to vector<16x1xf32>
    %255 = arith.addf %251, %254 : vector<16x1xf32>
    %256 = math.rsqrt %255 : vector<16x1xf32>
    %257 = vector.broadcast %256 : vector<16x1xf32> to vector<16x32xf32>
    %258 = arith.mulf %253, %257 : vector<16x32xf32>
    %259 = vector.broadcast %239 : vector<1x32xf32> to vector<16x32xf32>
    %260 = arith.mulf %258, %259 : vector<16x32xf32>
    %261 = vector.broadcast %240 : vector<1x32xf32> to vector<16x32xf32>
    %262 = arith.addf %260, %261 : vector<16x32xf32>
    %cst_85 = arith.constant dense<0.000000e+00> : vector<16x64xf32>
    %263 = tpu.matmul %262, %12, %cst_85 {dimension_numbers = #tpu.dot_dimension_numbers<[1], [0], [0], [1], [0, 0, 1, 1], [], []>} : vector<16x32xf32>, vector<32x64xf32>, vector<16x64xf32> -> vector<16x64xf32>
    %264 = vector.broadcast %14 : vector<1x64xf32> to vector<16x64xf32>
    %265 = arith.addf %263, %264 : vector<16x64xf32>
    %cst_86 = arith.constant 0.000000e+00 : f32
    %266 = vector.broadcast %cst_86 : f32 to vector<16x64xf32>
    %267 = arith.maximumf %265, %266 : vector<16x64xf32>
    %cst_87 = arith.constant dense<0.000000e+00> : vector<16x32xf32>
    %268 = tpu.matmul %267, %16, %cst_87 {dimension_numbers = #tpu.dot_dimension_numbers<[1], [0], [0], [1], [0, 0, 1, 1], [], []>} : vector<16x64xf32>, vector<64x32xf32>, vector<16x32xf32> -> vector<16x32xf32>
    %269 = vector.extract_strided_slice %18 {offsets = [8, 0], sizes = [1, 32], strides = [1, 1]} : vector<16x32xf32> to vector<1x32xf32>
    %270 = vector.broadcast %269 : vector<1x32xf32> to vector<16x32xf32>
    %271 = arith.addf %268, %270 : vector<16x32xf32>
    %272 = arith.addf %262, %271 : vector<16x32xf32>
    %273 = vector.extract_strided_slice %18 {offsets = [13, 0], sizes = [1, 32], strides = [1, 1]} : vector<16x32xf32> to vector<1x32xf32>
    %274 = vector.extract_strided_slice %18 {offsets = [14, 0], sizes = [1, 32], strides = [1, 1]} : vector<16x32xf32> to vector<1x32xf32>
    %cst_88 = arith.constant dense<0.000000e+00> : vector<16xf32>
    %275 = vector.multi_reduction <add>, %272, %cst_88 [1] : vector<16x32xf32> to vector<16xf32>
    %276 = vector.shape_cast %275 : vector<16xf32> to vector<16x1xf32>
    %cst_89 = arith.constant 3.200000e+01 : f32
    %277 = vector.broadcast %cst_89 : f32 to vector<16x1xf32>
    %278 = arith.divf %276, %277 : vector<16x1xf32>
    %279 = vector.broadcast %278 : vector<16x1xf32> to vector<16x32xf32>
    %280 = arith.subf %272, %279 : vector<16x32xf32>
    %281 = arith.mulf %280, %280 : vector<16x32xf32>
    %cst_90 = arith.constant dense<0.000000e+00> : vector<16xf32>
    %282 = vector.multi_reduction <add>, %281, %cst_90 [1] : vector<16x32xf32> to vector<16xf32>
    %283 = vector.shape_cast %282 : vector<16xf32> to vector<16x1xf32>
    %cst_91 = arith.constant 3.200000e+01 : f32
    %284 = vector.broadcast %cst_91 : f32 to vector<16x1xf32>
    %285 = arith.divf %283, %284 : vector<16x1xf32>
    %286 = vector.broadcast %278 : vector<16x1xf32> to vector<16x32xf32>
    %287 = arith.subf %272, %286 : vector<16x32xf32>
    %cst_92 = arith.constant 9.99999974E-6 : f32
    %288 = vector.broadcast %cst_92 : f32 to vector<16x1xf32>
    %289 = arith.addf %285, %288 : vector<16x1xf32>
    %290 = math.rsqrt %289 : vector<16x1xf32>
    %291 = vector.broadcast %290 : vector<16x1xf32> to vector<16x32xf32>
    %292 = arith.mulf %287, %291 : vector<16x32xf32>
    %293 = vector.broadcast %273 : vector<1x32xf32> to vector<16x32xf32>
    %294 = arith.mulf %292, %293 : vector<16x32xf32>
    %295 = vector.broadcast %274 : vector<1x32xf32> to vector<16x32xf32>
    %296 = arith.addf %294, %295 : vector<16x32xf32>
    %c1 = arith.constant 1 : index
    %c0_93 = arith.constant 0 : index
    %c0_94 = arith.constant 0 : index
    %297 = vector.load %arg6[%c1, %c0_93, %c0_94] : memref<2x32x128xf32, #tpu.memory_space<vmem>>, vector<1x32x128xf32>
    %298 = vector.shape_cast %297 : vector<1x32x128xf32> to vector<32x128xf32>
    %c1_95 = arith.constant 1 : index
    %c0_96 = arith.constant 0 : index
    %c0_97 = arith.constant 0 : index
    %299 = vector.load %arg7[%c1_95, %c0_96, %c0_97] : memref<2x32x128xf32, #tpu.memory_space<vmem>>, vector<1x32x128xf32>
    %300 = vector.shape_cast %299 : vector<1x32x128xf32> to vector<32x128xf32>
    %c1_98 = arith.constant 1 : index
    %c0_99 = arith.constant 0 : index
    %c0_100 = arith.constant 0 : index
    %301 = vector.load %arg8[%c1_98, %c0_99, %c0_100] : memref<2x32x64xf32, #tpu.memory_space<vmem>>, vector<1x32x64xf32>
    %302 = vector.shape_cast %301 : vector<1x32x64xf32> to vector<32x64xf32>
    %c1_101 = arith.constant 1 : index
    %c0_102 = arith.constant 0 : index
    %c0_103 = arith.constant 0 : index
    %303 = vector.load %arg9[%c1_101, %c0_102, %c0_103] : memref<2x1x64xf32, #tpu.memory_space<vmem>>, vector<1x1x64xf32>
    %304 = vector.shape_cast %303 : vector<1x1x64xf32> to vector<1x64xf32>
    %c1_104 = arith.constant 1 : index
    %c0_105 = arith.constant 0 : index
    %c0_106 = arith.constant 0 : index
    %305 = vector.load %arg10[%c1_104, %c0_105, %c0_106] : memref<2x64x32xf32, #tpu.memory_space<vmem>>, vector<1x64x32xf32>
    %306 = vector.shape_cast %305 : vector<1x64x32xf32> to vector<64x32xf32>
    %c1_107 = arith.constant 1 : index
    %c0_108 = arith.constant 0 : index
    %c0_109 = arith.constant 0 : index
    %307 = vector.load %arg11[%c1_107, %c0_108, %c0_109] : memref<2x16x32xf32, #tpu.memory_space<vmem>>, vector<1x16x32xf32>
    %308 = vector.shape_cast %307 : vector<1x16x32xf32> to vector<16x32xf32>
    %309 = arith.addf %296, %1 : vector<16x32xf32>
    %310 = vector.extract_strided_slice %308 {offsets = [0, 0], sizes = [4, 32], strides = [1, 1]} : vector<16x32xf32> to vector<4x32xf32>
    %311 = vector.extract_strided_slice %298 {offsets = [0, 0], sizes = [32, 64], strides = [1, 1]} : vector<32x128xf32> to vector<32x64xf32>
    %cst_110 = arith.constant dense<0.000000e+00> : vector<16x64xf32>
    %312 = tpu.matmul %309, %311, %cst_110 {dimension_numbers = #tpu.dot_dimension_numbers<[1], [0], [0], [1], [0, 0, 1, 1], [], []>} : vector<16x32xf32>, vector<32x64xf32>, vector<16x64xf32> -> vector<16x64xf32>
    %313 = vector.extract_strided_slice %312 {offsets = [0, 0], sizes = [16, 32], strides = [1, 1]} : vector<16x64xf32> to vector<16x32xf32>
    %314 = vector.extract_strided_slice %310 {offsets = [0, 0], sizes = [1, 32], strides = [1, 1]} : vector<4x32xf32> to vector<1x32xf32>
    %315 = vector.broadcast %314 : vector<1x32xf32> to vector<16x32xf32>
    %316 = arith.addf %313, %315 : vector<16x32xf32>
    %cst_111 = arith.constant 0.353553385 : f32
    %317 = vector.broadcast %cst_111 : f32 to vector<16x32xf32>
    %318 = arith.mulf %316, %317 : vector<16x32xf32>
    %319 = vector.extract_strided_slice %312 {offsets = [0, 32], sizes = [16, 32], strides = [1, 1]} : vector<16x64xf32> to vector<16x32xf32>
    %320 = vector.extract_strided_slice %310 {offsets = [1, 0], sizes = [1, 32], strides = [1, 1]} : vector<4x32xf32> to vector<1x32xf32>
    %321 = vector.broadcast %320 : vector<1x32xf32> to vector<16x32xf32>
    %322 = arith.addf %319, %321 : vector<16x32xf32>
    %323 = vector.extract_strided_slice %298 {offsets = [0, 64], sizes = [32, 32], strides = [1, 1]} : vector<32x128xf32> to vector<32x32xf32>
    %cst_112 = arith.constant dense<0.000000e+00> : vector<16x32xf32>
    %324 = tpu.matmul %296, %323, %cst_112 {dimension_numbers = #tpu.dot_dimension_numbers<[1], [0], [0], [1], [0, 0, 1, 1], [], []>} : vector<16x32xf32>, vector<32x32xf32>, vector<16x32xf32> -> vector<16x32xf32>
    %325 = vector.extract_strided_slice %310 {offsets = [2, 0], sizes = [1, 32], strides = [1, 1]} : vector<4x32xf32> to vector<1x32xf32>
    %326 = vector.broadcast %325 : vector<1x32xf32> to vector<16x32xf32>
    %327 = arith.addf %324, %326 : vector<16x32xf32>
    %328 = vector.extract_strided_slice %318 {offsets = [0, 0], sizes = [16, 8], strides = [1, 1]} : vector<16x32xf32> to vector<16x8xf32>
    %329 = vector.extract_strided_slice %322 {offsets = [0, 0], sizes = [16, 8], strides = [1, 1]} : vector<16x32xf32> to vector<16x8xf32>
    %cst_113 = arith.constant dense<0.000000e+00> : vector<16x16xf32>
    %330 = tpu.matmul %328, %329, %cst_113 {dimension_numbers = #tpu.dot_dimension_numbers<[1], [1], [0], [0], [0, 0, 1, 0], [], []>} : vector<16x8xf32>, vector<16x8xf32>, vector<16x16xf32> -> vector<16x16xf32>
    %331 = arith.addf %330, %5 : vector<16x16xf32>
    %cst_114 = arith.constant dense<0xFF800000> : vector<16xf32>
    %332 = vector.multi_reduction <maximumf>, %331, %cst_114 [1] : vector<16x16xf32> to vector<16xf32>
    %333 = vector.shape_cast %332 : vector<16xf32> to vector<16x1xf32>
    %334 = vector.broadcast %333 : vector<16x1xf32> to vector<16x16xf32>
    %335 = arith.subf %331, %334 : vector<16x16xf32>
    %336 = math.exp %335 : vector<16x16xf32>
    %cst_115 = arith.constant dense<0.000000e+00> : vector<16xf32>
    %337 = vector.multi_reduction <add>, %336, %cst_115 [1] : vector<16x16xf32> to vector<16xf32>
    %338 = vector.shape_cast %337 : vector<16xf32> to vector<16x1xf32>
    %339 = tpu.reciprocal %338 {approx = true} : vector<16x1xf32> -> vector<16x1xf32>
    %340 = vector.broadcast %339 : vector<16x1xf32> to vector<16x16xf32>
    %341 = arith.mulf %336, %340 : vector<16x16xf32>
    %342 = vector.extract_strided_slice %327 {offsets = [0, 0], sizes = [16, 8], strides = [1, 1]} : vector<16x32xf32> to vector<16x8xf32>
    %cst_116 = arith.constant dense<0.000000e+00> : vector<16x8xf32>
    %343 = tpu.matmul %341, %342, %cst_116 {dimension_numbers = #tpu.dot_dimension_numbers<[1], [0], [0], [1], [0, 0, 1, 1], [], []>} : vector<16x16xf32>, vector<16x8xf32>, vector<16x8xf32> -> vector<16x8xf32>
    %344 = vector.extract_strided_slice %298 {offsets = [0, 96], sizes = [8, 32], strides = [1, 1]} : vector<32x128xf32> to vector<8x32xf32>
    %cst_117 = arith.constant dense<0.000000e+00> : vector<16x32xf32>
    %345 = tpu.matmul %343, %344, %cst_117 {dimension_numbers = #tpu.dot_dimension_numbers<[1], [0], [0], [1], [0, 0, 1, 1], [], []>} : vector<16x8xf32>, vector<8x32xf32>, vector<16x32xf32> -> vector<16x32xf32>
    %346 = vector.extract_strided_slice %318 {offsets = [0, 8], sizes = [16, 8], strides = [1, 1]} : vector<16x32xf32> to vector<16x8xf32>
    %347 = vector.extract_strided_slice %322 {offsets = [0, 8], sizes = [16, 8], strides = [1, 1]} : vector<16x32xf32> to vector<16x8xf32>
    %cst_118 = arith.constant dense<0.000000e+00> : vector<16x16xf32>
    %348 = tpu.matmul %346, %347, %cst_118 {dimension_numbers = #tpu.dot_dimension_numbers<[1], [1], [0], [0], [0, 0, 1, 0], [], []>} : vector<16x8xf32>, vector<16x8xf32>, vector<16x16xf32> -> vector<16x16xf32>
    %349 = arith.addf %348, %5 : vector<16x16xf32>
    %cst_119 = arith.constant dense<0xFF800000> : vector<16xf32>
    %350 = vector.multi_reduction <maximumf>, %349, %cst_119 [1] : vector<16x16xf32> to vector<16xf32>
    %351 = vector.shape_cast %350 : vector<16xf32> to vector<16x1xf32>
    %352 = vector.broadcast %351 : vector<16x1xf32> to vector<16x16xf32>
    %353 = arith.subf %349, %352 : vector<16x16xf32>
    %354 = math.exp %353 : vector<16x16xf32>
    %cst_120 = arith.constant dense<0.000000e+00> : vector<16xf32>
    %355 = vector.multi_reduction <add>, %354, %cst_120 [1] : vector<16x16xf32> to vector<16xf32>
    %356 = vector.shape_cast %355 : vector<16xf32> to vector<16x1xf32>
    %357 = tpu.reciprocal %356 {approx = true} : vector<16x1xf32> -> vector<16x1xf32>
    %358 = vector.broadcast %357 : vector<16x1xf32> to vector<16x16xf32>
    %359 = arith.mulf %354, %358 : vector<16x16xf32>
    %360 = vector.extract_strided_slice %327 {offsets = [0, 8], sizes = [16, 8], strides = [1, 1]} : vector<16x32xf32> to vector<16x8xf32>
    %cst_121 = arith.constant dense<0.000000e+00> : vector<16x8xf32>
    %361 = tpu.matmul %359, %360, %cst_121 {dimension_numbers = #tpu.dot_dimension_numbers<[1], [0], [0], [1], [0, 0, 1, 1], [], []>} : vector<16x16xf32>, vector<16x8xf32>, vector<16x8xf32> -> vector<16x8xf32>
    %362 = vector.extract_strided_slice %298 {offsets = [8, 96], sizes = [8, 32], strides = [1, 1]} : vector<32x128xf32> to vector<8x32xf32>
    %cst_122 = arith.constant dense<0.000000e+00> : vector<16x32xf32>
    %363 = tpu.matmul %361, %362, %cst_122 {dimension_numbers = #tpu.dot_dimension_numbers<[1], [0], [0], [1], [0, 0, 1, 1], [], []>} : vector<16x8xf32>, vector<8x32xf32>, vector<16x32xf32> -> vector<16x32xf32>
    %364 = arith.addf %345, %363 : vector<16x32xf32>
    %365 = vector.extract_strided_slice %318 {offsets = [0, 16], sizes = [16, 8], strides = [1, 1]} : vector<16x32xf32> to vector<16x8xf32>
    %366 = vector.extract_strided_slice %322 {offsets = [0, 16], sizes = [16, 8], strides = [1, 1]} : vector<16x32xf32> to vector<16x8xf32>
    %cst_123 = arith.constant dense<0.000000e+00> : vector<16x16xf32>
    %367 = tpu.matmul %365, %366, %cst_123 {dimension_numbers = #tpu.dot_dimension_numbers<[1], [1], [0], [0], [0, 0, 1, 0], [], []>} : vector<16x8xf32>, vector<16x8xf32>, vector<16x16xf32> -> vector<16x16xf32>
    %368 = arith.addf %367, %5 : vector<16x16xf32>
    %cst_124 = arith.constant dense<0xFF800000> : vector<16xf32>
    %369 = vector.multi_reduction <maximumf>, %368, %cst_124 [1] : vector<16x16xf32> to vector<16xf32>
    %370 = vector.shape_cast %369 : vector<16xf32> to vector<16x1xf32>
    %371 = vector.broadcast %370 : vector<16x1xf32> to vector<16x16xf32>
    %372 = arith.subf %368, %371 : vector<16x16xf32>
    %373 = math.exp %372 : vector<16x16xf32>
    %cst_125 = arith.constant dense<0.000000e+00> : vector<16xf32>
    %374 = vector.multi_reduction <add>, %373, %cst_125 [1] : vector<16x16xf32> to vector<16xf32>
    %375 = vector.shape_cast %374 : vector<16xf32> to vector<16x1xf32>
    %376 = tpu.reciprocal %375 {approx = true} : vector<16x1xf32> -> vector<16x1xf32>
    %377 = vector.broadcast %376 : vector<16x1xf32> to vector<16x16xf32>
    %378 = arith.mulf %373, %377 : vector<16x16xf32>
    %379 = vector.extract_strided_slice %327 {offsets = [0, 16], sizes = [16, 8], strides = [1, 1]} : vector<16x32xf32> to vector<16x8xf32>
    %cst_126 = arith.constant dense<0.000000e+00> : vector<16x8xf32>
    %380 = tpu.matmul %378, %379, %cst_126 {dimension_numbers = #tpu.dot_dimension_numbers<[1], [0], [0], [1], [0, 0, 1, 1], [], []>} : vector<16x16xf32>, vector<16x8xf32>, vector<16x8xf32> -> vector<16x8xf32>
    %381 = vector.extract_strided_slice %298 {offsets = [16, 96], sizes = [8, 32], strides = [1, 1]} : vector<32x128xf32> to vector<8x32xf32>
    %cst_127 = arith.constant dense<0.000000e+00> : vector<16x32xf32>
    %382 = tpu.matmul %380, %381, %cst_127 {dimension_numbers = #tpu.dot_dimension_numbers<[1], [0], [0], [1], [0, 0, 1, 1], [], []>} : vector<16x8xf32>, vector<8x32xf32>, vector<16x32xf32> -> vector<16x32xf32>
    %383 = arith.addf %364, %382 : vector<16x32xf32>
    %384 = vector.extract_strided_slice %318 {offsets = [0, 24], sizes = [16, 8], strides = [1, 1]} : vector<16x32xf32> to vector<16x8xf32>
    %385 = vector.extract_strided_slice %322 {offsets = [0, 24], sizes = [16, 8], strides = [1, 1]} : vector<16x32xf32> to vector<16x8xf32>
    %cst_128 = arith.constant dense<0.000000e+00> : vector<16x16xf32>
    %386 = tpu.matmul %384, %385, %cst_128 {dimension_numbers = #tpu.dot_dimension_numbers<[1], [1], [0], [0], [0, 0, 1, 0], [], []>} : vector<16x8xf32>, vector<16x8xf32>, vector<16x16xf32> -> vector<16x16xf32>
    %387 = arith.addf %386, %5 : vector<16x16xf32>
    %cst_129 = arith.constant dense<0xFF800000> : vector<16xf32>
    %388 = vector.multi_reduction <maximumf>, %387, %cst_129 [1] : vector<16x16xf32> to vector<16xf32>
    %389 = vector.shape_cast %388 : vector<16xf32> to vector<16x1xf32>
    %390 = vector.broadcast %389 : vector<16x1xf32> to vector<16x16xf32>
    %391 = arith.subf %387, %390 : vector<16x16xf32>
    %392 = math.exp %391 : vector<16x16xf32>
    %cst_130 = arith.constant dense<0.000000e+00> : vector<16xf32>
    %393 = vector.multi_reduction <add>, %392, %cst_130 [1] : vector<16x16xf32> to vector<16xf32>
    %394 = vector.shape_cast %393 : vector<16xf32> to vector<16x1xf32>
    %395 = tpu.reciprocal %394 {approx = true} : vector<16x1xf32> -> vector<16x1xf32>
    %396 = vector.broadcast %395 : vector<16x1xf32> to vector<16x16xf32>
    %397 = arith.mulf %392, %396 : vector<16x16xf32>
    %398 = vector.extract_strided_slice %327 {offsets = [0, 24], sizes = [16, 8], strides = [1, 1]} : vector<16x32xf32> to vector<16x8xf32>
    %cst_131 = arith.constant dense<0.000000e+00> : vector<16x8xf32>
    %399 = tpu.matmul %397, %398, %cst_131 {dimension_numbers = #tpu.dot_dimension_numbers<[1], [0], [0], [1], [0, 0, 1, 1], [], []>} : vector<16x16xf32>, vector<16x8xf32>, vector<16x8xf32> -> vector<16x8xf32>
    %400 = vector.extract_strided_slice %298 {offsets = [24, 96], sizes = [8, 32], strides = [1, 1]} : vector<32x128xf32> to vector<8x32xf32>
    %cst_132 = arith.constant dense<0.000000e+00> : vector<16x32xf32>
    %401 = tpu.matmul %399, %400, %cst_132 {dimension_numbers = #tpu.dot_dimension_numbers<[1], [0], [0], [1], [0, 0, 1, 1], [], []>} : vector<16x8xf32>, vector<8x32xf32>, vector<16x32xf32> -> vector<16x32xf32>
    %402 = arith.addf %383, %401 : vector<16x32xf32>
    %403 = vector.extract_strided_slice %310 {offsets = [3, 0], sizes = [1, 32], strides = [1, 1]} : vector<4x32xf32> to vector<1x32xf32>
    %404 = vector.broadcast %403 : vector<1x32xf32> to vector<16x32xf32>
    %405 = arith.addf %402, %404 : vector<16x32xf32>
    %406 = arith.addf %296, %405 : vector<16x32xf32>
    %407 = vector.extract_strided_slice %308 {offsets = [9, 0], sizes = [1, 32], strides = [1, 1]} : vector<16x32xf32> to vector<1x32xf32>
    %408 = vector.extract_strided_slice %308 {offsets = [10, 0], sizes = [1, 32], strides = [1, 1]} : vector<16x32xf32> to vector<1x32xf32>
    %cst_133 = arith.constant dense<0.000000e+00> : vector<16xf32>
    %409 = vector.multi_reduction <add>, %406, %cst_133 [1] : vector<16x32xf32> to vector<16xf32>
    %410 = vector.shape_cast %409 : vector<16xf32> to vector<16x1xf32>
    %cst_134 = arith.constant 3.200000e+01 : f32
    %411 = vector.broadcast %cst_134 : f32 to vector<16x1xf32>
    %412 = arith.divf %410, %411 : vector<16x1xf32>
    %413 = vector.broadcast %412 : vector<16x1xf32> to vector<16x32xf32>
    %414 = arith.subf %406, %413 : vector<16x32xf32>
    %415 = arith.mulf %414, %414 : vector<16x32xf32>
    %cst_135 = arith.constant dense<0.000000e+00> : vector<16xf32>
    %416 = vector.multi_reduction <add>, %415, %cst_135 [1] : vector<16x32xf32> to vector<16xf32>
    %417 = vector.shape_cast %416 : vector<16xf32> to vector<16x1xf32>
    %cst_136 = arith.constant 3.200000e+01 : f32
    %418 = vector.broadcast %cst_136 : f32 to vector<16x1xf32>
    %419 = arith.divf %417, %418 : vector<16x1xf32>
    %420 = vector.broadcast %412 : vector<16x1xf32> to vector<16x32xf32>
    %421 = arith.subf %406, %420 : vector<16x32xf32>
    %cst_137 = arith.constant 9.99999974E-6 : f32
    %422 = vector.broadcast %cst_137 : f32 to vector<16x1xf32>
    %423 = arith.addf %419, %422 : vector<16x1xf32>
    %424 = math.rsqrt %423 : vector<16x1xf32>
    %425 = vector.broadcast %424 : vector<16x1xf32> to vector<16x32xf32>
    %426 = arith.mulf %421, %425 : vector<16x32xf32>
    %427 = vector.broadcast %407 : vector<1x32xf32> to vector<16x32xf32>
    %428 = arith.mulf %426, %427 : vector<16x32xf32>
    %429 = vector.broadcast %408 : vector<1x32xf32> to vector<16x32xf32>
    %430 = arith.addf %428, %429 : vector<16x32xf32>
    %431 = arith.addf %430, %1 : vector<16x32xf32>
    %432 = vector.extract_strided_slice %308 {offsets = [4, 0], sizes = [4, 32], strides = [1, 1]} : vector<16x32xf32> to vector<4x32xf32>
    %433 = vector.extract_strided_slice %300 {offsets = [0, 0], sizes = [32, 32], strides = [1, 1]} : vector<32x128xf32> to vector<32x32xf32>
    %cst_138 = arith.constant dense<0.000000e+00> : vector<16x32xf32>
    %434 = tpu.matmul %431, %433, %cst_138 {dimension_numbers = #tpu.dot_dimension_numbers<[1], [0], [0], [1], [0, 0, 1, 1], [], []>} : vector<16x32xf32>, vector<32x32xf32>, vector<16x32xf32> -> vector<16x32xf32>
    %435 = vector.extract_strided_slice %432 {offsets = [0, 0], sizes = [1, 32], strides = [1, 1]} : vector<4x32xf32> to vector<1x32xf32>
    %436 = vector.broadcast %435 : vector<1x32xf32> to vector<16x32xf32>
    %437 = arith.addf %434, %436 : vector<16x32xf32>
    %cst_139 = arith.constant 0.353553385 : f32
    %438 = vector.broadcast %cst_139 : f32 to vector<16x32xf32>
    %439 = arith.mulf %437, %438 : vector<16x32xf32>
    %440 = vector.extract_strided_slice %300 {offsets = [0, 32], sizes = [32, 32], strides = [1, 1]} : vector<32x128xf32> to vector<32x32xf32>
    %cst_140 = arith.constant dense<0.000000e+00> : vector<32x32xf32>
    %441 = tpu.matmul %4, %440, %cst_140 {dimension_numbers = #tpu.dot_dimension_numbers<[1], [0], [0], [1], [0, 0, 1, 1], [], []>} : vector<32x32xf32>, vector<32x32xf32>, vector<32x32xf32> -> vector<32x32xf32>
    %442 = vector.extract_strided_slice %432 {offsets = [1, 0], sizes = [1, 32], strides = [1, 1]} : vector<4x32xf32> to vector<1x32xf32>
    %443 = vector.broadcast %442 : vector<1x32xf32> to vector<32x32xf32>
    %444 = arith.addf %441, %443 : vector<32x32xf32>
    %445 = vector.extract_strided_slice %300 {offsets = [0, 64], sizes = [32, 32], strides = [1, 1]} : vector<32x128xf32> to vector<32x32xf32>
    %cst_141 = arith.constant dense<0.000000e+00> : vector<32x32xf32>
    %446 = tpu.matmul %2, %445, %cst_141 {dimension_numbers = #tpu.dot_dimension_numbers<[1], [0], [0], [1], [0, 0, 1, 1], [], []>} : vector<32x32xf32>, vector<32x32xf32>, vector<32x32xf32> -> vector<32x32xf32>
    %447 = vector.extract_strided_slice %432 {offsets = [2, 0], sizes = [1, 32], strides = [1, 1]} : vector<4x32xf32> to vector<1x32xf32>
    %448 = vector.broadcast %447 : vector<1x32xf32> to vector<32x32xf32>
    %449 = arith.addf %446, %448 : vector<32x32xf32>
    %450 = vector.extract_strided_slice %439 {offsets = [0, 0], sizes = [16, 8], strides = [1, 1]} : vector<16x32xf32> to vector<16x8xf32>
    %451 = vector.extract_strided_slice %444 {offsets = [0, 0], sizes = [32, 8], strides = [1, 1]} : vector<32x32xf32> to vector<32x8xf32>
    %cst_142 = arith.constant dense<0.000000e+00> : vector<16x32xf32>
    %452 = tpu.matmul %450, %451, %cst_142 {dimension_numbers = #tpu.dot_dimension_numbers<[1], [1], [0], [0], [0, 0, 1, 0], [], []>} : vector<16x8xf32>, vector<32x8xf32>, vector<16x32xf32> -> vector<16x32xf32>
    %453 = arith.addf %452, %6 : vector<16x32xf32>
    %cst_143 = arith.constant dense<0xFF800000> : vector<16xf32>
    %454 = vector.multi_reduction <maximumf>, %453, %cst_143 [1] : vector<16x32xf32> to vector<16xf32>
    %455 = vector.shape_cast %454 : vector<16xf32> to vector<16x1xf32>
    %456 = vector.broadcast %455 : vector<16x1xf32> to vector<16x32xf32>
    %457 = arith.subf %453, %456 : vector<16x32xf32>
    %458 = math.exp %457 : vector<16x32xf32>
    %cst_144 = arith.constant dense<0.000000e+00> : vector<16xf32>
    %459 = vector.multi_reduction <add>, %458, %cst_144 [1] : vector<16x32xf32> to vector<16xf32>
    %460 = vector.shape_cast %459 : vector<16xf32> to vector<16x1xf32>
    %461 = tpu.reciprocal %460 {approx = true} : vector<16x1xf32> -> vector<16x1xf32>
    %462 = vector.broadcast %461 : vector<16x1xf32> to vector<16x32xf32>
    %463 = arith.mulf %458, %462 : vector<16x32xf32>
    %464 = vector.extract_strided_slice %449 {offsets = [0, 0], sizes = [32, 8], strides = [1, 1]} : vector<32x32xf32> to vector<32x8xf32>
    %cst_145 = arith.constant dense<0.000000e+00> : vector<16x8xf32>
    %465 = tpu.matmul %463, %464, %cst_145 {dimension_numbers = #tpu.dot_dimension_numbers<[1], [0], [0], [1], [0, 0, 1, 1], [], []>} : vector<16x32xf32>, vector<32x8xf32>, vector<16x8xf32> -> vector<16x8xf32>
    %466 = vector.extract_strided_slice %300 {offsets = [0, 96], sizes = [8, 32], strides = [1, 1]} : vector<32x128xf32> to vector<8x32xf32>
    %cst_146 = arith.constant dense<0.000000e+00> : vector<16x32xf32>
    %467 = tpu.matmul %465, %466, %cst_146 {dimension_numbers = #tpu.dot_dimension_numbers<[1], [0], [0], [1], [0, 0, 1, 1], [], []>} : vector<16x8xf32>, vector<8x32xf32>, vector<16x32xf32> -> vector<16x32xf32>
    %468 = vector.extract_strided_slice %439 {offsets = [0, 8], sizes = [16, 8], strides = [1, 1]} : vector<16x32xf32> to vector<16x8xf32>
    %469 = vector.extract_strided_slice %444 {offsets = [0, 8], sizes = [32, 8], strides = [1, 1]} : vector<32x32xf32> to vector<32x8xf32>
    %cst_147 = arith.constant dense<0.000000e+00> : vector<16x32xf32>
    %470 = tpu.matmul %468, %469, %cst_147 {dimension_numbers = #tpu.dot_dimension_numbers<[1], [1], [0], [0], [0, 0, 1, 0], [], []>} : vector<16x8xf32>, vector<32x8xf32>, vector<16x32xf32> -> vector<16x32xf32>
    %471 = arith.addf %470, %6 : vector<16x32xf32>
    %cst_148 = arith.constant dense<0xFF800000> : vector<16xf32>
    %472 = vector.multi_reduction <maximumf>, %471, %cst_148 [1] : vector<16x32xf32> to vector<16xf32>
    %473 = vector.shape_cast %472 : vector<16xf32> to vector<16x1xf32>
    %474 = vector.broadcast %473 : vector<16x1xf32> to vector<16x32xf32>
    %475 = arith.subf %471, %474 : vector<16x32xf32>
    %476 = math.exp %475 : vector<16x32xf32>
    %cst_149 = arith.constant dense<0.000000e+00> : vector<16xf32>
    %477 = vector.multi_reduction <add>, %476, %cst_149 [1] : vector<16x32xf32> to vector<16xf32>
    %478 = vector.shape_cast %477 : vector<16xf32> to vector<16x1xf32>
    %479 = tpu.reciprocal %478 {approx = true} : vector<16x1xf32> -> vector<16x1xf32>
    %480 = vector.broadcast %479 : vector<16x1xf32> to vector<16x32xf32>
    %481 = arith.mulf %476, %480 : vector<16x32xf32>
    %482 = vector.extract_strided_slice %449 {offsets = [0, 8], sizes = [32, 8], strides = [1, 1]} : vector<32x32xf32> to vector<32x8xf32>
    %cst_150 = arith.constant dense<0.000000e+00> : vector<16x8xf32>
    %483 = tpu.matmul %481, %482, %cst_150 {dimension_numbers = #tpu.dot_dimension_numbers<[1], [0], [0], [1], [0, 0, 1, 1], [], []>} : vector<16x32xf32>, vector<32x8xf32>, vector<16x8xf32> -> vector<16x8xf32>
    %484 = vector.extract_strided_slice %300 {offsets = [8, 96], sizes = [8, 32], strides = [1, 1]} : vector<32x128xf32> to vector<8x32xf32>
    %cst_151 = arith.constant dense<0.000000e+00> : vector<16x32xf32>
    %485 = tpu.matmul %483, %484, %cst_151 {dimension_numbers = #tpu.dot_dimension_numbers<[1], [0], [0], [1], [0, 0, 1, 1], [], []>} : vector<16x8xf32>, vector<8x32xf32>, vector<16x32xf32> -> vector<16x32xf32>
    %486 = arith.addf %467, %485 : vector<16x32xf32>
    %487 = vector.extract_strided_slice %439 {offsets = [0, 16], sizes = [16, 8], strides = [1, 1]} : vector<16x32xf32> to vector<16x8xf32>
    %488 = vector.extract_strided_slice %444 {offsets = [0, 16], sizes = [32, 8], strides = [1, 1]} : vector<32x32xf32> to vector<32x8xf32>
    %cst_152 = arith.constant dense<0.000000e+00> : vector<16x32xf32>
    %489 = tpu.matmul %487, %488, %cst_152 {dimension_numbers = #tpu.dot_dimension_numbers<[1], [1], [0], [0], [0, 0, 1, 0], [], []>} : vector<16x8xf32>, vector<32x8xf32>, vector<16x32xf32> -> vector<16x32xf32>
    %490 = arith.addf %489, %6 : vector<16x32xf32>
    %cst_153 = arith.constant dense<0xFF800000> : vector<16xf32>
    %491 = vector.multi_reduction <maximumf>, %490, %cst_153 [1] : vector<16x32xf32> to vector<16xf32>
    %492 = vector.shape_cast %491 : vector<16xf32> to vector<16x1xf32>
    %493 = vector.broadcast %492 : vector<16x1xf32> to vector<16x32xf32>
    %494 = arith.subf %490, %493 : vector<16x32xf32>
    %495 = math.exp %494 : vector<16x32xf32>
    %cst_154 = arith.constant dense<0.000000e+00> : vector<16xf32>
    %496 = vector.multi_reduction <add>, %495, %cst_154 [1] : vector<16x32xf32> to vector<16xf32>
    %497 = vector.shape_cast %496 : vector<16xf32> to vector<16x1xf32>
    %498 = tpu.reciprocal %497 {approx = true} : vector<16x1xf32> -> vector<16x1xf32>
    %499 = vector.broadcast %498 : vector<16x1xf32> to vector<16x32xf32>
    %500 = arith.mulf %495, %499 : vector<16x32xf32>
    %501 = vector.extract_strided_slice %449 {offsets = [0, 16], sizes = [32, 8], strides = [1, 1]} : vector<32x32xf32> to vector<32x8xf32>
    %cst_155 = arith.constant dense<0.000000e+00> : vector<16x8xf32>
    %502 = tpu.matmul %500, %501, %cst_155 {dimension_numbers = #tpu.dot_dimension_numbers<[1], [0], [0], [1], [0, 0, 1, 1], [], []>} : vector<16x32xf32>, vector<32x8xf32>, vector<16x8xf32> -> vector<16x8xf32>
    %503 = vector.extract_strided_slice %300 {offsets = [16, 96], sizes = [8, 32], strides = [1, 1]} : vector<32x128xf32> to vector<8x32xf32>
    %cst_156 = arith.constant dense<0.000000e+00> : vector<16x32xf32>
    %504 = tpu.matmul %502, %503, %cst_156 {dimension_numbers = #tpu.dot_dimension_numbers<[1], [0], [0], [1], [0, 0, 1, 1], [], []>} : vector<16x8xf32>, vector<8x32xf32>, vector<16x32xf32> -> vector<16x32xf32>
    %505 = arith.addf %486, %504 : vector<16x32xf32>
    %506 = vector.extract_strided_slice %439 {offsets = [0, 24], sizes = [16, 8], strides = [1, 1]} : vector<16x32xf32> to vector<16x8xf32>
    %507 = vector.extract_strided_slice %444 {offsets = [0, 24], sizes = [32, 8], strides = [1, 1]} : vector<32x32xf32> to vector<32x8xf32>
    %cst_157 = arith.constant dense<0.000000e+00> : vector<16x32xf32>
    %508 = tpu.matmul %506, %507, %cst_157 {dimension_numbers = #tpu.dot_dimension_numbers<[1], [1], [0], [0], [0, 0, 1, 0], [], []>} : vector<16x8xf32>, vector<32x8xf32>, vector<16x32xf32> -> vector<16x32xf32>
    %509 = arith.addf %508, %6 : vector<16x32xf32>
    %cst_158 = arith.constant dense<0xFF800000> : vector<16xf32>
    %510 = vector.multi_reduction <maximumf>, %509, %cst_158 [1] : vector<16x32xf32> to vector<16xf32>
    %511 = vector.shape_cast %510 : vector<16xf32> to vector<16x1xf32>
    %512 = vector.broadcast %511 : vector<16x1xf32> to vector<16x32xf32>
    %513 = arith.subf %509, %512 : vector<16x32xf32>
    %514 = math.exp %513 : vector<16x32xf32>
    %cst_159 = arith.constant dense<0.000000e+00> : vector<16xf32>
    %515 = vector.multi_reduction <add>, %514, %cst_159 [1] : vector<16x32xf32> to vector<16xf32>
    %516 = vector.shape_cast %515 : vector<16xf32> to vector<16x1xf32>
    %517 = tpu.reciprocal %516 {approx = true} : vector<16x1xf32> -> vector<16x1xf32>
    %518 = vector.broadcast %517 : vector<16x1xf32> to vector<16x32xf32>
    %519 = arith.mulf %514, %518 : vector<16x32xf32>
    %520 = vector.extract_strided_slice %449 {offsets = [0, 24], sizes = [32, 8], strides = [1, 1]} : vector<32x32xf32> to vector<32x8xf32>
    %cst_160 = arith.constant dense<0.000000e+00> : vector<16x8xf32>
    %521 = tpu.matmul %519, %520, %cst_160 {dimension_numbers = #tpu.dot_dimension_numbers<[1], [0], [0], [1], [0, 0, 1, 1], [], []>} : vector<16x32xf32>, vector<32x8xf32>, vector<16x8xf32> -> vector<16x8xf32>
    %522 = vector.extract_strided_slice %300 {offsets = [24, 96], sizes = [8, 32], strides = [1, 1]} : vector<32x128xf32> to vector<8x32xf32>
    %cst_161 = arith.constant dense<0.000000e+00> : vector<16x32xf32>
    %523 = tpu.matmul %521, %522, %cst_161 {dimension_numbers = #tpu.dot_dimension_numbers<[1], [0], [0], [1], [0, 0, 1, 1], [], []>} : vector<16x8xf32>, vector<8x32xf32>, vector<16x32xf32> -> vector<16x32xf32>
    %524 = arith.addf %505, %523 : vector<16x32xf32>
    %525 = vector.extract_strided_slice %432 {offsets = [3, 0], sizes = [1, 32], strides = [1, 1]} : vector<4x32xf32> to vector<1x32xf32>
    %526 = vector.broadcast %525 : vector<1x32xf32> to vector<16x32xf32>
    %527 = arith.addf %524, %526 : vector<16x32xf32>
    %528 = arith.addf %430, %527 : vector<16x32xf32>
    %529 = vector.extract_strided_slice %308 {offsets = [11, 0], sizes = [1, 32], strides = [1, 1]} : vector<16x32xf32> to vector<1x32xf32>
    %530 = vector.extract_strided_slice %308 {offsets = [12, 0], sizes = [1, 32], strides = [1, 1]} : vector<16x32xf32> to vector<1x32xf32>
    %cst_162 = arith.constant dense<0.000000e+00> : vector<16xf32>
    %531 = vector.multi_reduction <add>, %528, %cst_162 [1] : vector<16x32xf32> to vector<16xf32>
    %532 = vector.shape_cast %531 : vector<16xf32> to vector<16x1xf32>
    %cst_163 = arith.constant 3.200000e+01 : f32
    %533 = vector.broadcast %cst_163 : f32 to vector<16x1xf32>
    %534 = arith.divf %532, %533 : vector<16x1xf32>
    %535 = vector.broadcast %534 : vector<16x1xf32> to vector<16x32xf32>
    %536 = arith.subf %528, %535 : vector<16x32xf32>
    %537 = arith.mulf %536, %536 : vector<16x32xf32>
    %cst_164 = arith.constant dense<0.000000e+00> : vector<16xf32>
    %538 = vector.multi_reduction <add>, %537, %cst_164 [1] : vector<16x32xf32> to vector<16xf32>
    %539 = vector.shape_cast %538 : vector<16xf32> to vector<16x1xf32>
    %cst_165 = arith.constant 3.200000e+01 : f32
    %540 = vector.broadcast %cst_165 : f32 to vector<16x1xf32>
    %541 = arith.divf %539, %540 : vector<16x1xf32>
    %542 = vector.broadcast %534 : vector<16x1xf32> to vector<16x32xf32>
    %543 = arith.subf %528, %542 : vector<16x32xf32>
    %cst_166 = arith.constant 9.99999974E-6 : f32
    %544 = vector.broadcast %cst_166 : f32 to vector<16x1xf32>
    %545 = arith.addf %541, %544 : vector<16x1xf32>
    %546 = math.rsqrt %545 : vector<16x1xf32>
    %547 = vector.broadcast %546 : vector<16x1xf32> to vector<16x32xf32>
    %548 = arith.mulf %543, %547 : vector<16x32xf32>
    %549 = vector.broadcast %529 : vector<1x32xf32> to vector<16x32xf32>
    %550 = arith.mulf %548, %549 : vector<16x32xf32>
    %551 = vector.broadcast %530 : vector<1x32xf32> to vector<16x32xf32>
    %552 = arith.addf %550, %551 : vector<16x32xf32>
    %cst_167 = arith.constant dense<0.000000e+00> : vector<16x64xf32>
    %553 = tpu.matmul %552, %302, %cst_167 {dimension_numbers = #tpu.dot_dimension_numbers<[1], [0], [0], [1], [0, 0, 1, 1], [], []>} : vector<16x32xf32>, vector<32x64xf32>, vector<16x64xf32> -> vector<16x64xf32>
    %554 = vector.broadcast %304 : vector<1x64xf32> to vector<16x64xf32>
    %555 = arith.addf %553, %554 : vector<16x64xf32>
    %cst_168 = arith.constant 0.000000e+00 : f32
    %556 = vector.broadcast %cst_168 : f32 to vector<16x64xf32>
    %557 = arith.maximumf %555, %556 : vector<16x64xf32>
    %cst_169 = arith.constant dense<0.000000e+00> : vector<16x32xf32>
    %558 = tpu.matmul %557, %306, %cst_169 {dimension_numbers = #tpu.dot_dimension_numbers<[1], [0], [0], [1], [0, 0, 1, 1], [], []>} : vector<16x64xf32>, vector<64x32xf32>, vector<16x32xf32> -> vector<16x32xf32>
    %559 = vector.extract_strided_slice %308 {offsets = [8, 0], sizes = [1, 32], strides = [1, 1]} : vector<16x32xf32> to vector<1x32xf32>
    %560 = vector.broadcast %559 : vector<1x32xf32> to vector<16x32xf32>
    %561 = arith.addf %558, %560 : vector<16x32xf32>
    %562 = arith.addf %552, %561 : vector<16x32xf32>
    %563 = vector.extract_strided_slice %308 {offsets = [13, 0], sizes = [1, 32], strides = [1, 1]} : vector<16x32xf32> to vector<1x32xf32>
    %564 = vector.extract_strided_slice %308 {offsets = [14, 0], sizes = [1, 32], strides = [1, 1]} : vector<16x32xf32> to vector<1x32xf32>
    %cst_170 = arith.constant dense<0.000000e+00> : vector<16xf32>
    %565 = vector.multi_reduction <add>, %562, %cst_170 [1] : vector<16x32xf32> to vector<16xf32>
    %566 = vector.shape_cast %565 : vector<16xf32> to vector<16x1xf32>
    %cst_171 = arith.constant 3.200000e+01 : f32
    %567 = vector.broadcast %cst_171 : f32 to vector<16x1xf32>
    %568 = arith.divf %566, %567 : vector<16x1xf32>
    %569 = vector.broadcast %568 : vector<16x1xf32> to vector<16x32xf32>
    %570 = arith.subf %562, %569 : vector<16x32xf32>
    %571 = arith.mulf %570, %570 : vector<16x32xf32>
    %cst_172 = arith.constant dense<0.000000e+00> : vector<16xf32>
    %572 = vector.multi_reduction <add>, %571, %cst_172 [1] : vector<16x32xf32> to vector<16xf32>
    %573 = vector.shape_cast %572 : vector<16xf32> to vector<16x1xf32>
    %cst_173 = arith.constant 3.200000e+01 : f32
    %574 = vector.broadcast %cst_173 : f32 to vector<16x1xf32>
    %575 = arith.divf %573, %574 : vector<16x1xf32>
    %576 = vector.broadcast %568 : vector<16x1xf32> to vector<16x32xf32>
    %577 = arith.subf %562, %576 : vector<16x32xf32>
    %cst_174 = arith.constant 9.99999974E-6 : f32
    %578 = vector.broadcast %cst_174 : f32 to vector<16x1xf32>
    %579 = arith.addf %575, %578 : vector<16x1xf32>
    %580 = math.rsqrt %579 : vector<16x1xf32>
    %581 = vector.broadcast %580 : vector<16x1xf32> to vector<16x32xf32>
    %582 = arith.mulf %577, %581 : vector<16x32xf32>
    %583 = vector.broadcast %563 : vector<1x32xf32> to vector<16x32xf32>
    %584 = arith.mulf %582, %583 : vector<16x32xf32>
    %585 = vector.broadcast %564 : vector<1x32xf32> to vector<16x32xf32>
    %586 = arith.addf %584, %585 : vector<16x32xf32>
    %c0_175 = arith.constant 0 : index
    %c0_176 = arith.constant 0 : index
    %587 = vector.load %arg12[%c0_175, %c0_176] : memref<2x32xf32, #tpu.memory_space<vmem>>, vector<1x32xf32>
    %c1_177 = arith.constant 1 : index
    %c0_178 = arith.constant 0 : index
    %588 = vector.load %arg12[%c1_177, %c0_178] : memref<2x32xf32, #tpu.memory_space<vmem>>, vector<1x32xf32>
    %cst_179 = arith.constant dense<0.000000e+00> : vector<16xf32>
    %589 = vector.multi_reduction <add>, %586, %cst_179 [1] : vector<16x32xf32> to vector<16xf32>
    %590 = vector.shape_cast %589 : vector<16xf32> to vector<16x1xf32>
    %cst_180 = arith.constant 3.200000e+01 : f32
    %591 = vector.broadcast %cst_180 : f32 to vector<16x1xf32>
    %592 = arith.divf %590, %591 : vector<16x1xf32>
    %593 = vector.broadcast %592 : vector<16x1xf32> to vector<16x32xf32>
    %594 = arith.subf %586, %593 : vector<16x32xf32>
    %595 = arith.mulf %594, %594 : vector<16x32xf32>
    %cst_181 = arith.constant dense<0.000000e+00> : vector<16xf32>
    %596 = vector.multi_reduction <add>, %595, %cst_181 [1] : vector<16x32xf32> to vector<16xf32>
    %597 = vector.shape_cast %596 : vector<16xf32> to vector<16x1xf32>
    %cst_182 = arith.constant 3.200000e+01 : f32
    %598 = vector.broadcast %cst_182 : f32 to vector<16x1xf32>
    %599 = arith.divf %597, %598 : vector<16x1xf32>
    %600 = vector.broadcast %592 : vector<16x1xf32> to vector<16x32xf32>
    %601 = arith.subf %586, %600 : vector<16x32xf32>
    %cst_183 = arith.constant 9.99999974E-6 : f32
    %602 = vector.broadcast %cst_183 : f32 to vector<16x1xf32>
    %603 = arith.addf %599, %602 : vector<16x1xf32>
    %604 = math.rsqrt %603 : vector<16x1xf32>
    %605 = vector.broadcast %604 : vector<16x1xf32> to vector<16x32xf32>
    %606 = arith.mulf %601, %605 : vector<16x32xf32>
    %607 = vector.broadcast %587 : vector<1x32xf32> to vector<16x32xf32>
    %608 = arith.mulf %606, %607 : vector<16x32xf32>
    %609 = vector.broadcast %588 : vector<1x32xf32> to vector<16x32xf32>
    %610 = arith.addf %608, %609 : vector<16x32xf32>
    %c0_184 = arith.constant 0 : index
    %c0_185 = arith.constant 0 : index
    %611 = vector.load %arg13[%c0_184, %c0_185] : memref<16x32xf32, #tpu.memory_space<vmem>>, vector<16x32xf32>
    tpu.vector_store %arg13[%c0_184, %c0_185], %610 {strides = array<i32>} : memref<16x32xf32, #tpu.memory_space<vmem>>, vector<16x32xf32>,
    return
  }
}

</mosaic_0001>

<bundles_post_ra>
// kernel: transformer_decoder_forward.1
= control target key start
LH: loop header
LB: loop body
LE: loop exit
PB: predicated region body
PF: predicated region fallthrough
CT: control target
= control target key end

     0   :  { %18 = vsyncpa [#allocation3], 0  ;;  %s9281_s0 = inlined_call_operand.hbm [shape: f32[16,32], index: 0, kind: input, shape index: {}]   ;;  %s9282_s1 = inlined_call_operand.hbm [shape: f32[32,32], index: 1, kind: input, shape index: {}]   ;;  %s9283_s2 = inlined_call_operand.hbm [shape: f32[16,32], index: 2, kind: input, shape index: {}]   ;;  %s9284_s3 = inlined_call_operand.hbm [shape: f32[32,32], index: 3, kind: input, shape index: {}]   ;;  %s9285_s4 = inlined_call_operand.vmem [shape: f32[16,16], index: 4, kind: input, shape index: {}]   ;;  %s9286_s5 = inlined_call_operand.vmem [shape: f32[16,32], index: 5, kind: input, shape index: {}]   ;;  %s9287_s6 = inlined_call_operand.vmem [shape: f32[2,32,128], index: 6, kind: input, shape index: {}]   ;;  %s9288_s7 = inlined_call_operand.vmem [shape: f32[2,32,128], index: 7, kind: input, shape index: {}]   ;;  %s9289_s8 = inlined_call_operand.vmem [shape: f32[2,32,64], index: 8, kind: input, shape index: {}]   ;;  %s9290_s9 = inlined_call_operand.hbm [shape: f32[2,1,64], index: 9, kind: input, shape index: {}]   ;;  %s9291_s10 = inlined_call_operand.vmem [shape: f32[2,64,32], index: 10, kind: input, shape index: {}]   ;;  %s9292_s11 = inlined_call_operand.hbm [shape: f32[2,16,32], index: 11, kind: input, shape index: {}]   ;;  %s9293_s12 = inlined_call_operand.hbm [shape: f32[2,32], index: 12, kind: input, shape index: {}]   ;;  %s9294_s13 = inlined_call_operand.hbm [shape: f32[16,32], index: 13, kind: output, shape index: {}]  }
   0x1   :  { %19 = vsyncpa [#allocation6], 0 }
   0x2   :  { %20 = vsyncpa [#allocation9], 0 }
   0x3   :  { %21 = vsyncpa [#allocation12], 0 }
   0x4   :  { %22 = vsyncpa [#allocation4], 0  ;;  %s7964_s25 = smov [#allocation5]   ;;  %s7965_s27 = smov [#allocation8]  }
   0x5   :  { %s40_s26 = sshll.u32 %s7964_s25, 4  ;;  %s64_s28 = sshll.u32 %s7965_s27, 4  ;;  %s41_s26 = int_to_ptr.vmem [resolvable:$true] %s40_s26  ;;  %s65_s28 = int_to_ptr.vmem [resolvable:$true] %s64_s28 }
   0x6   :  { %s7802_s29 = scalar_lea.vmem %s41_s26, 512  ;;  %p7807_p1 = scmp.lt.s32.totalorder %s41_s26, %s41_s26 }
   0x7   :  { %p7803_p0 = scmp.ne.s32.totalorder %s41_s26, %s7802_s29  ;;  %p7808_p2 = scmp.lt.s32.totalorder %s7802_s29, %s7802_s29 }
   0x9   :  { %p7809_p3 = por %p7808_p2, %p7807_p1 }
   0xb   :  { %p7810_p4 = pnand %p7809_p3, %p7803_p0 }
   0xd   :  { %7813 = shalt.err (!%p7810_p4)
}
   0xe   :  { %s7966_s30 = smov 128   ;;  %s7967_s14 = smov 8  }
   0xf   :  { %46 = dma.hbm_to_vmem [thread:$0]  %s9282_s1, 512, %s41_s26, [#allocation6], %s7966_s30, %s7966_s30, %s7967_s14  }
  0x10   :  { %s7822_s17 = scalar_lea.vmem %s65_s28, 512  ;;  %p7827_p6 = scmp.lt.s32.totalorder %s65_s28, %s65_s28 }
  0x11   :  { %p7823_p5 = scmp.ne.s32.totalorder %s65_s28, %s7822_s17  ;;  %p7828_p7 = scmp.lt.s32.totalorder %s7822_s17, %s7822_s17 }
  0x13   :  { %p7829_p8 = por %p7828_p7, %p7827_p6 }
  0x15   :  { %p7830_p9 = pnand %p7829_p8, %p7823_p5 }
  0x17   :  { %7833 = shalt.err (!%p7830_p9)
}
  0x18   :  { %70 = dma.hbm_to_vmem [thread:$0]  %s9284_s3, 512, %s65_s28, [#allocation9], %s7966_s30, %s7966_s30, %s7967_s14  }
  0x19   :  { %s7968_s20 = smov [#allocation11]   ;;  %s7969_s22 = smov [#allocation2]  }
  0x1a   :  { %s100_s21 = sshll.u32 %s7968_s20, 4  ;;  %s28_s23 = sshll.u32 %s7969_s22, 4  ;;  %s101_s21 = int_to_ptr.vmem [resolvable:$true] %s100_s21  ;;  %s29_s23 = int_to_ptr.vmem [resolvable:$true] %s28_s23 }
  0x1b   :  { %s7842_s1 = scalar_lea.vmem %s101_s21, 512  ;;  %p7847_p11 = scmp.lt.s32.totalorder %s101_s21, %s101_s21 }
  0x1c   :  { %p7843_p10 = scmp.ne.s32.totalorder %s101_s21, %s7842_s1  ;;  %p7848_p12 = scmp.lt.s32.totalorder %s7842_s1, %s7842_s1 }
  0x1e   :  { %p7849_p13 = por %p7848_p12, %p7847_p11 }
  0x20   :  { %p7850_p0 = pnand %p7849_p13, %p7843_p10 }
  0x22   :  { %7853 = shalt.err (!%p7850_p0)
}
  0x23   :  { %106 = dma.hbm_to_vmem [thread:$0]  %s9292_s11, 512, %s101_s21, [#allocation12], %s7966_s30, %s7966_s30, %s7967_s14  }
  0x24   :  { %s7862_s3 = scalar_lea.vmem %s29_s23, 256  ;;  %p7867_p2 = scmp.lt.s32.totalorder %s29_s23, %s29_s23 }
  0x25   :  { %p7863_p1 = scmp.ne.s32.totalorder %s29_s23, %s7862_s3  ;;  %p7868_p3 = scmp.lt.s32.totalorder %s7862_s3, %s7862_s3 }
  0x27   :  { %p7869_p4 = por %p7868_p3, %p7867_p2 }
  0x29   :  { %p7870_p5 = pnand %p7869_p4, %p7863_p1 }
  0x2b   :  { %7873 = shalt.err (!%p7870_p5)
}
  0x2c   :  { %34 = dma.hbm_to_vmem [thread:$0]  %s9281_s0, 256, %s29_s23, [#allocation3], %s7966_s30, %s7966_s30, %s7967_s14  }
  0x2d   :  { %s7970_s28 = smov [#allocation7]   ;;  %s7971_s15 = smov [#allocation10]  }
  0x2e   :  { %s52_s29 = sshll.u32 %s7970_s28, 4  ;;  %s86_s16 = sshll.u32 %s7971_s15, 4  ;;  %s53_s29 = int_to_ptr.vmem [resolvable:$true] %s52_s29  ;;  %s87_s16 = int_to_ptr.vmem [resolvable:$true] %s86_s16 }
  0x2f   :  { %s7882_s11 = scalar_lea.vmem %s53_s29, 256  ;;  %p7887_p7 = scmp.lt.s32.totalorder %s53_s29, %s53_s29 }
  0x30   :  { %p7883_p6 = scmp.ne.s32.totalorder %s53_s29, %s7882_s11  ;;  %p7888_p8 = scmp.lt.s32.totalorder %s7882_s11, %s7882_s11 }
  0x32   :  { %p7889_p9 = por %p7888_p8, %p7887_p7 }
  0x34   :  { %p7890_p10 = pnand %p7889_p9, %p7883_p6 }
  0x36   :  { %7893 = shalt.err (!%p7890_p10)
}
  0x37   :  { %58 = dma.hbm_to_vmem [thread:$0]  %s9283_s2, 256, %s53_s29, [#allocation6], %s7966_s30, %s7966_s30, %s7967_s14  }
  0x38   :  { %s7902_s0 = scalar_lea.vmem %s87_s16, 32  ;;  %p7907_p12 = scmp.lt.s32.totalorder %s87_s16, %s87_s16 }
  0x39   :  { %p7903_p11 = scmp.ne.s32.totalorder %s87_s16, %s7902_s0  ;;  %p7908_p13 = scmp.lt.s32.totalorder %s7902_s0, %s7902_s0 }
  0x3b   :  { %p7909_p0 = por %p7908_p13, %p7907_p12 }
  0x3d   :  { %p7910_p1 = pnand %p7909_p0, %p7903_p11 }
  0x3f   :  { %7913 = shalt.err (!%p7910_p1)
}
  0x40   :  { %s7972_s19 = smov 16   ;;  %s7973_s20 = smov 1  }
  0x41   :  { %92 = dma.hbm_to_vmem [thread:$0]  %s9290_s9, 32, %s87_s16, [#allocation9], %s7972_s19, %s7972_s19, %s7973_s20  }
  0x42   :  { %s7974_s23 = smov [#allocation13]  }
  0x43   :  { %s113_s1 = sshll.u32 %s7974_s23, 4  ;;  %s114_s1 = int_to_ptr.vmem [resolvable:$true] %s113_s1 }
  0x44   :  { %s7922_s24 = scalar_lea.vmem %s114_s1, 32  ;;  %p7927_p3 = scmp.lt.s32.totalorder %s114_s1, %s114_s1 }
  0x45   :  { %p7923_p2 = scmp.ne.s32.totalorder %s114_s1, %s7922_s24  ;;  %p7928_p4 = scmp.lt.s32.totalorder %s7922_s24, %s7922_s24 }
  0x47   :  { %p7929_p5 = por %p7928_p4, %p7927_p3 }
  0x49   :  { %p7930_p6 = pnand %p7929_p5, %p7923_p2 }
  0x4b   :  { %7933 = shalt.err (!%p7930_p6)
}
  0x4c   :  { %116 = dma.hbm_to_vmem [thread:$0]  %s9293_s12, 32, %s114_s1, [#allocation12]  }
  0x4d   :  { %7954 = dma.done.wait [#allocation3], 256  }
  0x4e   :  { %7955 = vsyncadd [#allocation3], 4294967040 }
  0x4f   :  { %7956 = dma.done.wait [#allocation6], 768  }
  0x50   :  { %7957 = vsyncadd [#allocation6], 4294966528 }
  0x51   :  { %7958 = dma.done.wait [#allocation9], 544  }
  0x52   :  { %7959 = vsyncadd [#allocation9], 4294966752 }
  0x53   :  { %7960 = dma.done.wait [#allocation12], 544  }
  0x54   :  { %7961 = vsyncadd [#allocation12], 4294966752  ;;  %v265_v0 = vlaneseq  ;;  %v8099_v3 = vld [vmem:[%s9287_s6 + $0x18] sm:$0xff]  ;;  %v8104_v4 = vld [vmem:[%s9287_s6 + $0x10] sm:$0xff]  ;;  %vm183_vm0 = vcmask 261120   ;;  %s7975_s29 = smov 64  }
  0x55   :  { %7055 = vmatprep.subr.mxu0 %v8099_v3  ;;  %v8110_v5 = vld [vmem:[%s9287_s6 + $0x8] sm:$0xff]  ;;  %v8112_v6 = vld [vmem:[#allocation2] sm:$0xff]  ;;  %v8114_v7 = vld [vmem:[#allocation7] sm:$0xff]  ;;  %295 = vrot.lane.b32.xlu1 %v8104_v4, %s7975_s29  ;;  %s7976_s11 = smov 32   ;;  %s7977_s17 = smov 88   ;;  %vm390_vm1 = vcmask 64512  }
  0x56   :  { %v8091_v1 = vshrl.u32 %v265_v0, 7  ;;  %7056 = vmatpush3.msra.mxu0 %v8099_v3  ;;  %v181_v8 = vadd.f32 %v8114_v7, %v8112_v6  ;;  %v8121_v9 = vld [vmem:[#allocation2 + $0x8] sm:$0xff]  ;;  %v8123_v10 = vld [vmem:[#allocation7 + $0x8] sm:$0xff]  ;;  %7074 = vmatprep.mubr.msk.f32.mxu1 %vm183_vm0, %v8112_v6  ;;  %v8136_v13 = vld [vmem:[%s9287_s6] sm:$0xff]  ;;  %s7978_s18 = smov 96   ;;  %s7979_s0 = smov 120  }
  0x57   :  { %v8125_v11 = vld [vmem:[#allocation11] sm:$0xff]  ;;  %7057 = vmatprep.subr.mxu0 %v8104_v4  ;;  %v182_v14 = vadd.f32 %v8123_v10, %v8121_v9  ;;  %vm476_vm2 = vcmask 130048   ;;  %s7980_s23 = smov 80   ;;  %s7981_s1 = smov 112   ;;  %vm3209_vm3 = vcmask 523264  }
  0x58   :  { %v8094_v2 = vsub.s32 1, %v8091_v1  ;;  %7058 = vmatpush3.msra.mxu0 %v8104_v4  ;;  %7063 = vmatprep.mubr.msk.f32.mxu0 %vm183_vm0, %v181_v8  ;;  %v8156_v20 = vsub.s32 0, %v8091_v1  ;;  %v8183_v30 = vsub.s32 2, %v8091_v1  ;;  %v8210_v42 = vld [vmem:[%s9285_s4 + $0x8] sm:$0xff]  ;;  %v8215_v44 = vld [vmem:[%s9285_s4] sm:$0xff]  ;;  %s7982_s24 = smov 72  }
  0x59   :  { %7059 = vmatprep.subr.mxu0 %v8110_v5  ;;  %293 = vrot.lane.b32.xlu1 %v8110_v5, %s7975_s29  ;;  %s7983_s2 = smov 104  }
  0x5a   :  { %v276_v12 = vrot.slane %v8125_v11, %v8094_v2  ;;  %7060 = vmatpush3.msra.mxu0 %v8110_v5  ;;  %v268_v22 = vrot.slane %v8125_v11, %v8156_v20  ;;  %v286_v33 = vrot.slane %v8125_v11, %v8183_v30 }
  0x5b   :  { %7061 = vmatprep.subr.mxu0 %v8136_v13 }
  0x5c   :  { %278 = vrot.lane.b32.xlu0 %v276_v12, %s7976_s11  ;;  %7062 = vmatpush3.msra.mxu0 %v8136_v13 }
  0x5d   :  { %7064 = vmatmul.mubr.msk.f32.vlgmr.msra.gmra.mxu0 %vm183_vm0, %v182_v14  ;;  %291 = vrot.lane.b32.xlu1 %v8136_v13, %s7975_s29 }
  0x60   :  { %297 = vrot.lane.b32.xlu0 %v8099_v3, %s7975_s29 }
  0xc7   :  { %v296_v15 = vpop.permute.xlu1 %295 }
  0xcb   :  { %v294_v18 = vpop.permute.xlu1 %293 }
  0xce   :  { %v279_v16 = vpop.permute.xlu0 %278 }
  0xcf   :  { %v292_v19 = vpop.permute.xlu1 %291 }
  0xd2   :  { %v298_v17 = vpop.permute.xlu0 %297 }
  0xd3   :  { %7066 = vmatprep.subr.mxu1 %v298_v17 }
  0xd4   :  { %7067 = vmatpush3.msra.mxu1 %v298_v17 }
  0xd5   :  { %7068 = vmatprep.subr.mxu1 %v296_v15 }
  0xd6   :  { %7069 = vmatpush3.msra.mxu1 %v296_v15 }
  0xd7   :  { %7070 = vmatprep.subr.mxu1 %v294_v18 }
  0xd8   :  { %7071 = vmatpush3.msra.mxu1 %v294_v18 }
  0xd9   :  { %7072 = vmatprep.subr.mxu1 %v292_v19 }
  0xda   :  { %7073 = vmatpush3.msra.mxu1 %v292_v19 }
  0xdb   :  { %7075 = vmatmul.mubr.msk.f32.vlgmr.msra.gmra.mxu1 %vm183_vm0, %v8121_v9 }
 0x11d   :  { %v7065_v21 = vpop.f32.mrf.mxu0 }
 0x11e   :  { %v8160_v23 = vadd.f32 %v7065_v21, %v279_v16  ;;  %v270_v28 = vadd.f32 %v7065_v21, %v268_v22 }
 0x11f   :  { %v256_v24 = vpop.f32.mrf.mxu0 }
 0x120   :  { %v269_v25 = vadd.f32 %v268_v22, %v256_v24  ;;  %586 = vrot.lane.b32.xlu1 %v8160_v23, %s7977_s17  ;;  %388 = vrot.lane.b32.xlu0 %v8160_v23, %s7978_s18  ;;  %v8168_v27 = vadd.f32 %v279_v16, %v256_v24  ;;  %v8178_v29 = vmul.f32 0.35355338, %v270_v28 }
 0x122   :  { %v8166_v26 = vmul.f32 0.35355338, %v269_v25 }
 0x124   :  { %386 = vrot.lane.b32.xlu0 %v8168_v27, %s7978_s18  ;;  %580 = vrot.lane.b32.xlu1 %v8166_v26, %s7979_s0 }
 0x125   :  { %7081 = vmatprep.mubr.msk.f32.mxu0 %vm390_vm1, %v8166_v26 }
 0x128   :  { %584 = vrot.lane.b32.xlu0 %v8168_v27, %s7977_s17 }
 0x12c   :  { %582 = vrot.lane.b32.xlu0 %v8178_v29, %s7979_s0 }
 0x192   :  { %v587_v31 = vpop.permute.xlu1 %586  ;;  %v389_v32 = vpop.permute.xlu0 %388 }
 0x193   :  { %7077 = vmatprep.subr.msk.mxu0 %vm390_vm1, %v389_v32  ;;  %7091 = vmatprep.subr.msk.mxu1 %vm390_vm1, %v587_v31 }
 0x194   :  { %7078 = vmatpush3.xpose.msk.msra.mxu0 %vm390_vm1, %v389_v32  ;;  %7092 = vmatpush3.xpose.msk.msra.mxu1 %vm390_vm1, %v587_v31 }
 0x196   :  { %v387_v34 = vpop.permute.xlu0 %386  ;;  %v581_v35 = vpop.permute.xlu1 %580 }
 0x197   :  { %7079 = vmatprep.subr.msk.mxu0 %vm390_vm1, %v387_v34  ;;  %7095 = vmatprep.mubr.msk.f32.mxu1 %vm390_vm1, %v581_v35 }
 0x198   :  { %7080 = vmatpush3.xpose.msk.msra.mxu0 %vm390_vm1, %v387_v34 }
 0x19a   :  { %v585_v38 = vpop.permute.xlu0 %584 }
 0x19b   :  { %v7076_v36 = vpop.f32.mrf.mxu1  ;;  %7082 = vmatmul.mubr.msk.f32.vlgmr.msra.gmra.mxu0 %vm390_vm1, %v8178_v29  ;;  %7093 = vmatprep.subr.msk.mxu1 %vm390_vm1, %v585_v38 }
 0x19c   :  { %v8194_v37 = vadd.f32 %v7076_v36, %v286_v33  ;;  %7094 = vmatpush3.xpose.msk.msra.mxu1 %vm390_vm1, %v585_v38 }
 0x19d   :  { %v375_v39 = vpop.f32.mrf.mxu1 }
 0x19e   :  { %v8199_v40 = vadd.f32 %v375_v39, %v286_v33  ;;  %7084 = vmatprep.subr.mxu0 %v8194_v37  ;;  %v583_v41 = vpop.permute.xlu0 %582 }
 0x19f   :  { %7085 = vmatpush3.msra.mxu0 %v8194_v37  ;;  %7096 = vmatmul.mubr.msk.f32.vlgmr.msra.gmra.mxu1 %vm390_vm1, %v583_v41 }
 0x1a0   :  { %7086 = vmatprep.subr.mxu0 %v8199_v40 }
 0x1a1   :  { %7087 = vmatpush3.msra.mxu0 %v8199_v40 }
 0x25b   :  { %v7083_v43 = vpop.f32.mrf.mxu0 }
 0x25c   :  { %v473_v45 = vadd.f32 %v7083_v43, %v8210_v42 }
 0x25d   :  { %v467_v46 = vpop.f32.mrf.mxu0 }
 0x25e   :  { %v468_v47 = vadd.f32 %v467_v46, %v8215_v44  ;;  %v480_v48 = vsel %vm476_vm2, %v473_v45, -inf }
 0x25f   :  { %v7097_v49 = vpop.f32.mrf.mxu1  ;;  %481 = vmax.xlane.f32.xlu0 %v480_v48 }
 0x260   :  { %v668_v50 = vadd.f32 %v7097_v49, %v8210_v42  ;;  %v477_v51 = vsel %vm476_vm2, %v468_v47, -inf }
 0x261   :  { %v662_v52 = vpop.f32.mrf.mxu1  ;;  %478 = vmax.xlane.f32.xlu1 %v477_v51 }
 0x262   :  { %v663_v53 = vadd.f32 %v662_v52, %v8215_v44  ;;  %v674_v55 = vsel %vm476_vm2, %v668_v50, -inf }
 0x264   :  { %v671_v54 = vsel %vm476_vm2, %v663_v53, -inf }
 0x265   :  { %672 = vmax.xlane.f32.xlu0 %v671_v54  ;;  %675 = vmax.xlane.f32.xlu1 %v674_v55 }
 0x2e8   :  { %v482_v56 = vpop.xlane.xlu0 %481 }
 0x2e9   :  { %v484_v57 = vsub.f32 %v473_v45, %v482_v56 }
 0x2ea   :  { %v479_v58 = vpop.xlane.xlu1 %478 }
 0x2eb   :  { %v487_v59 = vmul.f32 1.442695, %v484_v57  ;;  %v483_v60 = vsub.f32 %v468_v47, %v479_v58 }
 0x2ed   :  { %7626 = vpow2.f32 %v487_v59  ;;  %v485_v61 = vmul.f32 1.442695, %v483_v60 }
 0x2ee   :  { %v673_v62 = vpop.xlane.xlu0 %672  ;;  %v676_v63 = vpop.xlane.xlu1 %675 }
 0x2ef   :  { %7628 = vpow2.f32 %v485_v61  ;;  %v677_v0 = vsub.f32 %v663_v53, %v673_v62  ;;  %v678_v8 = vsub.f32 %v668_v50, %v676_v63 }
 0x2f1   :  { %v679_v12 = vmul.f32 1.442695, %v677_v0  ;;  %v681_v14 = vmul.f32 1.442695, %v678_v8 }
 0x2f3   :  { %7630 = vpow2.f32 %v679_v12 }
 0x2f4   :  { %7632 = vpow2.f32 %v681_v14 }
 0x2fa   :  { %v7627_v15 = vpop.eup %7626 }
 0x2fb   :  { %v492_v16 = vsel %vm476_vm2, %v7627_v15, 0.0 }
 0x2fc   :  { %v7629_v17 = vpop.eup %7628  ;;  %493 = vadd.xlane.f32.xlu1 %v492_v16 }
 0x2fd   :  { %v489_v18 = vsel %vm476_vm2, %v7629_v17, 0.0 }
 0x2fe   :  { %490 = vadd.xlane.f32.xlu0 %v489_v18 }
 0x300   :  { %v7631_v19 = vpop.eup %7630 }
 0x301   :  { %v7633_v21 = vpop.eup %7632  ;;  %v683_v22 = vsel %vm476_vm2, %v7631_v19, 0.0 }
 0x302   :  { %684 = vadd.xlane.f32.xlu0 %v683_v22  ;;  %v686_v24 = vsel %vm476_vm2, %v7633_v21, 0.0 }
 0x303   :  { %687 = vadd.xlane.f32.xlu1 %v686_v24 }
 0x314   :  { %695 = vrot.lane.b32.xlu1 %v8199_v40, %s7979_s0 }
 0x318   :  { %782 = vrot.lane.b32.xlu1 %v8110_v5, %s7976_s11  ;;  %697 = vrot.lane.b32.xlu0 %v8194_v37, %s7979_s0 }
 0x31c   :  { %954 = vrot.lane.b32.xlu1 %v8168_v27, %s7980_s23  ;;  %956 = vrot.lane.b32.xlu0 %v8160_v23, %s7980_s23 }
 0x320   :  { %952 = vrot.lane.b32.xlu1 %v8178_v29, %s7981_s1  ;;  %950 = vrot.lane.b32.xlu0 %v8166_v26, %s7981_s1 }
 0x324   :  { %1240 = vrot.lane.b32.xlu1 %v8168_v27, %s7982_s24  ;;  %1242 = vrot.lane.b32.xlu0 %v8160_v23, %s7982_s24 }
 0x328   :  { %1238 = vrot.lane.b32.xlu1 %v8178_v29, %s7983_s2  ;;  %1236 = vrot.lane.b32.xlu0 %v8166_v26, %s7983_s2 }
 0x385   :  { %v494_v5 = vpop.xlane.xlu1 %493 }
 0x386   :  { %7634 = vrcp.f32 %v494_v5 }
 0x387   :  { %v491_v25 = vpop.xlane.xlu0 %490 }
 0x388   :  { %7636 = vrcp.f32 %v491_v25 }
 0x38b   :  { %v685_v28 = vpop.xlane.xlu0 %684 }
 0x38c   :  { %7638 = vrcp.f32 %v685_v28  ;;  %v688_v31 = vpop.xlane.xlu1 %687 }
 0x38d   :  { %7640 = vrcp.f32 %v688_v31 }
 0x38f   :  { %v698_v32 = vpop.permute.xlu0 %697 }
 0x390   :  { %7098 = vmatprep.subr.mxu0 %v698_v32  ;;  %v696_v23 = vpop.permute.xlu1 %695 }
 0x393   :  { %v7635_v27 = vpop.eup %7634  ;;  %v957_v41 = vpop.permute.xlu0 %956 }
 0x394   :  { %v498_v35 = vmul.f32 %v7635_v27, %v7627_v15  ;;  %v783_v39 = vpop.permute.xlu1 %782 }
 0x395   :  { %v7637_v33 = vpop.eup %7636 }
 0x396   :  { %v497_v34 = vmul.f32 %v7637_v33, %v7629_v17 }
 0x397   :  { %v951_v46 = vpop.permute.xlu0 %950 }
 0x398   :  { %7088 = vmatprep.mubr.msk.f32.mxu0 %vm476_vm2, %v497_v34  ;;  %v955_v48 = vpop.permute.xlu1 %954 }
 0x399   :  { %v7639_v29 = vpop.eup %7638  ;;  %7089 = vmatmul.mubr.msk.f32.vlgmr.msra.gmra.mxu0 %vm476_vm2, %v498_v35 }
 0x39a   :  { %v7641_v26 = vpop.eup %7640  ;;  %7099 = vmatpush3.msra.mxu0 %v698_v32  ;;  %v691_v36 = vmul.f32 %v7639_v29, %v7631_v19 }
 0x39b   :  { %7100 = vmatprep.subr.mxu0 %v696_v23  ;;  %v692_v38 = vmul.f32 %v7641_v26, %v7633_v21  ;;  %v1243_v50 = vpop.permute.xlu0 %1242 }
 0x39c   :  { %7101 = vmatpush3.msra.mxu0 %v696_v23  ;;  %7102 = vmatprep.mubr.msk.f32.mxu0 %vm476_vm2, %v691_v36  ;;  %v953_v51 = vpop.permute.xlu1 %952 }
 0x39d   :  { %7105 = vmatprep.subr.mxu0 %v783_v39  ;;  %7103 = vmatmul.mubr.msk.f32.vlgmr.msra.gmra.mxu0 %vm476_vm2, %v692_v38 }
 0x39e   :  { %7106 = vmatpush3.msra.mxu0 %v783_v39 }
 0x39f   :  { %7115 = vmatprep.subr.msk.mxu0 %vm390_vm1, %v957_v41  ;;  %v1237_v52 = vpop.permute.xlu0 %1236 }
 0x3a0   :  { %v1241_v53 = vpop.permute.xlu1 %1240 }
 0x3a4   :  { %v1239_v54 = vpop.permute.xlu1 %1238 }
 0x459   :  { %v7090_v43 = vpop.f32.mrf.mxu0 }
 0x45b   :  { %v571_v45 = vpop.f32.mrf.mxu0 }
 0x45c   :  { %7112 = vmatprep.mubr.msk.f32.mxu1 %vm390_vm1, %v571_v45 }
 0x45d   :  { %v7104_v47 = vpop.f32.mrf.mxu0 }
 0x45f   :  { %v773_v49 = vpop.f32.mrf.mxu0 }
 0x460   :  { %7107 = vmatprep.mubr.msk.f32.mxu0 %vm390_vm1, %v773_v49 }
 0x461   :  { %7108 = vmatmul.mubr.msk.f32.vlgmr.msra.gmra.mxu0 %vm390_vm1, %v7104_v47 }
 0x462   :  { %7116 = vmatpush3.xpose.msk.msra.mxu0 %vm390_vm1, %v957_v41  ;;  %7119 = vmatprep.mubr.msk.f32.mxu0 %vm390_vm1, %v951_v46 }
 0x463   :  { %7117 = vmatprep.subr.msk.mxu0 %vm390_vm1, %v955_v48 }
 0x466   :  { %7118 = vmatpush3.xpose.msk.msra.mxu0 %vm390_vm1, %v955_v48 }
 0x467   :  { %7134 = vmatprep.subr.msk.mxu0 %vm390_vm1, %v1243_v50 }
 0x469   :  { %7120 = vmatmul.mubr.msk.f32.vlgmr.msra.gmra.mxu0 %vm390_vm1, %v953_v51 }
 0x46a   :  { %7135 = vmatpush3.xpose.msk.msra.mxu0 %vm390_vm1, %v1243_v50  ;;  %7138 = vmatprep.mubr.msk.f32.mxu0 %vm390_vm1, %v1237_v52 }
 0x46b   :  { %7136 = vmatprep.subr.msk.mxu0 %vm390_vm1, %v1241_v53 }
 0x46e   :  { %7137 = vmatpush3.xpose.msk.msra.mxu0 %vm390_vm1, %v1241_v53 }
 0x471   :  { %7139 = vmatmul.mubr.msk.f32.vlgmr.msra.gmra.mxu0 %vm390_vm1, %v1239_v54 }
 0x521   :  { %v8270_v55 = vpop.f32.mrf.mxu0 }
 0x523   :  { %v8272_v56 = vpop.f32.mrf.mxu0 }
 0x529   :  { %v7121_v57 = vpop.f32.mrf.mxu0 }
 0x52a   :  { %v1038_v58 = vadd.f32 %v7121_v57, %v8210_v42 }
 0x52b   :  { %v1032_v59 = vpop.f32.mrf.mxu0 }
 0x52c   :  { %v1033_v60 = vadd.f32 %v1032_v59, %v8215_v44  ;;  %v1044_v61 = vsel %vm476_vm2, %v1038_v58, -inf }
 0x52d   :  { %1045 = vmax.xlane.f32.xlu1 %v1044_v61 }
 0x52e   :  { %v1041_v62 = vsel %vm476_vm2, %v1033_v60, -inf }
 0x52f   :  { %1042 = vmax.xlane.f32.xlu0 %v1041_v62 }
 0x531   :  { %v7140_v63 = vpop.f32.mrf.mxu0 }
 0x532   :  { %v1324_v32 = vadd.f32 %v7140_v63, %v8210_v42 }
 0x533   :  { %v1318_v0 = vpop.f32.mrf.mxu0 }
 0x534   :  { %v1319_v8 = vadd.f32 %v1318_v0, %v8215_v44  ;;  %v1330_v27 = vsel %vm476_vm2, %v1324_v32, -inf }
 0x536   :  { %v1327_v12 = vsel %vm476_vm2, %v1319_v8, -inf }
 0x53e   :  { %866 = vrot.lane.b32.xlu1 %v8136_v13, %s7976_s11 }
 0x542   :  { %1063 = vrot.lane.b32.xlu1 %v8199_v40, %s7981_s1 }
 0x566   :  { %1328 = vmax.xlane.f32.xlu1 %v1327_v12  ;;  %v8325_v12 = vsub.s32 3, %v8091_v1 }
 0x5b6   :  { %v1046_v14 = vpop.xlane.xlu1 %1045 }
 0x5b7   :  { %v1048_v15 = vsub.f32 %v1038_v58, %v1046_v14 }
 0x5b8   :  { %v1043_v16 = vpop.xlane.xlu0 %1042 }
 0x5b9   :  { %v1051_v17 = vmul.f32 1.442695, %v1048_v15  ;;  %v1047_v18 = vsub.f32 %v1033_v60, %v1043_v16  ;;  %v1525_v15 = vrot.slane %v8125_v11, %v8325_v12 }
 0x5ba   :  { %v867_v19 = vpop.permute.xlu1 %866 }
 0x5bb   :  { %7642 = vpow2.f32 %v1051_v17  ;;  %v1049_v21 = vmul.f32 1.442695, %v1047_v18  ;;  %7110 = vmatprep.subr.mxu1 %v867_v19 }
 0x5bc   :  { %7111 = vmatpush3.msra.mxu1 %v867_v19 }
 0x5bd   :  { %7644 = vpow2.f32 %v1049_v21  ;;  %7113 = vmatmul.mubr.msk.f32.vlgmr.msra.gmra.mxu1 %vm390_vm1, %v7090_v43 }
 0x5be   :  { %v1064_v5 = vpop.permute.xlu1 %1063 }
 0x5c8   :  { %v7643_v13 = vpop.eup %7642 }
 0x5c9   :  { %v1056_v22 = vsel %vm476_vm2, %v7643_v13, 0.0 }
 0x5ca   :  { %v7645_v44 = vpop.eup %7644  ;;  %1057 = vadd.xlane.f32.xlu0 %v1056_v22 }
 0x5cb   :  { %v1053_v24 = vsel %vm476_vm2, %v7645_v44, 0.0 }
 0x5ce   :  { %1054 = vadd.xlane.f32.xlu0 %v1053_v24 }
 0x5e4   :  { %1065 = vrot.lane.b32.xlu0 %v8194_v37, %s7981_s1 }
 0x5ef   :  { %v1329_v25 = vpop.xlane.xlu1 %1328 }
 0x5f0   :  { %v1333_v28 = vsub.f32 %v1319_v8, %v1329_v25  ;;  %v8313_v8 = vld [vmem:[%s9288_s7 + $0x18] sm:$0xff] }
 0x5f1   :  { %7153 = vmatprep.subr.mxu0 %v8313_v8 }
 0x5f2   :  { %v1335_v31 = vmul.f32 1.442695, %v1333_v28  ;;  %7154 = vmatpush3.msra.mxu0 %v8313_v8 }
 0x5f4   :  { %7646 = vpow2.f32 %v1335_v31 }
 0x601   :  { %v7647_v33 = vpop.eup %7646 }
 0x602   :  { %v1339_v23 = vsel %vm476_vm2, %v7647_v33, 0.0 }
 0x603   :  { %1331 = vmax.xlane.f32.xlu0 %v1330_v27 }
 0x607   :  { %1340 = vadd.xlane.f32.xlu0 %v1339_v23 }
 0x61d   :  { %1150 = vrot.lane.b32.xlu0 %v8104_v4, %s7976_s11 }
 0x621   :  { %1436 = vrot.lane.b32.xlu0 %v8099_v3, %s7976_s11 }
 0x653   :  { %v1058_v34 = vpop.xlane.xlu0 %1057 }
 0x654   :  { %7648 = vrcp.f32 %v1058_v34 }
 0x657   :  { %v1055_v35 = vpop.xlane.xlu0 %1054 }
 0x658   :  { %7650 = vrcp.f32 %v1055_v35 }
 0x65b   :  { %v1066_v29 = vpop.permute.xlu0 %1065 }
 0x65c   :  { %7122 = vmatprep.subr.mxu1 %v1066_v29 }
 0x65d   :  { %7123 = vmatpush3.msra.mxu1 %v1066_v29 }
 0x65e   :  { %7124 = vmatprep.subr.mxu1 %v1064_v5 }
 0x65f   :  { %7125 = vmatpush3.msra.mxu1 %v1064_v5 }
 0x661   :  { %v7649_v42 = vpop.eup %7648 }
 0x662   :  { %v1062_v38 = vmul.f32 %v7649_v42, %v7643_v13 }
 0x665   :  { %v7651_v26 = vpop.eup %7650 }
 0x666   :  { %v1061_v36 = vmul.f32 %v7651_v26, %v7645_v44 }
 0x668   :  { %7126 = vmatprep.mubr.msk.f32.mxu1 %vm476_vm2, %v1061_v36  ;;  %v142_v36 = vld [vmem:[#allocation5] sm:$0xff] }
 0x669   :  { %7127 = vmatmul.mubr.msk.f32.vlgmr.msra.gmra.mxu1 %vm476_vm2, %v1062_v38  ;;  %v146_v38 = vld [vmem:[#allocation8] sm:$0xff] }
 0x67d   :  { %v7114_v47 = vpop.f32.mrf.mxu1 }
 0x67e   :  { %v947_v59 = vadd.f32 %v7114_v47, %v8270_v55  ;;  %v8320_v55 = vld [vmem:[%s9288_s7 + $0x10] sm:$0xff] }
 0x67f   :  { %v941_v48 = vpop.f32.mrf.mxu1  ;;  %7155 = vmatprep.subr.mxu0 %v8320_v55 }
 0x680   :  { %7156 = vmatpush3.msra.mxu0 %v8320_v55  ;;  %v942_v14 = vadd.f32 %v941_v48, %v8272_v56  ;;  %v8339_v56 = vld [vmem:[%s9288_s7 + $0x8] sm:$0xff]  ;;  %v8372_v48 = vld [vmem:[#allocation5 + $0x10] sm:$0xff] }
 0x681   :  { %7157 = vmatprep.subr.mxu0 %v8339_v56 }
 0x682   :  { %7158 = vmatpush3.msra.mxu0 %v8339_v56 }
 0x68c   :  { %v1332_v4 = vpop.xlane.xlu0 %1331 }
 0x68d   :  { %v1334_v39 = vsub.f32 %v1324_v32, %v1332_v4  ;;  %v8354_v4 = vadd.f32 %v146_v38, %v142_v36  ;;  %v8459_v38 = vld [vmem:[%s9286_s5 + $0x8] sm:$0xff] }
 0x68f   :  { %v1337_v3 = vmul.f32 1.442695, %v1334_v39 }
 0x690   :  { %v1341_v45 = vpop.xlane.xlu0 %1340 }
 0x691   :  { %7652 = vpow2.f32 %v1337_v3 }
 0x692   :  { %7654 = vrcp.f32 %v1341_v45  ;;  %v147_v45 = vld [vmem:[#allocation8 + $0x8] sm:$0xff] }
 0x694   :  { %v1151_v46 = vpop.permute.xlu0 %1150 }
 0x695   :  { %7129 = vmatprep.subr.mxu1 %v1151_v46 }
 0x696   :  { %7130 = vmatpush3.msra.mxu1 %v1151_v46 }
 0x698   :  { %v1437_v58 = vpop.permute.xlu0 %1436 }
 0x69e   :  { %v7653_v41 = vpop.eup %7652 }
 0x69f   :  { %v1342_v43 = vsel %vm476_vm2, %v7653_v41, 0.0  ;;  %v7655_v49 = vpop.eup %7654 }
 0x6a0   :  { %1343 = vadd.xlane.f32.xlu1 %v1342_v43  ;;  %v1347_v53 = vmul.f32 %v7655_v49, %v7647_v33  ;;  %v8370_v43 = vld [vmem:[#allocation5 + $0x8] sm:$0xff]  ;;  %v148_v49 = vld [vmem:[#allocation8 + $0x10] sm:$0xff] }
 0x6b1   :  { %1351 = vrot.lane.b32.xlu1 %v8194_v37, %s7983_s2 }
 0x6b5   :  { %1349 = vrot.lane.b32.xlu1 %v8199_v40, %s7983_s2 }
 0x729   :  { %v7128_v50 = vpop.f32.mrf.mxu1  ;;  %v1344_v51 = vpop.xlane.xlu1 %1343 }
 0x72a   :  { %7656 = vrcp.f32 %v1344_v51 }
 0x72b   :  { %v1141_v52 = vpop.f32.mrf.mxu1 }
 0x72c   :  { %7131 = vmatprep.mubr.msk.f32.mxu1 %vm390_vm1, %v1141_v52  ;;  %v8375_v52 = vadd.f32 %v147_v45, %v8370_v43 }
 0x72d   :  { %7132 = vmatmul.mubr.msk.f32.vlgmr.msra.gmra.mxu1 %vm390_vm1, %v7128_v50  ;;  %v1352_v54 = vpop.permute.xlu1 %1351 }
 0x72e   :  { %7141 = vmatprep.subr.mxu1 %v1352_v54  ;;  %7145 = vmatprep.mubr.msk.f32.mxu1 %vm476_vm2, %v1347_v53 }
 0x72f   :  { %7142 = vmatpush3.msra.mxu1 %v1352_v54  ;;  %v8378_v54 = vadd.f32 %v148_v49, %v8372_v48 }
 0x731   :  { %v1350_v37 = vpop.permute.xlu1 %1349 }
 0x732   :  { %7143 = vmatprep.subr.mxu1 %v1350_v37 }
 0x733   :  { %7144 = vmatpush3.msra.mxu1 %v1350_v37  ;;  %v8380_v37 = vld [vmem:[#allocation5 + $0x18] sm:$0xff] }
 0x734   :  { %7148 = vmatprep.subr.mxu1 %v1437_v58 }
 0x737   :  { %v7657_v40 = vpop.eup %7656 }
 0x738   :  { %v1348_v57 = vmul.f32 %v7657_v40, %v7653_v41  ;;  %v149_v40 = vld [vmem:[#allocation8 + $0x18] sm:$0xff] }
 0x73a   :  { %7146 = vmatmul.mubr.msk.f32.vlgmr.msra.gmra.mxu1 %vm476_vm2, %v1348_v57  ;;  %v8385_v57 = vadd.f32 %v149_v40, %v8380_v37 }
 0x73b   :  { %7149 = vmatpush3.msra.mxu1 %v1437_v58  ;;  %v8391_v58 = vld [vmem:[#allocation11 + $0x8] sm:$0xff] }
 0x7ed   :  { %v7133_v60 = vpop.f32.mrf.mxu1 }
 0x7ee   :  { %v1235_v61 = vadd.f32 %v7133_v60, %v947_v59  ;;  %v1560_v59 = vrot.slane %v8391_v58, %v8094_v2 }
 0x7ef   :  { %v1225_v62 = vpop.f32.mrf.mxu1 }
 0x7f0   :  { %v1234_v17 = vadd.f32 %v1225_v62, %v942_v14 }
 0x7fa   :  { %v7147_v63 = vpop.f32.mrf.mxu1 }
 0x7fc   :  { %v1427_v0 = vpop.f32.mrf.mxu1 }
 0x7fd   :  { %7150 = vmatprep.mubr.msk.f32.mxu1 %vm390_vm1, %v1427_v0 }
 0x7fe   :  { %7151 = vmatmul.mubr.msk.f32.vlgmr.msra.gmra.mxu1 %vm390_vm1, %v7147_v63  ;;  %v1566_v63 = vrot.slane %v8391_v58, %v8183_v30 }
 0x7ff   :  { %7172 = vmatprep.mubr.msk.f32.mxu1 %vm183_vm0, %v8354_v4 }
 0x8be   :  { %v7152_v16 = vpop.f32.mrf.mxu1 }
 0x8bf   :  { %v1521_v18 = vadd.f32 %v7152_v16, %v1235_v61 }
 0x8c0   :  { %v1511_v19 = vpop.f32.mrf.mxu1 }
 0x8c1   :  { %v1527_v21 = vadd.f32 %v1525_v15, %v1521_v18  ;;  %v1520_v13 = vadd.f32 %v1511_v19, %v1234_v17 }
 0x8c3   :  { %v1526_v22 = vadd.f32 %v1525_v15, %v1520_v13  ;;  %v1529_v44 = vadd.f32 %v1527_v21, %v8121_v9  ;;  %v8409_v21 = vsub.s32 5, %v8091_v1 }
 0x8c5   :  { %v1533_v24 = vsel %vm183_vm0, %v1529_v44, 0.0  ;;  %v1528_v5 = vadd.f32 %v1526_v22, %v8112_v6  ;;  %v8348_v6 = vld [vmem:[%s9288_s7] sm:$0xff]  ;;  %v1661_v22 = vrot.slane %v8125_v11, %v8409_v21 }
 0x8c6   :  { %1534 = vadd.xlane.f32.xlu0 %v1533_v24  ;;  %7159 = vmatprep.subr.mxu0 %v8348_v6 }
 0x8c7   :  { %v1530_v25 = vsel %vm183_vm0, %v1528_v5, 0.0  ;;  %7160 = vmatpush3.msra.mxu0 %v8348_v6 }
 0x8c8   :  { %1531 = vadd.xlane.f32.xlu1 %v1530_v25 }
 0x8d9   :  { %1670 = vrot.lane.b32.xlu1 %v8320_v55, %s7978_s18 }
 0x8dc   :  { %1672 = vrot.lane.b32.xlu0 %v8313_v8, %s7978_s18 }
 0x94f   :  { %v1535_v9 = vpop.xlane.xlu0 %1534 }
 0x950   :  { %v1538_v28 = vmul.f32 0.03125, %v1535_v9 }
 0x951   :  { %v1532_v31 = vpop.xlane.xlu1 %1531 }
 0x952   :  { %v1540_v32 = vsub.f32 %v1529_v44, %v1538_v28  ;;  %v1537_v27 = vmul.f32 0.03125, %v1532_v31  ;;  %v8432_v28 = vsub.s32 4, %v8091_v1 }
 0x953   :  { %v1673_v33 = vpop.permute.xlu0 %1672 }
 0x954   :  { %v1539_v23 = vsub.f32 %v1528_v5, %v1537_v27  ;;  %v1542_v34 = vmul.f32 %v1540_v32, %v1540_v32  ;;  %7164 = vmatprep.subr.mxu1 %v1673_v33  ;;  %v1574_v31 = vrot.slane %v8125_v11, %v8432_v28 }
 0x955   :  { %7165 = vmatpush3.msra.mxu1 %v1673_v33  ;;  %v1671_v35 = vpop.permute.xlu1 %1670 }
 0x956   :  { %v1546_v29 = vsel %vm183_vm0, %v1542_v34, 0.0  ;;  %v1541_v42 = vmul.f32 %v1539_v23, %v1539_v23  ;;  %7166 = vmatprep.subr.mxu1 %v1671_v35 }
 0x957   :  { %1547 = vadd.xlane.f32.xlu1 %v1546_v29  ;;  %7167 = vmatpush3.msra.mxu1 %v1671_v35 }
 0x958   :  { %v1543_v26 = vsel %vm183_vm0, %v1541_v42, 0.0 }
 0x959   :  { %1544 = vadd.xlane.f32.xlu0 %v1543_v26 }
 0x968   :  { %1668 = vrot.lane.b32.xlu1 %v8339_v56, %s7978_s18 }
 0x96c   :  { %1785 = vrot.lane.b32.xlu1 %v8313_v8, %s7975_s29 }
 0x96f   :  { %1666 = vrot.lane.b32.xlu0 %v8348_v6, %s7978_s18 }
 0x970   :  { %1781 = vrot.lane.b32.xlu1 %v8339_v56, %s7975_s29 }
 0x973   :  { %1783 = vrot.lane.b32.xlu0 %v8320_v55, %s7975_s29 }
 0x977   :  { %1779 = vrot.lane.b32.xlu0 %v8348_v6, %s7975_s29 }
 0x9e0   :  { %v1548_v39 = vpop.xlane.xlu1 %1547 }
 0x9e1   :  { %v1550_v3 = vmul.f32 0.03125, %v1548_v39 }
 0x9e2   :  { %v1545_v41 = vpop.xlane.xlu0 %1544 }
 0x9e3   :  { %v1552_v46 = vadd.f32 1e-05, %v1550_v3  ;;  %v1549_v47 = vmul.f32 0.03125, %v1545_v41  ;;  %v8464_v3 = vld [vmem:[%s9286_s5] sm:$0xff] }
 0x9e4   :  { %v1669_v50 = vpop.permute.xlu1 %1668 }
 0x9e5   :  { %7658 = vrsqrt.f32 %v1552_v46  ;;  %v1551_v51 = vadd.f32 1e-05, %v1549_v47  ;;  %7168 = vmatprep.subr.mxu1 %v1669_v50 }
 0x9e6   :  { %v1667_v53 = vpop.permute.xlu0 %1666  ;;  %7169 = vmatpush3.msra.mxu1 %v1669_v50 }
 0x9e7   :  { %7660 = vrsqrt.f32 %v1551_v51  ;;  %7170 = vmatprep.subr.mxu1 %v1667_v53 }
 0x9e8   :  { %7171 = vmatpush3.msra.mxu1 %v1667_v53  ;;  %v1786_v29 = vpop.permute.xlu1 %1785 }
 0x9e9   :  { %7173 = vmatmul.mubr.msk.f32.vlgmr.msra.gmra.mxu1 %vm183_vm0, %v8375_v52  ;;  %7178 = vmatprep.subr.mxu0 %v1786_v29 }
 0x9ea   :  { %7175 = vmatprep.mubr.msk.f32.mxu1 %vm183_vm0, %v8378_v54  ;;  %v1784_v42 = vpop.permute.xlu0 %1783 }
 0x9ec   :  { %v1782_v26 = vpop.permute.xlu1 %1781 }
 0x9ed   :  { %7176 = vmatmul.mubr.msk.f32.gmra.mxu1 %vm183_vm0, %v8385_v57 }
 0x9f2   :  { %v7659_v60 = vpop.eup %7658 }
 0x9f3   :  { %v1556_v61 = vmul.f32 %v7659_v60, %v1540_v32 }
 0x9f4   :  { %v7661_v62 = vpop.eup %7660 }
 0x9f5   :  { %v1555_v0 = vmul.f32 %v7661_v62, %v1539_v23  ;;  %v1562_v14 = vmul.f32 %v1560_v59, %v1556_v61 }
 0x9f7   :  { %v1561_v15 = vmul.f32 %v1560_v59, %v1555_v0  ;;  %v8397_v16 = vadd.f32 %v1566_v63, %v1562_v14 }
 0x9f9   :  { %v8399_v17 = vadd.f32 %v1566_v63, %v1561_v15  ;;  %v1570_v19 = vadd.f32 %v8397_v16, %v8123_v10 }
 0x9fb   :  { %v1569_v18 = vadd.f32 %v8399_v17, %v8114_v7 }
 0x9fd   :  { %7161 = vmatprep.mubr.msk.f32.mxu0 %vm183_vm0, %v1569_v18 }
 0x9fe   :  { %7162 = vmatmul.mubr.msk.f32.vlgmr.msra.gmra.mxu0 %vm183_vm0, %v1570_v19 }
 0x9ff   :  { %7186 = vmatprep.mubr.msk.f32.mxu0 %vm183_vm0, %v142_v36  ;;  %7179 = vmatpush3.msra.mxu0 %v1786_v29  ;;  %v1780_v36 = vpop.permute.xlu0 %1779 }
 0xa00   :  { %7180 = vmatprep.subr.mxu0 %v1784_v42 }
 0xa01   :  { %7181 = vmatpush3.msra.mxu0 %v1784_v42 }
 0xa02   :  { %7182 = vmatprep.subr.mxu0 %v1782_v26 }
 0xa03   :  { %7183 = vmatpush3.msra.mxu0 %v1782_v26 }
 0xa04   :  { %7184 = vmatprep.subr.mxu0 %v1780_v36 }
 0xa05   :  { %7185 = vmatpush3.msra.mxu0 %v1780_v36 }
 0xa06   :  { %7187 = vmatmul.mubr.msk.f32.vlgmr.msra.gmra.mxu0 %vm183_vm0, %v8370_v43 }
 0xa07   :  { %7189 = vmatprep.mubr.msk.f32.mxu0 %vm183_vm0, %v8372_v48  ;;  %v8471_v48 = vsub.s32 6, %v8091_v1 }
 0xa09   :  { %v1778_v50 = vrot.slane %v8125_v11, %v8471_v48 }
 0xa0a   :  { %7190 = vmatmul.mubr.msk.f32.gmra.mxu0 %vm183_vm0, %v8380_v37 }
 0xaa9   :  { %v7174_v13 = vpop.f32.mrf.mxu1 }
 0xaaa   :  { %v8423_v25 = vadd.f32 %v7174_v13, %v1661_v22 }
 0xaab   :  { %v1756_v44 = vpop.f32.mrf.mxu1 }
 0xaac   :  { %v8429_v9 = vadd.f32 %v1756_v44, %v1661_v22 }
 0xaad   :  { %v7177_v24 = vpop.f32.mrf.mxu1 }
 0xaae   :  { %v8413_v5 = vadd.f32 %v7177_v24, %v1661_v22 }
 0xaaf   :  { %v1766_v7 = vpop.f32.mrf.mxu1 }
 0xab0   :  { %7192 = vmatprep.subr.msk.mxu1 %vm390_vm1, %v8413_v5  ;;  %v8417_v10 = vadd.f32 %v1766_v7, %v1661_v22 }
 0xab1   :  { %7193 = vmatpush3.xpose.msk.msra.mxu1 %vm390_vm1, %v8413_v5 }
 0xab2   :  { %7194 = vmatprep.subr.msk.mxu1 %vm390_vm1, %v8417_v10 }
 0xab5   :  { %7195 = vmatpush3.xpose.msk.msra.mxu1 %vm390_vm1, %v8417_v10 }
 0xab6   :  { %7196 = vmatprep.subr.msk.mxu1 %vm390_vm1, %v8423_v25 }
 0xab9   :  { %7197 = vmatpush3.xpose.msk.msra.mxu1 %vm390_vm1, %v8423_v25 }
 0xaba   :  { %7198 = vmatprep.subr.msk.mxu1 %vm390_vm1, %v8429_v9 }
 0xabd   :  { %7199 = vmatpush3.xpose.msk.msra.mxu1 %vm390_vm1, %v8429_v9 }
 0xabe   :  { %v7163_v32 = vpop.f32.mrf.mxu0 }
 0xabf   :  { %v1653_v27 = vadd.f32 %v7163_v32, %v1574_v31 }
 0xac0   :  { %v1647_v33 = vpop.f32.mrf.mxu0 }
 0xac1   :  { %v1648_v23 = vadd.f32 %v1647_v33, %v1574_v31  ;;  %v8444_v35 = vmul.f32 0.35355338, %v1653_v27 }
 0xac3   :  { %v8442_v34 = vmul.f32 0.35355338, %v1648_v23 }
 0xac5   :  { %7200 = vmatprep.mubr.msk.f32.mxu1 %vm390_vm1, %v8442_v34 }
 0xac6   :  { %7201 = vmatmul.mubr.msk.f32.vlgmr.msra.gmra.mxu1 %vm390_vm1, %v8444_v35  ;;  %v7188_v49 = vpop.f32.mrf.mxu0 }
 0xac7   :  { %v8477_v59 = vadd.f32 %v7188_v49, %v1778_v50 }
 0xac8   :  { %v1869_v51 = vpop.f32.mrf.mxu0 }
 0xac9   :  { %v8483_v61 = vadd.f32 %v1869_v51, %v1778_v50 }
 0xaca   :  { %v7191_v53 = vpop.f32.mrf.mxu0 }
 0xacb   :  { %v8475_v37 = vadd.f32 %v7191_v53, %v1778_v50 }
 0xacc   :  { %v1879_v40 = vpop.f32.mrf.mxu0 }
 0xacd   :  { %v8479_v60 = vadd.f32 %v1879_v40, %v1778_v50  ;;  %7203 = vmatprep.subr.mxu0 %v8475_v37 }
 0xace   :  { %7204 = vmatpush3.msra.mxu0 %v8475_v37 }
 0xacf   :  { %7205 = vmatprep.subr.mxu0 %v8479_v60 }
 0xad0   :  { %7206 = vmatpush3.msra.mxu0 %v8479_v60 }
 0xad1   :  { %7207 = vmatprep.subr.mxu0 %v8477_v59 }
 0xad2   :  { %7208 = vmatpush3.msra.mxu0 %v8477_v59 }
 0xad3   :  { %7209 = vmatprep.subr.mxu0 %v8483_v61 }
 0xad4   :  { %7210 = vmatpush3.msra.mxu0 %v8483_v61 }
 0xb86   :  { %v7202_v39 = vpop.f32.mrf.mxu1 }
 0xb87   :  { %v1978_v41 = vadd.f32 %v7202_v39, %v8459_v38 }
 0xb88   :  { %v1972_v43 = vpop.f32.mrf.mxu1 }
 0xb89   :  { %v1973_v45 = vadd.f32 %v1972_v43, %v8464_v3  ;;  %v1984_v46 = vsel %vm183_vm0, %v1978_v41, -inf }
 0xb8a   :  { %1985 = vmax.xlane.f32.xlu0 %v1984_v46 }
 0xb8b   :  { %v1981_v47 = vsel %vm183_vm0, %v1973_v45, -inf }
 0xb8c   :  { %1982 = vmax.xlane.f32.xlu1 %v1981_v47 }
 0xc13   :  { %v1986_v11 = vpop.xlane.xlu0 %1985 }
 0xc14   :  { %v1988_v62 = vsub.f32 %v1978_v41, %v1986_v11 }
 0xc15   :  { %v1983_v63 = vpop.xlane.xlu1 %1982 }
 0xc16   :  { %v1991_v0 = vmul.f32 1.442695, %v1988_v62  ;;  %v1987_v14 = vsub.f32 %v1973_v45, %v1983_v63 }
 0xc18   :  { %7662 = vpow2.f32 %v1991_v0  ;;  %v1989_v15 = vmul.f32 1.442695, %v1987_v14 }
 0xc1a   :  { %7664 = vpow2.f32 %v1989_v15 }
 0xc25   :  { %v7663_v18 = vpop.eup %7662 }
 0xc26   :  { %v1996_v19 = vsel %vm183_vm0, %v7663_v18, 0.0 }
 0xc27   :  { %v7665_v13 = vpop.eup %7664  ;;  %1997 = vadd.xlane.f32.xlu1 %v1996_v19 }
 0xc28   :  { %v1993_v22 = vsel %vm183_vm0, %v7665_v13, 0.0 }
 0xc29   :  { %1994 = vadd.xlane.f32.xlu0 %v1993_v22 }
 0xc38   :  { %2092 = vrot.lane.b32.xlu1 %v8417_v10, %s7979_s0 }
 0xc3c   :  { %2090 = vrot.lane.b32.xlu1 %v8423_v25, %s7979_s0 }
 0xc3f   :  { %2094 = vrot.lane.b32.xlu0 %v8413_v5, %s7979_s0 }
 0xc40   :  { %2084 = vrot.lane.b32.xlu1 %v8442_v34, %s7979_s0 }
 0xc43   :  { %2088 = vrot.lane.b32.xlu0 %v8429_v9, %s7979_s0 }
 0xc44   :  { %2480 = vrot.lane.b32.xlu1 %v8413_v5, %s7981_s1 }
 0xc47   :  { %2086 = vrot.lane.b32.xlu0 %v8444_v35, %s7979_s0 }
 0xc48   :  { %2476 = vrot.lane.b32.xlu1 %v8423_v25, %s7981_s1 }
 0xc4b   :  { %2478 = vrot.lane.b32.xlu0 %v8417_v10, %s7981_s1 }
 0xc4c   :  { %2470 = vrot.lane.b32.xlu1 %v8442_v34, %s7981_s1 }
 0xc4f   :  { %2474 = vrot.lane.b32.xlu0 %v8429_v9, %s7981_s1 }
 0xc53   :  { %2472 = vrot.lane.b32.xlu0 %v8444_v35, %s7981_s1 }
 0xcb0   :  { %v1998_v44 = vpop.xlane.xlu1 %1997 }
 0xcb1   :  { %7666 = vrcp.f32 %v1998_v44 }
 0xcb2   :  { %v1995_v24 = vpop.xlane.xlu0 %1994 }
 0xcb3   :  { %7668 = vrcp.f32 %v1995_v24 }
 0xcb4   :  { %v2093_v7 = vpop.permute.xlu1 %2092 }
 0xcb6   :  { %v2095_v31 = vpop.permute.xlu0 %2094 }
 0xcb7   :  { %7214 = vmatprep.subr.msk.mxu0 %vm390_vm1, %v2095_v31 }
 0xcb8   :  { %v2091_v32 = vpop.permute.xlu1 %2090 }
 0xcba   :  { %v2089_v36 = vpop.permute.xlu0 %2088 }
 0xcbc   :  { %v2085_v42 = vpop.permute.xlu1 %2084 }
 0xcbe   :  { %v7667_v27 = vpop.eup %7666  ;;  %v2087_v41 = vpop.permute.xlu0 %2086 }
 0xcbf   :  { %v2002_v29 = vmul.f32 %v7667_v27, %v7663_v18 }
 0xcc0   :  { %v7669_v33 = vpop.eup %7668  ;;  %v2481_v26 = vpop.permute.xlu1 %2480 }
 0xcc1   :  { %v2001_v23 = vmul.f32 %v7669_v33, %v7665_v13 }
 0xcc2   :  { %v2479_v45 = vpop.permute.xlu0 %2478 }
 0xcc3   :  { %7211 = vmatprep.mubr.msk.f32.mxu0 %vm183_vm0, %v2001_v23 }
 0xcc4   :  { %7212 = vmatmul.mubr.msk.f32.vlgmr.msra.gmra.mxu0 %vm183_vm0, %v2002_v29  ;;  %v2477_v39 = vpop.permute.xlu1 %2476 }
 0xcc5   :  { %7215 = vmatpush3.xpose.msk.msra.mxu0 %vm390_vm1, %v2095_v31  ;;  %7222 = vmatprep.mubr.msk.f32.mxu0 %vm390_vm1, %v2085_v42 }
 0xcc6   :  { %7216 = vmatprep.subr.msk.mxu0 %vm390_vm1, %v2093_v7  ;;  %v2475_v46 = vpop.permute.xlu0 %2474 }
 0xcc8   :  { %v2471_v43 = vpop.permute.xlu1 %2470 }
 0xcc9   :  { %7217 = vmatpush3.xpose.msk.msra.mxu0 %vm390_vm1, %v2093_v7 }
 0xcca   :  { %7218 = vmatprep.subr.msk.mxu0 %vm390_vm1, %v2091_v32  ;;  %v2473_v47 = vpop.permute.xlu0 %2472 }
 0xccd   :  { %7219 = vmatpush3.xpose.msk.msra.mxu0 %vm390_vm1, %v2091_v32 }
 0xcce   :  { %7220 = vmatprep.subr.msk.mxu0 %vm390_vm1, %v2089_v36 }
 0xcd1   :  { %7221 = vmatpush3.xpose.msk.msra.mxu0 %vm390_vm1, %v2089_v36 }
 0xcd2   :  { %7246 = vmatprep.subr.msk.mxu0 %vm390_vm1, %v2481_v26 }
 0xcd4   :  { %7223 = vmatmul.mubr.msk.f32.vlgmr.msra.gmra.mxu0 %vm390_vm1, %v2087_v41 }
 0xcd5   :  { %7247 = vmatpush3.xpose.msk.msra.mxu0 %vm390_vm1, %v2481_v26  ;;  %7254 = vmatprep.mubr.msk.f32.mxu0 %vm390_vm1, %v2471_v43 }
 0xcd6   :  { %7248 = vmatprep.subr.msk.mxu0 %vm390_vm1, %v2479_v45 }
 0xcd9   :  { %7249 = vmatpush3.xpose.msk.msra.mxu0 %vm390_vm1, %v2479_v45 }
 0xcda   :  { %7250 = vmatprep.subr.msk.mxu0 %vm390_vm1, %v2477_v39 }
 0xcdd   :  { %7251 = vmatpush3.xpose.msk.msra.mxu0 %vm390_vm1, %v2477_v39 }
 0xcde   :  { %7252 = vmatprep.subr.msk.mxu0 %vm390_vm1, %v2475_v46 }
 0xce1   :  { %7253 = vmatpush3.xpose.msk.msra.mxu0 %vm390_vm1, %v2475_v46 }
 0xce4   :  { %7255 = vmatmul.mubr.msk.f32.vlgmr.msra.gmra.mxu0 %vm390_vm1, %v2473_v47 }
 0xd84   :  { %v8539_v49 = vpop.f32.mrf.mxu0 }
 0xd86   :  { %v8541_v50 = vpop.f32.mrf.mxu0 }
 0xd94   :  { %v7224_v51 = vpop.f32.mrf.mxu0 }
 0xd95   :  { %v2180_v53 = vadd.f32 %v7224_v51, %v8459_v38 }
 0xd96   :  { %v2174_v40 = vpop.f32.mrf.mxu0 }
 0xd97   :  { %v2175_v11 = vadd.f32 %v2174_v40, %v8464_v3  ;;  %v2186_v62 = vsel %vm183_vm0, %v2180_v53, -inf }
 0xd98   :  { %2187 = vmax.xlane.f32.xlu0 %v2186_v62 }
 0xd99   :  { %v2183_v63 = vsel %vm183_vm0, %v2175_v11, -inf }
 0xd9a   :  { %2184 = vmax.xlane.f32.xlu1 %v2183_v63 }
 0xda4   :  { %v7256_v27 = vpop.f32.mrf.mxu0 }
 0xda5   :  { %v2566_v29 = vadd.f32 %v7256_v27, %v8459_v38 }
 0xda6   :  { %v2560_v33 = vpop.f32.mrf.mxu0 }
 0xda7   :  { %v2561_v23 = vadd.f32 %v2560_v33, %v8464_v3  ;;  %v2572_v26 = vsel %vm183_vm0, %v2566_v29, -inf }
 0xda9   :  { %v2569_v42 = vsel %vm183_vm0, %v2561_v23, -inf }
 0xdab   :  { %2213 = vrot.lane.b32.xlu1 %v8479_v60, %s7979_s0 }
 0xdae   :  { %2215 = vrot.lane.b32.xlu0 %v8475_v37, %s7979_s0 }
 0xe21   :  { %v2188_v0 = vpop.xlane.xlu0 %2187 }
 0xe22   :  { %v2190_v14 = vsub.f32 %v2180_v53, %v2188_v0 }
 0xe23   :  { %v2185_v15 = vpop.xlane.xlu1 %2184 }
 0xe24   :  { %v2193_v18 = vmul.f32 1.442695, %v2190_v14  ;;  %v2189_v19 = vsub.f32 %v2175_v11, %v2185_v15 }
 0xe25   :  { %v2216_v13 = vpop.permute.xlu0 %2215 }
 0xe26   :  { %7670 = vpow2.f32 %v2193_v18  ;;  %v2191_v22 = vmul.f32 1.442695, %v2189_v19  ;;  %7225 = vmatprep.subr.mxu1 %v2216_v13 }
 0xe27   :  { %7226 = vmatpush3.msra.mxu1 %v2216_v13  ;;  %v2214_v44 = vpop.permute.xlu1 %2213 }
 0xe28   :  { %7672 = vpow2.f32 %v2191_v22  ;;  %7227 = vmatprep.subr.mxu1 %v2214_v44 }
 0xe29   :  { %7228 = vmatpush3.msra.mxu1 %v2214_v44 }
 0xe33   :  { %v7671_v24 = vpop.eup %7670 }
 0xe34   :  { %v2198_v7 = vsel %vm183_vm0, %v7671_v24, 0.0 }
 0xe35   :  { %v7673_v31 = vpop.eup %7672  ;;  %2199 = vadd.xlane.f32.xlu1 %v2198_v7 }
 0xe36   :  { %v2195_v32 = vsel %vm183_vm0, %v7673_v31, 0.0 }
 0xe37   :  { %2196 = vadd.xlane.f32.xlu0 %v2195_v32 }
 0xe46   :  { %2211 = vrot.lane.b32.xlu1 %v8477_v59, %s7979_s0 }
 0xe4d   :  { %2209 = vrot.lane.b32.xlu0 %v8483_v61, %s7979_s0 }
 0xe6a   :  { %2570 = vmax.xlane.f32.xlu1 %v2569_v42 }
 0xe6c   :  { %2573 = vmax.xlane.f32.xlu0 %v2572_v26 }
 0xe7b   :  { %2386 = vrot.lane.b32.xlu1 %v8348_v6, %s7976_s11 }
 0xe7f   :  { %2597 = vrot.lane.b32.xlu1 %v8475_v37, %s7981_s1 }
 0xe82   :  { %2302 = vrot.lane.b32.xlu0 %v8339_v56, %s7976_s11 }
 0xe86   :  { %2595 = vrot.lane.b32.xlu0 %v8479_v60, %s7981_s1 }
 0xebe   :  { %v2200_v36 = vpop.xlane.xlu1 %2199 }
 0xebf   :  { %7674 = vrcp.f32 %v2200_v36 }
 0xec0   :  { %v2197_v39 = vpop.xlane.xlu0 %2196 }
 0xec1   :  { %7676 = vrcp.f32 %v2197_v39 }
 0xec2   :  { %v2212_v41 = vpop.permute.xlu1 %2211 }
 0xec3   :  { %7229 = vmatprep.subr.mxu1 %v2212_v41 }
 0xec4   :  { %v2210_v43 = vpop.permute.xlu0 %2209  ;;  %7230 = vmatpush3.msra.mxu1 %v2212_v41 }
 0xec5   :  { %7231 = vmatprep.subr.mxu1 %v2210_v43 }
 0xec6   :  { %7232 = vmatpush3.msra.mxu1 %v2210_v43 }
 0xecc   :  { %v7675_v6 = vpop.eup %7674 }
 0xecd   :  { %v2204_v47 = vmul.f32 %v7675_v6, %v7671_v24 }
 0xece   :  { %v7677_v45 = vpop.eup %7676 }
 0xecf   :  { %v2203_v46 = vmul.f32 %v7677_v45, %v7673_v31 }
 0xed1   :  { %7233 = vmatprep.mubr.msk.f32.mxu1 %vm183_vm0, %v2203_v46 }
 0xed2   :  { %7234 = vmatmul.mubr.msk.f32.vlgmr.msra.gmra.mxu1 %vm183_vm0, %v2204_v47 }
 0xef3   :  { %v2571_v56 = vpop.xlane.xlu1 %2570 }
 0xef4   :  { %v2575_v51 = vsub.f32 %v2561_v23, %v2571_v56 }
 0xef5   :  { %v2574_v53 = vpop.xlane.xlu0 %2573 }
 0xef6   :  { %v2577_v40 = vmul.f32 1.442695, %v2575_v51  ;;  %v2576_v11 = vsub.f32 %v2566_v29, %v2574_v53 }
 0xef7   :  { %v2387_v0 = vpop.permute.xlu1 %2386 }
 0xef8   :  { %7678 = vpow2.f32 %v2577_v40  ;;  %v2579_v62 = vmul.f32 1.442695, %v2576_v11 }
 0xef9   :  { %v2303_v63 = vpop.permute.xlu0 %2302 }
 0xefa   :  { %7680 = vpow2.f32 %v2579_v62  ;;  %7236 = vmatprep.subr.mxu1 %v2303_v63 }
 0xefb   :  { %7237 = vmatpush3.msra.mxu1 %v2303_v63 }
 0xefc   :  { %7241 = vmatprep.subr.mxu1 %v2387_v0 }
 0xefd   :  { %v2596_v13 = vpop.permute.xlu0 %2595 }
 0xf05   :  { %v7679_v14 = vpop.eup %7678 }
 0xf06   :  { %v2581_v15 = vsel %vm183_vm0, %v7679_v14, 0.0 }
 0xf07   :  { %v7681_v18 = vpop.eup %7680  ;;  %2582 = vadd.xlane.f32.xlu0 %v2581_v15 }
 0xf08   :  { %v2584_v19 = vsel %vm183_vm0, %v7681_v18, 0.0 }
 0xf09   :  { %2585 = vadd.xlane.f32.xlu1 %v2584_v19 }
 0xf1a   :  { %2593 = vrot.lane.b32.xlu1 %v8477_v59, %s7981_s1 }
 0xf1d   :  { %2591 = vrot.lane.b32.xlu0 %v8483_v61, %s7981_s1 }
 0xf1e   :  { %2684 = vrot.lane.b32.xlu1 %v8320_v55, %s7976_s11  ;;  %v2598_v55 = vpop.permute.xlu1 %2597 }
 0xf21   :  { %2780 = vrot.lane.b32.xlu0 %v8413_v5, %s7983_s2 }
 0xf22   :  { %2778 = vrot.lane.b32.xlu1 %v8417_v10, %s7983_s2 }
 0xf25   :  { %2776 = vrot.lane.b32.xlu0 %v8423_v25, %s7983_s2 }
 0xf26   :  { %2774 = vrot.lane.b32.xlu1 %v8429_v9, %s7983_s2 }
 0xf29   :  { %2770 = vrot.lane.b32.xlu0 %v8442_v34, %s7983_s2 }
 0xf2a   :  { %2772 = vrot.lane.b32.xlu1 %v8444_v35, %s7983_s2 }
 0xf90   :  { %v2583_v22 = vpop.xlane.xlu0 %2582 }
 0xf91   :  { %7682 = vrcp.f32 %v2583_v22 }
 0xf92   :  { %v7235_v5 = vpop.f32.mrf.mxu1  ;;  %v2586_v44 = vpop.xlane.xlu1 %2585 }
 0xf93   :  { %7684 = vrcp.f32 %v2586_v44 }
 0xf94   :  { %v2293_v10 = vpop.f32.mrf.mxu1  ;;  %v2592_v34 = vpop.permute.xlu0 %2591 }
 0xf95   :  { %7238 = vmatprep.mubr.msk.f32.mxu1 %vm390_vm1, %v2293_v10 }
 0xf96   :  { %7239 = vmatmul.mubr.msk.f32.vlgmr.msra.gmra.mxu1 %vm390_vm1, %v7235_v5  ;;  %v2594_v25 = vpop.permute.xlu1 %2593 }
 0xf97   :  { %7242 = vmatpush3.msra.mxu1 %v2387_v0  ;;  %7243 = vmatprep.mubr.msk.f32.mxu1 %vm390_vm1, %v8541_v50 }
 0xf98   :  { %7257 = vmatprep.subr.mxu1 %v2598_v55 }
 0xf9a   :  { %7244 = vmatmul.mubr.msk.f32.vlgmr.msra.gmra.mxu1 %vm390_vm1, %v8539_v49  ;;  %v2685_v7 = vpop.permute.xlu1 %2684  ;;  %v2781_v49 = vpop.permute.xlu0 %2780 }
 0xf9b   :  { %7258 = vmatpush3.msra.mxu1 %v2598_v55 }
 0xf9c   :  { %7259 = vmatprep.subr.mxu1 %v2596_v13 }
 0xf9d   :  { %7260 = vmatpush3.msra.mxu1 %v2596_v13 }
 0xf9e   :  { %v7683_v9 = vpop.eup %7682  ;;  %7261 = vmatprep.subr.mxu1 %v2594_v25  ;;  %v2777_v42 = vpop.permute.xlu0 %2776 }
 0xf9f   :  { %7262 = vmatpush3.msra.mxu1 %v2594_v25  ;;  %v2589_v35 = vmul.f32 %v7683_v9, %v7679_v14  ;;  %v2779_v41 = vpop.permute.xlu1 %2778 }
 0xfa0   :  { %v7685_v24 = vpop.eup %7684  ;;  %7263 = vmatprep.subr.mxu1 %v2592_v34 }
 0xfa1   :  { %7264 = vmatpush3.msra.mxu1 %v2592_v34  ;;  %7265 = vmatprep.mubr.msk.f32.mxu1 %vm183_vm0, %v2589_v35  ;;  %v2590_v50 = vmul.f32 %v7685_v24, %v7681_v18 }
 0xfa2   :  { %7268 = vmatprep.subr.mxu1 %v2685_v7  ;;  %v2771_v39 = vpop.permute.xlu0 %2770 }
 0xfa3   :  { %7266 = vmatmul.mubr.msk.f32.vlgmr.msra.gmra.mxu1 %vm183_vm0, %v2590_v50  ;;  %v2775_v43 = vpop.permute.xlu1 %2774  ;;  %v7782_v50 = vld [vmem:[#allocation11] sm:$0xff] }
 0xfa4   :  { %7269 = vmatpush3.msra.mxu1 %v2685_v7  ;;  %v3072_v7 = vsub.s32 7, %v8091_v1 }
 0xfa5   :  { %7273 = vmatprep.subr.msk.mxu1 %vm390_vm1, %v2781_v49 }
 0xfa7   :  { %v2773_v6 = vpop.permute.xlu1 %2772 }
0x1056   :  { %v7240_v31 = vpop.f32.mrf.mxu1 }
0x1058   :  { %v2377_v32 = vpop.f32.mrf.mxu1 }
0x105a   :  { %v7245_v27 = vpop.f32.mrf.mxu1 }
0x105b   :  { %v2467_v33 = vadd.f32 %v7245_v27, %v7240_v31 }
0x105c   :  { %v2461_v23 = vpop.f32.mrf.mxu1 }
0x105d   :  { %v2462_v29 = vadd.f32 %v2461_v23, %v2377_v32 }
0x1063   :  { %v7267_v26 = vpop.f32.mrf.mxu1 }
0x1065   :  { %v2675_v36 = vpop.f32.mrf.mxu1 }
0x1066   :  { %7270 = vmatprep.mubr.msk.f32.mxu1 %vm390_vm1, %v2675_v36 }
0x1067   :  { %7271 = vmatmul.mubr.msk.f32.vlgmr.msra.gmra.mxu1 %vm390_vm1, %v7267_v26 }
0x1068   :  { %7274 = vmatpush3.xpose.msk.msra.mxu1 %vm390_vm1, %v2781_v49  ;;  %7281 = vmatprep.mubr.msk.f32.mxu1 %vm390_vm1, %v2771_v39  ;;  %v3073_v49 = vrot.slane %v7782_v50, %v3072_v7  ;;  %v6629_v50 = vld [vmem:[#allocation10] ss:$0 sm:$0xff] }
0x1069   :  { %7275 = vmatprep.subr.msk.mxu1 %vm390_vm1, %v2779_v41 }
0x106c   :  { %7276 = vmatpush3.xpose.msk.msra.mxu1 %vm390_vm1, %v2779_v41 }
0x106d   :  { %7277 = vmatprep.subr.msk.mxu1 %vm390_vm1, %v2777_v42 }
0x1070   :  { %7278 = vmatpush3.xpose.msk.msra.mxu1 %vm390_vm1, %v2777_v42 }
0x1071   :  { %7279 = vmatprep.subr.msk.mxu1 %vm390_vm1, %v2775_v43 }
0x1074   :  { %7280 = vmatpush3.xpose.msk.msra.mxu1 %vm390_vm1, %v2775_v43 }
0x1077   :  { %7282 = vmatmul.mubr.msk.f32.vlgmr.msra.gmra.mxu1 %vm390_vm1, %v2773_v6 }
0x1127   :  { %v7272_v45 = vpop.f32.mrf.mxu1 }
0x1128   :  { %v8611_v46 = vadd.f32 %v7272_v45, %v2467_v33 }
0x1129   :  { %v2759_v47 = vpop.f32.mrf.mxu1 }
0x112a   :  { %v8613_v56 = vadd.f32 %v2759_v47, %v2462_v29 }
0x1137   :  { %v7283_v51 = vpop.f32.mrf.mxu1 }
0x1138   :  { %v2866_v53 = vadd.f32 %v7283_v51, %v8459_v38 }
0x1139   :  { %v2860_v40 = vpop.f32.mrf.mxu1 }
0x113a   :  { %v2861_v11 = vadd.f32 %v2860_v40, %v8464_v3  ;;  %v2872_v62 = vsel %vm183_vm0, %v2866_v53, -inf  ;;  %v168_v40 = vld [vmem:[%s9289_s8 + $0x10] sm:$0xff] }
0x113b   :  { %2873 = vmax.xlane.f32.xlu1 %v2872_v62  ;;  %v166_v62 = vld [vmem:[%s9289_s8] sm:$0xff] }
0x113c   :  { %v2869_v63 = vsel %vm183_vm0, %v2861_v11, -inf }
0x113d   :  { %2870 = vmax.xlane.f32.xlu0 %v2869_v63  ;;  %v178_v63 = vld [vmem:[%s9291_s10 + $0x38] sm:$0xff] }
0x113e   :  { %7311 = vmatprep.subr.mxu1 %v178_v63 }
0x113f   :  { %7312 = vmatpush3.msra.mxu1 %v178_v63  ;;  %v8699_v63 = vld [vmem:[%s9287_s6 + $0x38] sm:$0xff] }
0x114c   :  { %2897 = vrot.lane.b32.xlu1 %v8475_v37, %s7983_s2 }
0x1150   :  { %2893 = vrot.lane.b32.xlu1 %v8477_v59, %s7983_s2 }
0x1154   :  { %2891 = vrot.lane.b32.xlu1 %v8483_v61, %s7983_s2 }
0x11c4   :  { %v2874_v0 = vpop.xlane.xlu1 %2873 }
0x11c5   :  { %v2876_v38 = vsub.f32 %v2866_v53, %v2874_v0  ;;  %v177_v0 = vld [vmem:[%s9291_s10 + $0x30] sm:$0xff] }
0x11c6   :  { %v2871_v14 = vpop.xlane.xlu0 %2870  ;;  %7313 = vmatprep.subr.mxu1 %v177_v0 }
0x11c7   :  { %v2879_v15 = vmul.f32 1.442695, %v2876_v38  ;;  %v2875_v3 = vsub.f32 %v2861_v11, %v2871_v14  ;;  %v167_v11 = vld [vmem:[%s9289_s8 + $0x8] sm:$0xff]  ;;  %7314 = vmatpush3.msra.mxu1 %v177_v0  ;;  %v175_v14 = vld [vmem:[%s9291_s10 + $0x20] sm:$0xff]  ;;  %v8704_v0 = vld [vmem:[%s9287_s6 + $0x30] sm:$0xff] }
0x11c8   :  { %v2898_v18 = vpop.permute.xlu1 %2897  ;;  %v176_v38 = vld [vmem:[%s9291_s10 + $0x28] sm:$0xff] }
0x11c9   :  { %7686 = vpow2.f32 %v2879_v15  ;;  %v2877_v19 = vmul.f32 1.442695, %v2875_v3  ;;  %7284 = vmatprep.subr.mxu0 %v2898_v18  ;;  %7315 = vmatprep.subr.mxu1 %v176_v38 }
0x11ca   :  { %7285 = vmatpush3.msra.mxu0 %v2898_v18  ;;  %7316 = vmatpush3.msra.mxu1 %v176_v38  ;;  %v8711_v38 = vld [vmem:[%s9287_s6 + $0x28] sm:$0xff] }
0x11cb   :  { %7688 = vpow2.f32 %v2877_v19  ;;  %7317 = vmatprep.subr.mxu1 %v175_v14 }
0x11cc   :  { %v2894_v5 = vpop.permute.xlu1 %2893  ;;  %7318 = vmatpush3.msra.mxu1 %v175_v14  ;;  %v8718_v14 = vld [vmem:[%s9287_s6 + $0x20] sm:$0xff] }
0x11d0   :  { %v2892_v10 = vpop.permute.xlu1 %2891 }
0x11d6   :  { %v7687_v13 = vpop.eup %7686 }
0x11d7   :  { %v2884_v37 = vsel %vm183_vm0, %v7687_v13, 0.0 }
0x11d8   :  { %v7689_v55 = vpop.eup %7688  ;;  %2885 = vadd.xlane.f32.xlu0 %v2884_v37 }
0x11d9   :  { %v2881_v59 = vsel %vm183_vm0, %v7689_v55, 0.0 }
0x11dc   :  { %2882 = vadd.xlane.f32.xlu0 %v2881_v59  ;;  %v3107_v59 = vrot.slane %v8391_v58, %v8325_v12 }
0x11f2   :  { %2895 = vrot.lane.b32.xlu0 %v8479_v60, %s7983_s2 }
0x11f6   :  { %2984 = vrot.lane.b32.xlu0 %v8313_v8, %s7976_s11 }
0x1261   :  { %v2886_v61 = vpop.xlane.xlu0 %2885 }
0x1262   :  { %7690 = vrcp.f32 %v2886_v61 }
0x1265   :  { %v2883_v22 = vpop.xlane.xlu0 %2882 }
0x1266   :  { %7692 = vrcp.f32 %v2883_v22 }
0x1269   :  { %v2896_v44 = vpop.permute.xlu0 %2895 }
0x126a   :  { %7286 = vmatprep.subr.mxu0 %v2896_v44 }
0x126b   :  { %7287 = vmatpush3.msra.mxu0 %v2896_v44 }
0x126c   :  { %7288 = vmatprep.subr.mxu0 %v2894_v5 }
0x126d   :  { %7289 = vmatpush3.msra.mxu0 %v2894_v5  ;;  %v2985_v25 = vpop.permute.xlu0 %2984 }
0x126e   :  { %7290 = vmatprep.subr.mxu0 %v2892_v10 }
0x126f   :  { %7291 = vmatpush3.msra.mxu0 %v2892_v10  ;;  %v7691_v9 = vpop.eup %7690  ;;  %v3113_v10 = vrot.slane %v8391_v58, %v8432_v28 }
0x1270   :  { %7295 = vmatprep.subr.mxu0 %v2985_v25  ;;  %v2890_v35 = vmul.f32 %v7691_v9, %v7687_v13 }
0x1273   :  { %v7693_v60 = vpop.eup %7692 }
0x1274   :  { %v2889_v34 = vmul.f32 %v7693_v60, %v7689_v55 }
0x1276   :  { %7292 = vmatprep.mubr.msk.f32.mxu0 %vm183_vm0, %v2889_v34  ;;  %v174_v34 = vld [vmem:[%s9291_s10 + $0x18] sm:$0xff] }
0x1277   :  { %7293 = vmatmul.mubr.msk.f32.vlgmr.msra.gmra.mxu0 %vm183_vm0, %v2890_v35  ;;  %7319 = vmatprep.subr.mxu1 %v174_v34  ;;  %v173_v35 = vld [vmem:[%s9291_s10 + $0x10] sm:$0xff] }
0x1278   :  { %7296 = vmatpush3.msra.mxu0 %v2985_v25  ;;  %7320 = vmatpush3.msra.mxu1 %v174_v34 }
0x1279   :  { %7321 = vmatprep.subr.mxu1 %v173_v35 }
0x127a   :  { %7322 = vmatpush3.msra.mxu1 %v173_v35 }
0x1337   :  { %v7294_v8 = vpop.f32.mrf.mxu0 }
0x1339   :  { %v2975_v24 = vpop.f32.mrf.mxu0 }
0x133a   :  { %7297 = vmatprep.mubr.msk.f32.mxu0 %vm390_vm1, %v2975_v24  ;;  %v171_v24 = vld [vmem:[%s9291_s10] sm:$0xff] }
0x133b   :  { %7298 = vmatmul.mubr.msk.f32.vlgmr.msra.gmra.mxu0 %vm390_vm1, %v7294_v8  ;;  %v172_v8 = vld [vmem:[%s9291_s10 + $0x8] sm:$0xff] }
0x133c   :  { %7323 = vmatprep.subr.mxu1 %v172_v8 }
0x133d   :  { %7324 = vmatpush3.msra.mxu1 %v172_v8  ;;  %v8737_v8 = vld [vmem:[#allocation7] sm:$0xff] }
0x133e   :  { %7325 = vmatprep.subr.mxu1 %v171_v24 }
0x133f   :  { %7326 = vmatpush3.msra.mxu1 %v171_v24 }
0x13fb   :  { %v7299_v31 = vpop.f32.mrf.mxu0 }
0x13fc   :  { %v3069_v32 = vadd.f32 %v7299_v31, %v8611_v46 }
0x13fd   :  { %v3059_v27 = vpop.f32.mrf.mxu0 }
0x13fe   :  { %v3075_v33 = vadd.f32 %v3073_v49, %v3069_v32  ;;  %v3068_v23 = vadd.f32 %v3059_v27, %v8613_v56 }
0x1400   :  { %v3074_v29 = vadd.f32 %v3073_v49, %v3068_v23  ;;  %v3077_v42 = vadd.f32 %v3075_v33, %v8397_v16 }
0x1402   :  { %v3081_v26 = vsel %vm183_vm0, %v3077_v42, 0.0  ;;  %v3076_v36 = vadd.f32 %v3074_v29, %v8399_v17  ;;  %v169_v17 = vld [vmem:[%s9289_s8 + $0x18] sm:$0xff]  ;;  %v3208_v29 = vrot.slane %v8391_v58, %v8156_v20 }
0x1403   :  { %3082 = vadd.xlane.f32.xlu0 %v3081_v26  ;;  %7300 = vmatprep.subr.mxu0 %v169_v17 }
0x1404   :  { %v3078_v39 = vsel %vm183_vm0, %v3076_v36, 0.0  ;;  %7301 = vmatpush3.msra.mxu0 %v169_v17 }
0x1405   :  { %3079 = vadd.xlane.f32.xlu1 %v3078_v39  ;;  %7302 = vmatprep.subr.mxu0 %v168_v40 }
0x1406   :  { %7303 = vmatpush3.msra.mxu0 %v168_v40 }
0x1407   :  { %7304 = vmatprep.subr.mxu0 %v167_v11 }
0x1408   :  { %7305 = vmatpush3.msra.mxu0 %v167_v11 }
0x1409   :  { %7306 = vmatprep.subr.mxu0 %v166_v62 }
0x140a   :  { %7307 = vmatpush3.msra.mxu0 %v166_v62 }
0x140b   :  { %7330 = vmatprep.subr.mxu0 %v8699_v63 }
0x148c   :  { %v3083_v41 = vpop.xlane.xlu0 %3082 }
0x148d   :  { %v3085_v43 = vmul.f32 0.03125, %v3083_v41 }
0x148e   :  { %v3080_v6 = vpop.xlane.xlu1 %3079 }
0x148f   :  { %v3087_v45 = vsub.f32 %v3077_v42, %v3085_v43  ;;  %v3084_v46 = vmul.f32 0.03125, %v3080_v6 }
0x1491   :  { %v3086_v47 = vsub.f32 %v3076_v36, %v3084_v46  ;;  %v3089_v51 = vmul.f32 %v3087_v45, %v3087_v45 }
0x1493   :  { %v3093_v56 = vsel %vm183_vm0, %v3089_v51, 0.0  ;;  %v3088_v53 = vmul.f32 %v3086_v47, %v3086_v47 }
0x1494   :  { %3094 = vadd.xlane.f32.xlu1 %v3093_v56 }
0x1495   :  { %v3090_v16 = vsel %vm183_vm0, %v3088_v53, 0.0 }
0x1496   :  { %3091 = vadd.xlane.f32.xlu0 %v3090_v16 }
0x151d   :  { %v3095_v15 = vpop.xlane.xlu1 %3094 }
0x151e   :  { %v3097_v3 = vmul.f32 0.03125, %v3095_v15  ;;  %v8724_v15 = vld [vmem:[#allocation11 + $0x10] sm:$0xff] }
0x151f   :  { %v3092_v18 = vpop.xlane.xlu0 %3091 }
0x1520   :  { %v3099_v19 = vadd.f32 1e-05, %v3097_v3  ;;  %v3096_v13 = vmul.f32 0.03125, %v3092_v18  ;;  %v3454_v3 = vrot.slane %v8724_v15, %v8094_v2 }
0x1522   :  { %7694 = vrsqrt.f32 %v3099_v19  ;;  %v3098_v37 = vadd.f32 1e-05, %v3096_v13 }
0x1524   :  { %7696 = vrsqrt.f32 %v3098_v37 }
0x152f   :  { %v7695_v55 = vpop.eup %7694 }
0x1530   :  { %v3103_v61 = vmul.f32 %v7695_v55, %v3087_v45 }
0x1531   :  { %v7697_v22 = vpop.eup %7696 }
0x1532   :  { %v3102_v5 = vmul.f32 %v7697_v22, %v3086_v47  ;;  %v3109_v44 = vmul.f32 %v3107_v59, %v3103_v61  ;;  %v3322_v61 = vrot.slane %v8391_v58, %v8409_v21 }
0x1534   :  { %v3108_v25 = vmul.f32 %v3107_v59, %v3102_v5  ;;  %v3115_v60 = vadd.f32 %v3113_v10, %v3109_v44 }
0x1536   :  { %v3114_v9 = vadd.f32 %v3113_v10, %v3108_v25  ;;  %v3328_v10 = vrot.slane %v8391_v58, %v8471_v48 }
0x1538   :  { %7308 = vmatprep.mubr.msk.f32.mxu0 %vm183_vm0, %v3114_v9 }
0x1539   :  { %7309 = vmatmul.mubr.msk.f32.vlgmr.msra.gmra.mxu0 %vm183_vm0, %v3115_v60 }
0x153a   :  { %7331 = vmatpush3.msra.mxu0 %v8699_v63 }
0x153b   :  { %7332 = vmatprep.subr.mxu0 %v8704_v0 }
0x153c   :  { %7333 = vmatpush3.msra.mxu0 %v8704_v0 }
0x153d   :  { %7334 = vmatprep.subr.mxu0 %v8711_v38 }
0x153e   :  { %7335 = vmatpush3.msra.mxu0 %v8711_v38 }
0x153f   :  { %7336 = vmatprep.subr.mxu0 %v8718_v14 }
0x1540   :  { %7337 = vmatpush3.msra.mxu0 %v8718_v14 }
0x15f9   :  { %v7310_v49 = vpop.f32.mrf.mxu0 }
0x15fa   :  { %v3200_v31 = vadd.f32 %v7310_v49, %v6629_v50 }
0x15fb   :  { %v3194_v32 = vpop.f32.mrf.mxu0 }
0x15fc   :  { %v3195_v27 = vadd.f32 %v6629_v50, %v3194_v32  ;;  %v3204_v23 = vmax.f32 %v3200_v31, 0.0  ;;  %v8741_v50 = vld [vmem:[#allocation7 + $0x8] sm:$0xff]  ;;  %v3446_v32 = vrot.slane %v8724_v15, %v8156_v20 }
0x15fe   :  { %v3203_v33 = vmax.f32 %v3195_v27, 0.0 }
0x1600   :  { %7327 = vmatprep.mubr.msk.f32.mxu1 %vm3209_vm3, %v3203_v33 }
0x1601   :  { %7328 = vmatmul.mubr.msk.f32.vlgmr.msra.gmra.mxu1 %vm3209_vm3, %v3204_v23 }
0x16c1   :  { %v7329_v42 = vpop.f32.mrf.mxu1 }
0x16c2   :  { %v3288_v26 = vadd.f32 %v7329_v42, %v3208_v29 }
0x16c3   :  { %v3282_v36 = vpop.f32.mrf.mxu1 }
0x16c4   :  { %v3292_v39 = vadd.f32 %v3288_v26, %v3115_v60  ;;  %v3283_v41 = vadd.f32 %v3282_v36, %v3208_v29 }
0x16c6   :  { %v3291_v43 = vadd.f32 %v3283_v41, %v3114_v9  ;;  %v3296_v6 = vsel %vm183_vm0, %v3292_v39, 0.0 }
0x16c7   :  { %3297 = vadd.xlane.f32.xlu1 %v3296_v6 }
0x16c8   :  { %v3293_v45 = vsel %vm183_vm0, %v3291_v43, 0.0 }
0x16c9   :  { %3294 = vadd.xlane.f32.xlu0 %v3293_v45 }
0x1750   :  { %v3298_v46 = vpop.xlane.xlu1 %3297 }
0x1751   :  { %v3300_v47 = vmul.f32 0.03125, %v3298_v46 }
0x1752   :  { %v3295_v51 = vpop.xlane.xlu0 %3294 }
0x1753   :  { %v3302_v56 = vsub.f32 %v3292_v39, %v3300_v47  ;;  %v3299_v53 = vmul.f32 0.03125, %v3295_v51 }
0x1755   :  { %v3301_v16 = vsub.f32 %v3291_v43, %v3299_v53  ;;  %v3304_v17 = vmul.f32 %v3302_v56, %v3302_v56 }
0x1757   :  { %v3308_v40 = vsel %vm183_vm0, %v3304_v17, 0.0  ;;  %v3303_v11 = vmul.f32 %v3301_v16, %v3301_v16  ;;  %v8798_v17 = vld [vmem:[%s9285_s4 + $0x8] sm:$0xff] }
0x1758   :  { %3309 = vadd.xlane.f32.xlu1 %v3308_v40 }
0x1759   :  { %v3305_v62 = vsel %vm183_vm0, %v3303_v11, 0.0 }
0x175a   :  { %3306 = vadd.xlane.f32.xlu0 %v3305_v62  ;;  %v8804_v62 = vld [vmem:[%s9285_s4] sm:$0xff] }
0x1770   :  { %3456 = vrot.lane.b32.xlu0 %v3454_v3, %s7976_s11 }
0x17e1   :  { %v3310_v18 = vpop.xlane.xlu1 %3309 }
0x17e2   :  { %v3312_v19 = vmul.f32 0.03125, %v3310_v18 }
0x17e3   :  { %v3307_v13 = vpop.xlane.xlu0 %3306 }
0x17e4   :  { %v3314_v37 = vadd.f32 1e-05, %v3312_v19  ;;  %v3311_v55 = vmul.f32 0.03125, %v3307_v13 }
0x17e6   :  { %7698 = vrsqrt.f32 %v3314_v37  ;;  %v3313_v59 = vadd.f32 1e-05, %v3311_v55 }
0x17e7   :  { %v3457_v58 = vpop.permute.xlu0 %3456 }
0x17e8   :  { %7700 = vrsqrt.f32 %v3313_v59  ;;  %v3464_v59 = vrot.slane %v8724_v15, %v8183_v30 }
0x17f3   :  { %v7699_v22 = vpop.eup %7698 }
0x17f4   :  { %v3318_v5 = vmul.f32 %v7699_v22, %v3302_v56 }
0x17f5   :  { %v7701_v44 = vpop.eup %7700 }
0x17f6   :  { %v3317_v25 = vmul.f32 %v7701_v44, %v3301_v16  ;;  %v3324_v9 = vmul.f32 %v3322_v61, %v3318_v5 }
0x17f8   :  { %v3323_v60 = vmul.f32 %v3322_v61, %v3317_v25  ;;  %v8733_v34 = vadd.f32 %v3328_v10, %v3324_v9 }
0x17fa   :  { %v8735_v35 = vadd.f32 %v3328_v10, %v3323_v60  ;;  %v3361_v49 = vadd.f32 %v8741_v50, %v8733_v34 }
0x17fc   :  { %v3360_v24 = vadd.f32 %v8737_v8, %v8735_v35 }
0x17fe   :  { %7338 = vmatprep.mubr.msk.f32.mxu0 %vm183_vm0, %v3360_v24 }
0x17ff   :  { %7339 = vmatmul.mubr.msk.f32.vlgmr.msra.gmra.mxu0 %vm183_vm0, %v3361_v49 }
0x1800   :  { %7349 = vmatprep.mubr.msk.f32.mxu0 %vm183_vm0, %v8735_v35 }
0x18bf   :  { %v7340_v31 = vpop.f32.mrf.mxu0 }
0x18c0   :  { %v8751_v27 = vadd.f32 %v7340_v31, %v3457_v58  ;;  %v3448_v26 = vadd.f32 %v7340_v31, %v3446_v32 }
0x18c1   :  { %v3434_v33 = vpop.f32.mrf.mxu0 }
0x18c2   :  { %v3447_v23 = vadd.f32 %v3446_v32, %v3434_v33  ;;  %3762 = vrot.lane.b32.xlu0 %v8751_v27, %s7977_s17  ;;  %3566 = vrot.lane.b32.xlu1 %v8751_v27, %s7978_s18  ;;  %v8759_v42 = vadd.f32 %v3457_v58, %v3434_v33  ;;  %v8771_v36 = vmul.f32 0.35355338, %v3448_v26 }
0x18c4   :  { %v8757_v29 = vmul.f32 0.35355338, %v3447_v23 }
0x18c6   :  { %7356 = vmatprep.mubr.msk.f32.mxu1 %vm390_vm1, %v8757_v29  ;;  %3756 = vrot.lane.b32.xlu0 %v8757_v29, %s7979_s0 }
0x18c7   :  { %3564 = vrot.lane.b32.xlu1 %v8759_v42, %s7978_s18 }
0x18ca   :  { %3475 = vrot.lane.b32.xlu0 %v8699_v63, %s7975_s29 }
0x18cb   :  { %3760 = vrot.lane.b32.xlu1 %v8759_v42, %s7977_s17 }
0x18ce   :  { %3471 = vrot.lane.b32.xlu0 %v8711_v38, %s7975_s29 }
0x18cf   :  { %3758 = vrot.lane.b32.xlu1 %v8771_v36, %s7979_s0 }
0x18d3   :  { %3473 = vrot.lane.b32.xlu1 %v8704_v0, %s7975_s29 }
0x18d7   :  { %3469 = vrot.lane.b32.xlu1 %v8718_v14, %s7975_s29 }
0x1934   :  { %v3763_v39 = vpop.permute.xlu0 %3762  ;;  %v3567_v41 = vpop.permute.xlu1 %3566 }
0x1935   :  { %7352 = vmatprep.subr.msk.mxu1 %vm390_vm1, %v3567_v41 }
0x1936   :  { %7353 = vmatpush3.xpose.msk.msra.mxu1 %vm390_vm1, %v3567_v41 }
0x1938   :  { %v3757_v43 = vpop.permute.xlu0 %3756 }
0x1939   :  { %v3565_v6 = vpop.permute.xlu1 %3564 }
0x193a   :  { %7354 = vmatprep.subr.msk.mxu1 %vm390_vm1, %v3565_v6 }
0x193b   :  { %7355 = vmatpush3.xpose.msk.msra.mxu1 %vm390_vm1, %v3565_v6 }
0x193c   :  { %7366 = vmatprep.subr.msk.mxu1 %vm390_vm1, %v3763_v39  ;;  %v3476_v45 = vpop.permute.xlu0 %3475 }
0x193d   :  { %v3761_v46 = vpop.permute.xlu1 %3760  ;;  %7341 = vmatprep.subr.mxu0 %v3476_v45 }
0x193e   :  { %7357 = vmatmul.mubr.msk.f32.vlgmr.msra.gmra.mxu1 %vm390_vm1, %v8771_v36  ;;  %7342 = vmatpush3.msra.mxu0 %v3476_v45 }
0x193f   :  { %7367 = vmatpush3.xpose.msk.msra.mxu1 %vm390_vm1, %v3763_v39  ;;  %7370 = vmatprep.mubr.msk.f32.mxu1 %vm390_vm1, %v3757_v43 }
0x1940   :  { %7368 = vmatprep.subr.msk.mxu1 %vm390_vm1, %v3761_v46  ;;  %v3472_v56 = vpop.permute.xlu0 %3471 }
0x1941   :  { %v3759_v47 = vpop.permute.xlu1 %3758 }
0x1943   :  { %7369 = vmatpush3.xpose.msk.msra.mxu1 %vm390_vm1, %v3761_v46 }
0x1945   :  { %v3474_v51 = vpop.permute.xlu1 %3473 }
0x1946   :  { %7343 = vmatprep.subr.mxu0 %v3474_v51  ;;  %7371 = vmatmul.mubr.msk.f32.vlgmr.msra.gmra.mxu1 %vm390_vm1, %v3759_v47 }
0x1947   :  { %7344 = vmatpush3.msra.mxu0 %v3474_v51 }
0x1948   :  { %7345 = vmatprep.subr.mxu0 %v3472_v56 }
0x1949   :  { %7346 = vmatpush3.msra.mxu0 %v3472_v56  ;;  %v3470_v53 = vpop.permute.xlu1 %3469 }
0x194a   :  { %7347 = vmatprep.subr.mxu0 %v3470_v53 }
0x194b   :  { %7348 = vmatpush3.msra.mxu0 %v3470_v53 }
0x194c   :  { %7350 = vmatmul.mubr.msk.f32.vlgmr.msra.gmra.mxu0 %vm183_vm0, %v8733_v34 }
0x19fe   :  { %v7358_v16 = vpop.f32.mrf.mxu1 }
0x19ff   :  { %v3650_v40 = vadd.f32 %v8798_v17, %v7358_v16 }
0x1a00   :  { %v3644_v11 = vpop.f32.mrf.mxu1 }
0x1a01   :  { %v3645_v3 = vadd.f32 %v8804_v62, %v3644_v11  ;;  %v3656_v18 = vsel %vm476_vm2, %v3650_v40, -inf }
0x1a02   :  { %3657 = vmax.xlane.f32.xlu1 %v3656_v18 }
0x1a03   :  { %v3653_v19 = vsel %vm476_vm2, %v3645_v3, -inf }
0x1a04   :  { %3654 = vmax.xlane.f32.xlu0 %v3653_v19 }
0x1a06   :  { %v7372_v13 = vpop.f32.mrf.mxu1 }
0x1a07   :  { %v3844_v61 = vadd.f32 %v8798_v17, %v7372_v13 }
0x1a08   :  { %v3838_v37 = vpop.f32.mrf.mxu1 }
0x1a09   :  { %v3839_v55 = vadd.f32 %v8804_v62, %v3838_v37  ;;  %v3850_v9 = vsel %vm476_vm2, %v3844_v61, -inf }
0x1a0b   :  { %v3847_v22 = vsel %vm476_vm2, %v3839_v55, -inf }
0x1a0c   :  { %3848 = vmax.xlane.f32.xlu0 %v3847_v22  ;;  %v7351_v5 = vpop.f32.mrf.mxu0 }
0x1a0d   :  { %v8814_v44 = vadd.f32 %v7351_v5, %v3464_v59 }
0x1a0e   :  { %v3553_v10 = vpop.f32.mrf.mxu0 }
0x1a0f   :  { %v8816_v25 = vadd.f32 %v3553_v10, %v3464_v59  ;;  %7359 = vmatprep.subr.mxu0 %v8814_v44 }
0x1a10   :  { %3851 = vmax.xlane.f32.xlu0 %v3850_v9  ;;  %7360 = vmatpush3.msra.mxu0 %v8814_v44 }
0x1a11   :  { %7361 = vmatprep.subr.mxu0 %v8816_v25 }
0x1a12   :  { %7362 = vmatpush3.msra.mxu0 %v8816_v25 }
0x1a8b   :  { %v3658_v60 = vpop.xlane.xlu1 %3657 }
0x1a8c   :  { %v3660_v24 = vsub.f32 %v3650_v40, %v3658_v60 }
0x1a8d   :  { %v3655_v49 = vpop.xlane.xlu0 %3654 }
0x1a8e   :  { %v3663_v58 = vmul.f32 1.442695, %v3660_v24  ;;  %v3659_v31 = vsub.f32 %v3645_v3, %v3655_v49 }
0x1a90   :  { %7702 = vpow2.f32 %v3663_v58  ;;  %v3661_v32 = vmul.f32 1.442695, %v3659_v31 }
0x1a92   :  { %7704 = vpow2.f32 %v3661_v32 }
0x1a95   :  { %v3849_v33 = vpop.xlane.xlu0 %3848 }
0x1a96   :  { %v3853_v23 = vsub.f32 %v3839_v55, %v3849_v33 }
0x1a98   :  { %v3855_v26 = vmul.f32 1.442695, %v3853_v23 }
0x1a99   :  { %v3852_v39 = vpop.xlane.xlu0 %3851 }
0x1a9a   :  { %7706 = vpow2.f32 %v3855_v26  ;;  %v3854_v41 = vsub.f32 %v3844_v61, %v3852_v39 }
0x1a9c   :  { %v3857_v43 = vmul.f32 1.442695, %v3854_v41 }
0x1a9d   :  { %v7703_v6 = vpop.eup %7702 }
0x1a9e   :  { %7708 = vpow2.f32 %v3857_v43  ;;  %v3668_v45 = vsel %vm476_vm2, %v7703_v6, 0.0 }
0x1a9f   :  { %v7705_v46 = vpop.eup %7704  ;;  %3669 = vadd.xlane.f32.xlu0 %v3668_v45 }
0x1aa0   :  { %v3665_v47 = vsel %vm476_vm2, %v7705_v46, 0.0 }
0x1aa1   :  { %3666 = vadd.xlane.f32.xlu1 %v3665_v47 }
0x1aa7   :  { %v7707_v51 = vpop.eup %7706 }
0x1aa8   :  { %v3859_v56 = vsel %vm476_vm2, %v7707_v51, 0.0 }
0x1aa9   :  { %3860 = vadd.xlane.f32.xlu1 %v3859_v56 }
0x1aab   :  { %v7709_v53 = vpop.eup %7708 }
0x1aac   :  { %v3862_v16 = vsel %vm476_vm2, %v7709_v53, 0.0 }
0x1aad   :  { %3863 = vadd.xlane.f32.xlu0 %v3862_v16 }
0x1aba   :  { %3873 = vrot.lane.b32.xlu1 %v8814_v44, %s7979_s0 }
0x1abe   :  { %3958 = vrot.lane.b32.xlu1 %v8711_v38, %s7976_s11 }
0x1ac2   :  { %4132 = vrot.lane.b32.xlu1 %v8751_v27, %s7980_s23 }
0x1ac3   :  { %3871 = vrot.lane.b32.xlu0 %v8816_v25, %s7979_s0 }
0x1ac6   :  { %4126 = vrot.lane.b32.xlu1 %v8757_v29, %s7981_s1 }
0x1ac7   :  { %4130 = vrot.lane.b32.xlu0 %v8759_v42, %s7980_s23 }
0x1aca   :  { %4418 = vrot.lane.b32.xlu1 %v8751_v27, %s7982_s24 }
0x1acb   :  { %4128 = vrot.lane.b32.xlu0 %v8771_v36, %s7981_s1 }
0x1ace   :  { %4412 = vrot.lane.b32.xlu1 %v8757_v29, %s7983_s2 }
0x1acf   :  { %4416 = vrot.lane.b32.xlu0 %v8759_v42, %s7982_s24 }
0x1ad3   :  { %4414 = vrot.lane.b32.xlu0 %v8771_v36, %s7983_s2 }
0x1b28   :  { %v3670_v38 = vpop.xlane.xlu0 %3669 }
0x1b29   :  { %7710 = vrcp.f32 %v3670_v38 }
0x1b2a   :  { %v3667_v40 = vpop.xlane.xlu1 %3666 }
0x1b2b   :  { %7712 = vrcp.f32 %v3667_v40 }
0x1b32   :  { %v3861_v11 = vpop.xlane.xlu1 %3860 }
0x1b33   :  { %7714 = vrcp.f32 %v3861_v11 }
0x1b36   :  { %v3864_v3 = vpop.xlane.xlu0 %3863  ;;  %v3874_v27 = vpop.permute.xlu1 %3873 }
0x1b37   :  { %v7711_v18 = vpop.eup %7710  ;;  %7716 = vrcp.f32 %v3864_v3  ;;  %7373 = vmatprep.subr.mxu0 %v3874_v27 }
0x1b38   :  { %v7713_v19 = vpop.eup %7712  ;;  %v3674_v29 = vmul.f32 %v7711_v18, %v7703_v6 }
0x1b39   :  { %v3673_v13 = vmul.f32 %v7713_v19, %v7705_v46 }
0x1b3a   :  { %v3872_v42 = vpop.permute.xlu0 %3871  ;;  %v3959_v36 = vpop.permute.xlu1 %3958 }
0x1b3b   :  { %7363 = vmatprep.mubr.msk.f32.mxu0 %vm476_vm2, %v3673_v13 }
0x1b3c   :  { %7364 = vmatmul.mubr.msk.f32.vlgmr.msra.gmra.mxu0 %vm476_vm2, %v3674_v29 }
0x1b3d   :  { %7374 = vmatpush3.msra.mxu0 %v3874_v27 }
0x1b3e   :  { %7375 = vmatprep.subr.mxu0 %v3872_v42  ;;  %v4133_v22 = vpop.permute.xlu1 %4132  ;;  %v4131_v24 = vpop.permute.xlu0 %4130 }
0x1b3f   :  { %7376 = vmatpush3.msra.mxu0 %v3872_v42 }
0x1b40   :  { %v7715_v37 = vpop.eup %7714  ;;  %7380 = vmatprep.subr.mxu0 %v3959_v36 }
0x1b41   :  { %v3867_v55 = vmul.f32 %v7715_v37, %v7707_v51 }
0x1b42   :  { %v4127_v9 = vpop.permute.xlu1 %4126  ;;  %v4129_v31 = vpop.permute.xlu0 %4128 }
0x1b43   :  { %7377 = vmatprep.mubr.msk.f32.mxu0 %vm476_vm2, %v3867_v55 }
0x1b44   :  { %v7717_v59 = vpop.eup %7716 }
0x1b45   :  { %v3868_v61 = vmul.f32 %v7717_v59, %v7709_v53 }
0x1b46   :  { %v4419_v58 = vpop.permute.xlu1 %4418  ;;  %v4417_v33 = vpop.permute.xlu0 %4416 }
0x1b47   :  { %7378 = vmatmul.mubr.msk.f32.vlgmr.msra.gmra.mxu0 %vm476_vm2, %v3868_v61 }
0x1b48   :  { %7381 = vmatpush3.msra.mxu0 %v3959_v36 }
0x1b49   :  { %7390 = vmatprep.subr.msk.mxu0 %vm390_vm1, %v4133_v22 }
0x1b4a   :  { %v4413_v32 = vpop.permute.xlu1 %4412  ;;  %v4415_v23 = vpop.permute.xlu0 %4414 }
0x1bfc   :  { %v8854_v5 = vpop.f32.mrf.mxu0 }
0x1bfe   :  { %v3747_v10 = vpop.f32.mrf.mxu0 }
0x1bff   :  { %7387 = vmatprep.mubr.msk.f32.mxu1 %vm390_vm1, %v3747_v10 }
0x1c07   :  { %v7379_v60 = vpop.f32.mrf.mxu0 }
0x1c09   :  { %v3949_v49 = vpop.f32.mrf.mxu0 }
0x1c0a   :  { %7382 = vmatprep.mubr.msk.f32.mxu0 %vm390_vm1, %v3949_v49 }
0x1c0b   :  { %7383 = vmatmul.mubr.msk.f32.vlgmr.msra.gmra.mxu0 %vm390_vm1, %v7379_v60 }
0x1c0c   :  { %7391 = vmatpush3.xpose.msk.msra.mxu0 %vm390_vm1, %v4133_v22  ;;  %7394 = vmatprep.mubr.msk.f32.mxu0 %vm390_vm1, %v4127_v9 }
0x1c0d   :  { %7392 = vmatprep.subr.msk.mxu0 %vm390_vm1, %v4131_v24 }
0x1c10   :  { %7393 = vmatpush3.xpose.msk.msra.mxu0 %vm390_vm1, %v4131_v24 }
0x1c11   :  { %7409 = vmatprep.subr.msk.mxu0 %vm390_vm1, %v4419_v58 }
0x1c13   :  { %7395 = vmatmul.mubr.msk.f32.vlgmr.msra.gmra.mxu0 %vm390_vm1, %v4129_v31 }
0x1c14   :  { %7410 = vmatpush3.xpose.msk.msra.mxu0 %vm390_vm1, %v4419_v58  ;;  %7413 = vmatprep.mubr.msk.f32.mxu0 %vm390_vm1, %v4413_v32 }
0x1c15   :  { %7411 = vmatprep.subr.msk.mxu0 %vm390_vm1, %v4417_v33 }
0x1c18   :  { %7412 = vmatpush3.xpose.msk.msra.mxu0 %vm390_vm1, %v4417_v33 }
0x1c1b   :  { %7414 = vmatmul.mubr.msk.f32.vlgmr.msra.gmra.mxu0 %vm390_vm1, %v4415_v23 }
0x1ccb   :  { %v8870_v26 = vpop.f32.mrf.mxu0 }
0x1ccd   :  { %v8872_v39 = vpop.f32.mrf.mxu0 }
0x1cd3   :  { %v7396_v41 = vpop.f32.mrf.mxu0 }
0x1cd4   :  { %v4214_v43 = vadd.f32 %v8798_v17, %v7396_v41 }
0x1cd5   :  { %v4208_v6 = vpop.f32.mrf.mxu0 }
0x1cd6   :  { %v4209_v45 = vadd.f32 %v8804_v62, %v4208_v6  ;;  %v4220_v46 = vsel %vm476_vm2, %v4214_v43, -inf }
0x1cd7   :  { %4221 = vmax.xlane.f32.xlu0 %v4220_v46 }
0x1cd8   :  { %v4217_v47 = vsel %vm476_vm2, %v4209_v45, -inf }
0x1cd9   :  { %4218 = vmax.xlane.f32.xlu1 %v4217_v47 }
0x1cdb   :  { %v7415_v19 = vpop.f32.mrf.mxu0 }
0x1cdc   :  { %v4500_v42 = vadd.f32 %v8798_v17, %v7415_v19 }
0x1cdd   :  { %v4494_v13 = vpop.f32.mrf.mxu0 }
0x1cde   :  { %v4495_v29 = vadd.f32 %v8804_v62, %v4494_v13  ;;  %v4506_v37 = vsel %vm476_vm2, %v4500_v42, -inf }
0x1ce0   :  { %v4503_v36 = vsel %vm476_vm2, %v4495_v29, -inf }
0x1d60   :  { %v4222_v51 = vpop.xlane.xlu0 %4221 }
0x1d61   :  { %v4224_v56 = vsub.f32 %v4214_v43, %v4222_v51 }
0x1d62   :  { %v4219_v53 = vpop.xlane.xlu1 %4218 }
0x1d63   :  { %v4227_v16 = vmul.f32 1.442695, %v4224_v56  ;;  %v4223_v38 = vsub.f32 %v4209_v45, %v4219_v53 }
0x1d65   :  { %7718 = vpow2.f32 %v4227_v16  ;;  %v4225_v40 = vmul.f32 1.442695, %v4223_v38 }
0x1d67   :  { %7720 = vpow2.f32 %v4225_v40 }
0x1d72   :  { %v7719_v11 = vpop.eup %7718 }
0x1d73   :  { %v4232_v3 = vsel %vm476_vm2, %v7719_v11, 0.0 }
0x1d74   :  { %v7721_v27 = vpop.eup %7720  ;;  %4233 = vadd.xlane.f32.xlu1 %v4232_v3 }
0x1d75   :  { %v4229_v18 = vsel %vm476_vm2, %v7721_v27, 0.0 }
0x1d76   :  { %4230 = vadd.xlane.f32.xlu0 %v4229_v18 }
0x1d85   :  { %4241 = vrot.lane.b32.xlu1 %v8814_v44, %s7981_s1 }
0x1d89   :  { %4239 = vrot.lane.b32.xlu1 %v8816_v25, %s7981_s1 }
0x1d8c   :  { %4042 = vrot.lane.b32.xlu0 %v8718_v14, %s7976_s11 }
0x1dab   :  { %4504 = vmax.xlane.f32.xlu0 %v4503_v36 }
0x1dad   :  { %4507 = vmax.xlane.f32.xlu1 %v4506_v37 }
0x1dbe   :  { %4326 = vrot.lane.b32.xlu1 %v8704_v0, %s7976_s11 }
0x1dc2   :  { %4525 = vrot.lane.b32.xlu1 %v8816_v25, %s7983_s2 }
0x1dc6   :  { %4612 = vrot.lane.b32.xlu1 %v8699_v63, %s7976_s11 }
0x1dfd   :  { %v4234_v14 = vpop.xlane.xlu1 %4233 }
0x1dfe   :  { %7722 = vrcp.f32 %v4234_v14 }
0x1dff   :  { %v4231_v62 = vpop.xlane.xlu0 %4230 }
0x1e00   :  { %7724 = vrcp.f32 %v4231_v62 }
0x1e01   :  { %v4242_v17 = vpop.permute.xlu1 %4241 }
0x1e03   :  { %v4043_v55 = vpop.permute.xlu0 %4042 }
0x1e04   :  { %7385 = vmatprep.subr.mxu1 %v4043_v55 }
0x1e05   :  { %7386 = vmatpush3.msra.mxu1 %v4043_v55  ;;  %v4240_v59 = vpop.permute.xlu1 %4239 }
0x1e06   :  { %7388 = vmatmul.mubr.msk.f32.vlgmr.msra.gmra.mxu1 %vm390_vm1, %v8854_v5  ;;  %7397 = vmatprep.subr.mxu1 %v4242_v17 }
0x1e07   :  { %7398 = vmatpush3.msra.mxu1 %v4242_v17 }
0x1e08   :  { %7399 = vmatprep.subr.mxu1 %v4240_v59 }
0x1e09   :  { %7400 = vmatpush3.msra.mxu1 %v4240_v59 }
0x1e0b   :  { %v7723_v0 = vpop.eup %7722 }
0x1e0c   :  { %v4238_v63 = vmul.f32 %v7723_v0, %v7719_v11 }
0x1e0d   :  { %v7725_v25 = vpop.eup %7724 }
0x1e0e   :  { %v4237_v61 = vmul.f32 %v7725_v25, %v7721_v27  ;;  %v8948_v25 = vld [vmem:[%s9288_s7 + $0x20] sm:$0xff] }
0x1e10   :  { %7401 = vmatprep.mubr.msk.f32.mxu1 %vm476_vm2, %v4237_v61 }
0x1e11   :  { %7402 = vmatmul.mubr.msk.f32.vlgmr.msra.gmra.mxu1 %vm476_vm2, %v4238_v63 }
0x1e34   :  { %v4505_v22 = vpop.xlane.xlu0 %4504 }
0x1e35   :  { %v4509_v10 = vsub.f32 %v4495_v29, %v4505_v22 }
0x1e36   :  { %v4508_v9 = vpop.xlane.xlu1 %4507 }
0x1e37   :  { %v4510_v60 = vsub.f32 %v4500_v42, %v4508_v9  ;;  %v4511_v24 = vmul.f32 1.442695, %v4509_v10  ;;  %v4701_v42 = vrot.slane %v8724_v15, %v8325_v12 }
0x1e39   :  { %v4513_v49 = vmul.f32 1.442695, %v4510_v60 }
0x1e3a   :  { %v4327_v5 = vpop.permute.xlu1 %4326 }
0x1e3b   :  { %7726 = vpow2.f32 %v4513_v49  ;;  %7404 = vmatprep.subr.mxu1 %v4327_v5 }
0x1e3c   :  { %7405 = vmatpush3.msra.mxu1 %v4327_v5  ;;  %7728 = vpow2.f32 %v4511_v24 }
0x1e3e   :  { %v4526_v51 = vpop.permute.xlu1 %4525 }
0x1e42   :  { %v4613_v38 = vpop.permute.xlu1 %4612 }
0x1e48   :  { %v7727_v58 = vpop.eup %7726 }
0x1e49   :  { %v4518_v31 = vsel %vm476_vm2, %v7727_v58, 0.0  ;;  %v7729_v32 = vpop.eup %7728 }
0x1e4a   :  { %4519 = vadd.xlane.f32.xlu0 %v4518_v31  ;;  %v4515_v33 = vsel %vm476_vm2, %v7729_v32, 0.0 }
0x1e4e   :  { %4516 = vadd.xlane.f32.xlu0 %v4515_v33 }
0x1e64   :  { %4527 = vrot.lane.b32.xlu0 %v8814_v44, %s7983_s2 }
0x1ec6   :  { %v7389_v23 = vpop.f32.mrf.mxu1 }
0x1ec7   :  { %v4123_v40 = vadd.f32 %v7389_v23, %v8870_v26 }
0x1ec8   :  { %v4117_v41 = vpop.f32.mrf.mxu1 }
0x1ec9   :  { %v4118_v3 = vadd.f32 %v4117_v41, %v8872_v39 }
0x1ed1   :  { %v7403_v43 = vpop.f32.mrf.mxu1 }
0x1ed3   :  { %v4317_v6 = vpop.f32.mrf.mxu1  ;;  %v4520_v45 = vpop.xlane.xlu0 %4519 }
0x1ed4   :  { %7406 = vmatprep.mubr.msk.f32.mxu1 %vm390_vm1, %v4317_v6  ;;  %7730 = vrcp.f32 %v4520_v45 }
0x1ed5   :  { %7407 = vmatmul.mubr.msk.f32.vlgmr.msra.gmra.mxu1 %vm390_vm1, %v7403_v43 }
0x1ed7   :  { %v4517_v46 = vpop.xlane.xlu0 %4516 }
0x1ed8   :  { %7732 = vrcp.f32 %v4517_v46 }
0x1edb   :  { %v4528_v47 = vpop.permute.xlu0 %4527 }
0x1edc   :  { %7416 = vmatprep.subr.mxu1 %v4528_v47 }
0x1edd   :  { %7417 = vmatpush3.msra.mxu1 %v4528_v47 }
0x1ede   :  { %7418 = vmatprep.subr.mxu1 %v4526_v51 }
0x1edf   :  { %7419 = vmatpush3.msra.mxu1 %v4526_v51  ;;  %v8968_v51 = vld [vmem:[#allocation11 + $0x18] sm:$0xff] }
0x1ee0   :  { %7423 = vmatprep.subr.mxu1 %v4613_v38 }
0x1ee1   :  { %v7731_v56 = vpop.eup %7730 }
0x1ee2   :  { %v4524_v16 = vmul.f32 %v7731_v56, %v7727_v58 }
0x1ee5   :  { %v7733_v44 = vpop.eup %7732 }
0x1ee6   :  { %v4523_v53 = vmul.f32 %v7733_v44, %v7729_v32  ;;  %v4735_v44 = vrot.slane %v8968_v51, %v8094_v2 }
0x1ee8   :  { %7420 = vmatprep.mubr.msk.f32.mxu1 %vm476_vm2, %v4523_v53 }
0x1ee9   :  { %7421 = vmatmul.mubr.msk.f32.vlgmr.msra.gmra.mxu1 %vm476_vm2, %v4524_v16 }
0x1eea   :  { %7424 = vmatpush3.msra.mxu1 %v4613_v38 }
0x1f95   :  { %v7408_v11 = vpop.f32.mrf.mxu1 }
0x1f96   :  { %v4411_v27 = vadd.f32 %v7408_v11, %v4123_v40  ;;  %v4741_v40 = vrot.slane %v8968_v51, %v8183_v30 }
0x1f97   :  { %v4401_v18 = vpop.f32.mrf.mxu1 }
0x1f98   :  { %v4410_v19 = vadd.f32 %v4401_v18, %v4118_v3 }
0x1fa9   :  { %v7422_v13 = vpop.f32.mrf.mxu1 }
0x1fab   :  { %v4603_v29 = vpop.f32.mrf.mxu1 }
0x1fac   :  { %7425 = vmatprep.mubr.msk.f32.mxu1 %vm390_vm1, %v4603_v29  ;;  %v7790_v29 = vld [vmem:[#allocation5 + $0x18] sm:$0xff] }
0x1fad   :  { %7426 = vmatmul.mubr.msk.f32.vlgmr.msra.gmra.mxu1 %vm390_vm1, %v7422_v13 }
0x1fae   :  { %7447 = vmatprep.mubr.msk.f32.mxu1 %vm183_vm0, %v8354_v4  ;;  %v8923_v4 = vld [vmem:[%s9288_s7 + $0x38] sm:$0xff] }
0x1faf   :  { %7428 = vmatprep.subr.mxu0 %v8923_v4 }
0x1fb0   :  { %7429 = vmatpush3.msra.mxu0 %v8923_v4 }
0x206d   :  { %v7427_v36 = vpop.f32.mrf.mxu1 }
0x206e   :  { %v4697_v26 = vadd.f32 %v7427_v36, %v4411_v27 }
0x206f   :  { %v4687_v37 = vpop.f32.mrf.mxu1 }
0x2070   :  { %v4703_v14 = vadd.f32 %v4701_v42, %v4697_v26  ;;  %v4696_v39 = vadd.f32 %v4687_v37, %v4410_v19  ;;  %v4836_v26 = vrot.slane %v8724_v15, %v8409_v21 }
0x2072   :  { %v4702_v62 = vadd.f32 %v4701_v42, %v4696_v39  ;;  %v4705_v17 = vadd.f32 %v4703_v14, %v8733_v34  ;;  %v8931_v34 = vld [vmem:[%s9288_s7 + $0x28] sm:$0xff] }
0x2074   :  { %v4709_v55 = vsel %vm183_vm0, %v4705_v17, 0.0  ;;  %v4704_v59 = vadd.f32 %v4702_v62, %v8735_v35  ;;  %v8936_v35 = vld [vmem:[%s9288_s7 + $0x30] sm:$0xff] }
0x2075   :  { %4710 = vadd.xlane.f32.xlu1 %v4709_v55  ;;  %7430 = vmatprep.subr.mxu0 %v8936_v35 }
0x2076   :  { %v4706_v0 = vsel %vm183_vm0, %v4704_v59, 0.0  ;;  %7431 = vmatpush3.msra.mxu0 %v8936_v35 }
0x2077   :  { %4707 = vadd.xlane.f32.xlu0 %v4706_v0  ;;  %7432 = vmatprep.subr.mxu0 %v8931_v34 }
0x2078   :  { %7433 = vmatpush3.msra.mxu0 %v8931_v34 }
0x2079   :  { %7434 = vmatprep.subr.mxu0 %v8948_v25 }
0x207a   :  { %7435 = vmatpush3.msra.mxu0 %v8948_v25 }
0x2086   :  { %4847 = vrot.lane.b32.xlu1 %v8923_v4, %s7978_s18 }
0x208a   :  { %4843 = vrot.lane.b32.xlu1 %v8931_v34, %s7978_s18 }
0x208e   :  { %4841 = vrot.lane.b32.xlu1 %v8948_v25, %s7978_s18 }
0x2092   :  { %4946 = vrot.lane.b32.xlu1 %v8936_v35, %s7975_s29 }
0x2096   :  { %4942 = vrot.lane.b32.xlu1 %v8948_v25, %s7975_s29 }
0x20fe   :  { %v4711_v61 = vpop.xlane.xlu1 %4710 }
0x20ff   :  { %v4713_v63 = vmul.f32 0.03125, %v4711_v61 }
0x2100   :  { %v4708_v22 = vpop.xlane.xlu0 %4707 }
0x2101   :  { %v4715_v10 = vsub.f32 %v4705_v17, %v4713_v63  ;;  %v4712_v9 = vmul.f32 0.03125, %v4708_v22 }
0x2102   :  { %v4848_v31 = vpop.permute.xlu1 %4847 }
0x2103   :  { %v4714_v60 = vsub.f32 %v4704_v59, %v4712_v9  ;;  %v4717_v24 = vmul.f32 %v4715_v10, %v4715_v10  ;;  %7439 = vmatprep.subr.mxu1 %v4848_v31  ;;  %v4749_v59 = vrot.slane %v8724_v15, %v8432_v28 }
0x2104   :  { %7440 = vmatpush3.msra.mxu1 %v4848_v31 }
0x2105   :  { %v4721_v49 = vsel %vm183_vm0, %v4717_v24, 0.0  ;;  %v4716_v5 = vmul.f32 %v4714_v60, %v4714_v60  ;;  %v4941_v24 = vrot.slane %v8724_v15, %v8471_v48 }
0x2106   :  { %4722 = vadd.xlane.f32.xlu0 %v4721_v49  ;;  %v4844_v43 = vpop.permute.xlu1 %4843 }
0x2107   :  { %v4718_v58 = vsel %vm183_vm0, %v4716_v5, 0.0 }
0x210a   :  { %4719 = vadd.xlane.f32.xlu0 %v4718_v58  ;;  %v4842_v47 = vpop.permute.xlu1 %4841 }
0x210e   :  { %v4947_v18 = vpop.permute.xlu1 %4946 }
0x2112   :  { %v4943_v13 = vpop.permute.xlu1 %4942 }
0x2120   :  { %4845 = vrot.lane.b32.xlu0 %v8936_v35, %s7978_s18 }
0x2124   :  { %4948 = vrot.lane.b32.xlu0 %v8923_v4, %s7975_s29 }
0x2128   :  { %4944 = vrot.lane.b32.xlu0 %v8931_v34, %s7975_s29 }
0x218f   :  { %v4723_v32 = vpop.xlane.xlu0 %4722 }
0x2190   :  { %v4725_v33 = vmul.f32 0.03125, %v4723_v32 }
0x2192   :  { %v4727_v23 = vadd.f32 1e-05, %v4725_v33 }
0x2193   :  { %v4720_v41 = vpop.xlane.xlu0 %4719 }
0x2194   :  { %7734 = vrsqrt.f32 %v4727_v23  ;;  %v4724_v6 = vmul.f32 0.03125, %v4720_v41  ;;  %v9049_v41 = vld [vmem:[%s9286_s5 + $0x8] sm:$0xff] }
0x2196   :  { %v4726_v45 = vadd.f32 1e-05, %v4724_v6 }
0x2197   :  { %v4846_v46 = vpop.permute.xlu0 %4845 }
0x2198   :  { %7736 = vrsqrt.f32 %v4726_v45  ;;  %7441 = vmatprep.subr.mxu1 %v4846_v46  ;;  %v9055_v45 = vld [vmem:[%s9286_s5] sm:$0xff] }
0x2199   :  { %7442 = vmatpush3.msra.mxu1 %v4846_v46 }
0x219a   :  { %7443 = vmatprep.subr.mxu1 %v4844_v43 }
0x219b   :  { %7444 = vmatpush3.msra.mxu1 %v4844_v43  ;;  %v4949_v30 = vpop.permute.xlu0 %4948 }
0x219c   :  { %7445 = vmatprep.subr.mxu1 %v4842_v47  ;;  %7453 = vmatprep.subr.mxu0 %v4949_v30 }
0x219d   :  { %7446 = vmatpush3.msra.mxu1 %v4842_v47 }
0x219e   :  { %7448 = vmatmul.mubr.msk.f32.vlgmr.msra.gmra.mxu1 %vm183_vm0, %v8375_v52 }
0x219f   :  { %7450 = vmatprep.mubr.msk.f32.mxu1 %vm183_vm0, %v8378_v54  ;;  %v4945_v19 = vpop.permute.xlu0 %4944 }
0x21a1   :  { %v7735_v56 = vpop.eup %7734 }
0x21a2   :  { %v4731_v53 = vmul.f32 %v7735_v56, %v4715_v10  ;;  %7451 = vmatmul.mubr.msk.f32.gmra.mxu1 %vm183_vm0, %v8385_v57  ;;  %v7787_v57 = vld [vmem:[#allocation5] sm:$0xff] }
0x21a4   :  { %v4737_v38 = vmul.f32 %v4735_v44, %v4731_v53 }
0x21a5   :  { %v7737_v16 = vpop.eup %7736 }
0x21a6   :  { %v4730_v11 = vmul.f32 %v7737_v16, %v4714_v60  ;;  %v8978_v3 = vadd.f32 %v4741_v40, %v4737_v38 }
0x21a8   :  { %v4736_v52 = vmul.f32 %v4735_v44, %v4730_v11  ;;  %v4745_v2 = vadd.f32 %v8741_v50, %v8978_v3  ;;  %v7789_v50 = vld [vmem:[#allocation5 + $0x10] sm:$0xff] }
0x21aa   :  { %v8980_v27 = vadd.f32 %v4741_v40, %v4736_v52 }
0x21ac   :  { %v4744_v54 = vadd.f32 %v8737_v8, %v8980_v27  ;;  %v7788_v8 = vld [vmem:[#allocation5 + $0x8] sm:$0xff] }
0x21ae   :  { %7436 = vmatprep.mubr.msk.f32.mxu0 %vm183_vm0, %v4744_v54 }
0x21af   :  { %7437 = vmatmul.mubr.msk.f32.vlgmr.msra.gmra.mxu0 %vm183_vm0, %v4745_v2 }
0x21b0   :  { %7461 = vmatprep.mubr.msk.f32.mxu0 %vm183_vm0, %v7787_v57  ;;  %7454 = vmatpush3.msra.mxu0 %v4949_v30 }
0x21b1   :  { %7455 = vmatprep.subr.mxu0 %v4947_v18 }
0x21b2   :  { %7456 = vmatpush3.msra.mxu0 %v4947_v18 }
0x21b3   :  { %7457 = vmatprep.subr.mxu0 %v4945_v19 }
0x21b4   :  { %7458 = vmatpush3.msra.mxu0 %v4945_v19 }
0x21b5   :  { %7459 = vmatprep.subr.mxu0 %v4943_v13 }
0x21b6   :  { %7460 = vmatpush3.msra.mxu0 %v4943_v13 }
0x21b7   :  { %7462 = vmatmul.mubr.msk.f32.vlgmr.msra.gmra.mxu0 %vm183_vm0, %v7788_v8 }
0x21b8   :  { %7464 = vmatprep.mubr.msk.f32.mxu0 %vm183_vm0, %v7789_v50 }
0x21bb   :  { %7465 = vmatmul.mubr.msk.f32.gmra.mxu0 %vm183_vm0, %v7790_v29 }
0x225e   :  { %v7449_v42 = vpop.f32.mrf.mxu1 }
0x225f   :  { %v9004_v17 = vadd.f32 %v7449_v42, %v4836_v26 }
0x2260   :  { %v4919_v36 = vpop.f32.mrf.mxu1 }
0x2261   :  { %v9010_v55 = vadd.f32 %v4919_v36, %v4836_v26 }
0x2262   :  { %v7452_v37 = vpop.f32.mrf.mxu1 }
0x2263   :  { %v8994_v14 = vadd.f32 %v7452_v37, %v4836_v26 }
0x2264   :  { %v4929_v39 = vpop.f32.mrf.mxu1 }
0x2265   :  { %v8996_v62 = vadd.f32 %v4929_v39, %v4836_v26  ;;  %7467 = vmatprep.subr.msk.mxu1 %vm390_vm1, %v8994_v14 }
0x2266   :  { %7468 = vmatpush3.xpose.msk.msra.mxu1 %vm390_vm1, %v8994_v14 }
0x2267   :  { %7469 = vmatprep.subr.msk.mxu1 %vm390_vm1, %v8996_v62 }
0x226a   :  { %7470 = vmatpush3.xpose.msk.msra.mxu1 %vm390_vm1, %v8996_v62 }
0x226b   :  { %7471 = vmatprep.subr.msk.mxu1 %vm390_vm1, %v9004_v17 }
0x226e   :  { %7472 = vmatpush3.xpose.msk.msra.mxu1 %vm390_vm1, %v9004_v17 }
0x226f   :  { %v7438_v0 = vpop.f32.mrf.mxu0  ;;  %7473 = vmatprep.subr.msk.mxu1 %vm390_vm1, %v9010_v55 }
0x2270   :  { %v4828_v61 = vadd.f32 %v7438_v0, %v4749_v59 }
0x2271   :  { %v4822_v63 = vpop.f32.mrf.mxu0 }
0x2272   :  { %v4823_v22 = vadd.f32 %v4822_v63, %v4749_v59  ;;  %7474 = vmatpush3.xpose.msk.msra.mxu1 %vm390_vm1, %v9010_v55  ;;  %v9022_v9 = vmul.f32 0.35355338, %v4828_v61 }
0x2274   :  { %v9020_v10 = vmul.f32 0.35355338, %v4823_v22 }
0x2276   :  { %7475 = vmatprep.mubr.msk.f32.mxu1 %vm390_vm1, %v9020_v10 }
0x2277   :  { %7476 = vmatmul.mubr.msk.f32.vlgmr.msra.gmra.mxu1 %vm390_vm1, %v9022_v9  ;;  %v7463_v60 = vpop.f32.mrf.mxu0 }
0x2278   :  { %v9032_v32 = vadd.f32 %v7463_v60, %v4941_v24 }
0x2279   :  { %v5020_v49 = vpop.f32.mrf.mxu0 }
0x227a   :  { %v9038_v23 = vadd.f32 %v5020_v49, %v4941_v24 }
0x227b   :  { %v7466_v5 = vpop.f32.mrf.mxu0 }
0x227c   :  { %v9030_v58 = vadd.f32 %v7466_v5, %v4941_v24 }
0x227d   :  { %v5030_v31 = vpop.f32.mrf.mxu0 }
0x227e   :  { %v9034_v33 = vadd.f32 %v5030_v31, %v4941_v24  ;;  %7478 = vmatprep.subr.mxu0 %v9030_v58 }
0x227f   :  { %7479 = vmatpush3.msra.mxu0 %v9030_v58 }
0x2280   :  { %7480 = vmatprep.subr.mxu0 %v9034_v33 }
0x2281   :  { %7481 = vmatpush3.msra.mxu0 %v9034_v33 }
0x2282   :  { %7482 = vmatprep.subr.mxu0 %v9032_v32 }
0x2283   :  { %7483 = vmatpush3.msra.mxu0 %v9032_v32 }
0x2284   :  { %7484 = vmatprep.subr.mxu0 %v9038_v23 }
0x2285   :  { %7485 = vmatpush3.msra.mxu0 %v9038_v23 }
0x2337   :  { %v7477_v15 = vpop.f32.mrf.mxu1 }
0x2338   :  { %v5129_v43 = vadd.f32 %v9049_v41, %v7477_v15 }
0x2339   :  { %v5123_v6 = vpop.f32.mrf.mxu1 }
0x233a   :  { %v5124_v46 = vadd.f32 %v9055_v45, %v5123_v6  ;;  %v5135_v47 = vsel %vm183_vm0, %v5129_v43, -inf }
0x233b   :  { %5136 = vmax.xlane.f32.xlu1 %v5135_v47 }
0x233c   :  { %v5132_v56 = vsel %vm183_vm0, %v5124_v46, -inf }
0x233d   :  { %5133 = vmax.xlane.f32.xlu0 %v5132_v56 }
0x234c   :  { %5245 = vrot.lane.b32.xlu1 %v8994_v14, %s7979_s0 }
0x2350   :  { %5241 = vrot.lane.b32.xlu1 %v9004_v17, %s7979_s0 }
0x2354   :  { %5239 = vrot.lane.b32.xlu1 %v9010_v55, %s7979_s0 }
0x2358   :  { %5237 = vrot.lane.b32.xlu1 %v9022_v9, %s7979_s0 }
0x235c   :  { %5629 = vrot.lane.b32.xlu1 %v8996_v62, %s7981_s1 }
0x2360   :  { %5625 = vrot.lane.b32.xlu1 %v9010_v55, %s7981_s1 }
0x2364   :  { %5623 = vrot.lane.b32.xlu1 %v9022_v9, %s7981_s1 }
0x23c4   :  { %v5137_v44 = vpop.xlane.xlu1 %5136 }
0x23c5   :  { %v5139_v53 = vsub.f32 %v5129_v43, %v5137_v44 }
0x23c6   :  { %v5134_v16 = vpop.xlane.xlu0 %5133 }
0x23c7   :  { %v5138_v38 = vsub.f32 %v5124_v46, %v5134_v16  ;;  %v5142_v11 = vmul.f32 1.442695, %v5139_v53 }
0x23c8   :  { %v5246_v40 = vpop.permute.xlu1 %5245 }
0x23c9   :  { %v5140_v52 = vmul.f32 1.442695, %v5138_v38  ;;  %7489 = vmatprep.subr.msk.mxu0 %vm390_vm1, %v5246_v40 }
0x23cb   :  { %7738 = vpow2.f32 %v5140_v52 }
0x23cc   :  { %7740 = vpow2.f32 %v5142_v11  ;;  %v5242_v26 = vpop.permute.xlu1 %5241 }
0x23d0   :  { %v5240_v39 = vpop.permute.xlu1 %5239 }
0x23d4   :  { %v5238_v0 = vpop.permute.xlu1 %5237 }
0x23d8   :  { %v7739_v54 = vpop.eup %7738  ;;  %v5630_v63 = vpop.permute.xlu1 %5629 }
0x23d9   :  { %v5144_v2 = vsel %vm183_vm0, %v7739_v54, 0.0  ;;  %v7741_v57 = vpop.eup %7740 }
0x23da   :  { %5145 = vadd.xlane.f32.xlu0 %v5144_v2  ;;  %v5147_v30 = vsel %vm183_vm0, %v7741_v57, 0.0 }
0x23dc   :  { %v5626_v22 = vpop.permute.xlu1 %5625 }
0x23de   :  { %5148 = vadd.xlane.f32.xlu0 %v5147_v30 }
0x23e0   :  { %v5624_v60 = vpop.permute.xlu1 %5623 }
0x23f4   :  { %5243 = vrot.lane.b32.xlu0 %v8996_v62, %s7979_s0 }
0x23f8   :  { %5235 = vrot.lane.b32.xlu0 %v9020_v10, %s7979_s0 }
0x23fc   :  { %5631 = vrot.lane.b32.xlu0 %v8994_v14, %s7981_s1 }
0x2400   :  { %5627 = vrot.lane.b32.xlu0 %v9004_v17, %s7981_s1 }
0x2404   :  { %5621 = vrot.lane.b32.xlu0 %v9020_v10, %s7981_s1 }
0x2463   :  { %v5146_v18 = vpop.xlane.xlu0 %5145 }
0x2464   :  { %7742 = vrcp.f32 %v5146_v18 }
0x2467   :  { %v5149_v19 = vpop.xlane.xlu0 %5148 }
0x2468   :  { %7744 = vrcp.f32 %v5149_v19 }
0x246b   :  { %v5244_v13 = vpop.permute.xlu0 %5243 }
0x246f   :  { %v5236_v36 = vpop.permute.xlu0 %5235 }
0x2471   :  { %v7743_v8 = vpop.eup %7742 }
0x2472   :  { %v5152_v50 = vmul.f32 %v7743_v8, %v7739_v54 }
0x2473   :  { %v5632_v37 = vpop.permute.xlu0 %5631 }
0x2474   :  { %7486 = vmatprep.mubr.msk.f32.mxu0 %vm183_vm0, %v5152_v50 }
0x2475   :  { %v7745_v29 = vpop.eup %7744 }
0x2476   :  { %v5153_v42 = vmul.f32 %v7745_v29, %v7741_v57 }
0x2477   :  { %v5628_v59 = vpop.permute.xlu0 %5627 }
0x2478   :  { %7487 = vmatmul.mubr.msk.f32.vlgmr.msra.gmra.mxu0 %vm183_vm0, %v5153_v42 }
0x2479   :  { %7490 = vmatpush3.xpose.msk.msra.mxu0 %vm390_vm1, %v5246_v40  ;;  %7497 = vmatprep.mubr.msk.f32.mxu0 %vm390_vm1, %v5236_v36 }
0x247a   :  { %7491 = vmatprep.subr.msk.mxu0 %vm390_vm1, %v5244_v13 }
0x247b   :  { %v5622_v61 = vpop.permute.xlu0 %5621 }
0x247d   :  { %7492 = vmatpush3.xpose.msk.msra.mxu0 %vm390_vm1, %v5244_v13 }
0x247e   :  { %7493 = vmatprep.subr.msk.mxu0 %vm390_vm1, %v5242_v26 }
0x2481   :  { %7494 = vmatpush3.xpose.msk.msra.mxu0 %vm390_vm1, %v5242_v26 }
0x2482   :  { %7495 = vmatprep.subr.msk.mxu0 %vm390_vm1, %v5240_v39 }
0x2485   :  { %7496 = vmatpush3.xpose.msk.msra.mxu0 %vm390_vm1, %v5240_v39 }
0x2486   :  { %7521 = vmatprep.subr.msk.mxu0 %vm390_vm1, %v5632_v37 }
0x2488   :  { %7498 = vmatmul.mubr.msk.f32.vlgmr.msra.gmra.mxu0 %vm390_vm1, %v5238_v0 }
0x2489   :  { %7522 = vmatpush3.xpose.msk.msra.mxu0 %vm390_vm1, %v5632_v37  ;;  %7529 = vmatprep.mubr.msk.f32.mxu0 %vm390_vm1, %v5622_v61 }
0x248a   :  { %7523 = vmatprep.subr.msk.mxu0 %vm390_vm1, %v5630_v63 }
0x248d   :  { %7524 = vmatpush3.xpose.msk.msra.mxu0 %vm390_vm1, %v5630_v63 }
0x248e   :  { %7525 = vmatprep.subr.msk.mxu0 %vm390_vm1, %v5628_v59 }
0x2491   :  { %7526 = vmatpush3.xpose.msk.msra.mxu0 %vm390_vm1, %v5628_v59 }
0x2492   :  { %7527 = vmatprep.subr.msk.mxu0 %vm390_vm1, %v5626_v22 }
0x2495   :  { %7528 = vmatpush3.xpose.msk.msra.mxu0 %vm390_vm1, %v5626_v22 }
0x2498   :  { %7530 = vmatmul.mubr.msk.f32.vlgmr.msra.gmra.mxu0 %vm390_vm1, %v5624_v60 }
0x2538   :  { %v9108_v24 = vpop.f32.mrf.mxu0 }
0x253a   :  { %v9110_v49 = vpop.f32.mrf.mxu0 }
0x2548   :  { %v7499_v5 = vpop.f32.mrf.mxu0 }
0x2549   :  { %v5331_v31 = vadd.f32 %v9049_v41, %v7499_v5 }
0x254a   :  { %v5325_v15 = vpop.f32.mrf.mxu0 }
0x254b   :  { %v5326_v43 = vadd.f32 %v9055_v45, %v5325_v15  ;;  %v5337_v6 = vsel %vm183_vm0, %v5331_v31, -inf }
0x254c   :  { %5338 = vmax.xlane.f32.xlu1 %v5337_v6 }
0x254d   :  { %v5334_v46 = vsel %vm183_vm0, %v5326_v43, -inf }
0x254e   :  { %5335 = vmax.xlane.f32.xlu0 %v5334_v46 }
0x2558   :  { %v7531_v47 = vpop.f32.mrf.mxu0 }
0x2559   :  { %v5717_v56 = vadd.f32 %v9049_v41, %v7531_v47 }
0x255b   :  { %v5723_v44 = vsel %vm183_vm0, %v5717_v56, -inf }
0x255d   :  { %5366 = vrot.lane.b32.xlu1 %v9030_v58, %s7979_s0 }
0x2561   :  { %5362 = vrot.lane.b32.xlu1 %v9032_v32, %s7979_s0 }
0x2565   :  { %5360 = vrot.lane.b32.xlu1 %v9038_v23, %s7979_s0 }
0x2589   :  { %5724 = vmax.xlane.f32.xlu1 %v5723_v44 }
0x259a   :  { %5453 = vrot.lane.b32.xlu1 %v8931_v34, %s7976_s11 }
0x259e   :  { %5748 = vrot.lane.b32.xlu1 %v9030_v58, %s7981_s1 }
0x25a2   :  { %5746 = vrot.lane.b32.xlu1 %v9034_v33, %s7981_s1 }
0x25a6   :  { %5742 = vrot.lane.b32.xlu1 %v9038_v23, %s7981_s1 }
0x25aa   :  { %5931 = vrot.lane.b32.xlu1 %v8994_v14, %s7983_s2 }
0x25ae   :  { %5927 = vrot.lane.b32.xlu1 %v9004_v17, %s7983_s2 }
0x25b2   :  { %5921 = vrot.lane.b32.xlu1 %v9020_v10, %s7983_s2  ;;  %v5711_v10 = vpop.f32.mrf.mxu0 }
0x25b3   :  { %v5712_v57 = vadd.f32 %v9055_v45, %v5711_v10 }
0x25b5   :  { %v5720_v30 = vsel %vm183_vm0, %v5712_v57, -inf }
0x25d5   :  { %v5339_v53 = vpop.xlane.xlu1 %5338 }
0x25d6   :  { %v5341_v34 = vsub.f32 %v5331_v31, %v5339_v53 }
0x25d7   :  { %v5336_v16 = vpop.xlane.xlu0 %5335 }
0x25d8   :  { %v5344_v38 = vmul.f32 1.442695, %v5341_v34  ;;  %v5340_v40 = vsub.f32 %v5326_v43, %v5336_v16 }
0x25d9   :  { %v5367_v11 = vpop.permute.xlu1 %5366 }
0x25da   :  { %7746 = vpow2.f32 %v5344_v38  ;;  %v5342_v52 = vmul.f32 1.442695, %v5340_v40  ;;  %7500 = vmatprep.subr.mxu1 %v5367_v11 }
0x25db   :  { %7501 = vmatpush3.msra.mxu1 %v5367_v11 }
0x25dc   :  { %7748 = vpow2.f32 %v5342_v52 }
0x25dd   :  { %v5363_v18 = vpop.permute.xlu1 %5362 }
0x25e1   :  { %v5361_v19 = vpop.permute.xlu1 %5360 }
0x25e7   :  { %v7747_v54 = vpop.eup %7746 }
0x25e8   :  { %v5349_v14 = vsel %vm183_vm0, %v7747_v54, 0.0 }
0x25e9   :  { %v7749_v2 = vpop.eup %7748  ;;  %5350 = vadd.xlane.f32.xlu0 %v5349_v14 }
0x25ea   :  { %v5346_v17 = vsel %vm183_vm0, %v7749_v2, 0.0 }
0x25ed   :  { %5347 = vadd.xlane.f32.xlu0 %v5346_v17 }
0x2603   :  { %5364 = vrot.lane.b32.xlu0 %v9034_v33, %s7979_s0 }
0x2612   :  { %v5725_v13 = vpop.xlane.xlu1 %5724 }
0x2613   :  { %v5727_v8 = vsub.f32 %v5717_v56, %v5725_v13 }
0x2615   :  { %v5730_v50 = vmul.f32 1.442695, %v5727_v8 }
0x2617   :  { %7750 = vpow2.f32 %v5730_v50 }
0x2622   :  { %5721 = vmax.xlane.f32.xlu0 %v5720_v30 }
0x2624   :  { %v9146_v29 = vpop.eup %7750 }
0x2625   :  { %v5735_v42 = vsel %vm183_vm0, %v9146_v29, 0.0 }
0x2638   :  { %5537 = vrot.lane.b32.xlu0 %v8948_v25, %s7976_s11  ;;  %v5454_v25 = vpop.permute.xlu1 %5453 }
0x263c   :  { %v5749_v47 = vpop.permute.xlu1 %5748 }
0x2657   :  { %5736 = vadd.xlane.f32.xlu0 %v5735_v42 }
0x2672   :  { %v5351_v36 = vpop.xlane.xlu0 %5350 }
0x2673   :  { %7752 = vrcp.f32 %v5351_v36 }
0x2676   :  { %v5348_v26 = vpop.xlane.xlu0 %5347 }
0x2677   :  { %7754 = vrcp.f32 %v5348_v26 }
0x267a   :  { %v5365_v37 = vpop.permute.xlu0 %5364 }
0x267b   :  { %7502 = vmatprep.subr.mxu1 %v5365_v37 }
0x267c   :  { %7503 = vmatpush3.msra.mxu1 %v5365_v37 }
0x267d   :  { %7504 = vmatprep.subr.mxu1 %v5363_v18 }
0x267e   :  { %7505 = vmatpush3.msra.mxu1 %v5363_v18 }
0x267f   :  { %7506 = vmatprep.subr.mxu1 %v5361_v19 }
0x2680   :  { %7507 = vmatpush3.msra.mxu1 %v5361_v19  ;;  %v7753_v39 = vpop.eup %7752 }
0x2681   :  { %7511 = vmatprep.subr.mxu1 %v5454_v25  ;;  %v5355_v61 = vmul.f32 %v7753_v39, %v7747_v54 }
0x2684   :  { %v7755_v59 = vpop.eup %7754 }
0x2685   :  { %v5354_v0 = vmul.f32 %v7755_v59, %v7749_v2 }
0x2687   :  { %7508 = vmatprep.mubr.msk.f32.mxu1 %vm183_vm0, %v5354_v0 }
0x2688   :  { %7509 = vmatmul.mubr.msk.f32.vlgmr.msra.gmra.mxu1 %vm183_vm0, %v5355_v61 }
0x2689   :  { %7512 = vmatpush3.msra.mxu1 %v5454_v25 }
0x26ab   :  { %v5722_v63 = vpop.xlane.xlu0 %5721 }
0x26ac   :  { %v5726_v22 = vsub.f32 %v5712_v57, %v5722_v63 }
0x26ae   :  { %v5728_v60 = vmul.f32 1.442695, %v5726_v22 }
0x26af   :  { %v5538_v5 = vpop.permute.xlu0 %5537 }
0x26b0   :  { %7756 = vpow2.f32 %v5728_v60  ;;  %7516 = vmatprep.subr.mxu1 %v5538_v5 }
0x26bd   :  { %v7757_v31 = vpop.eup %7756 }
0x26be   :  { %v5732_v15 = vsel %vm183_vm0, %v7757_v31, 0.0 }
0x26bf   :  { %5733 = vadd.xlane.f32.xlu0 %v5732_v15 }
0x26d5   :  { %5744 = vrot.lane.b32.xlu0 %v9032_v32, %s7981_s1 }
0x26d9   :  { %5835 = vrot.lane.b32.xlu0 %v8936_v35, %s7976_s11  ;;  %v5747_v35 = vpop.permute.xlu1 %5746 }
0x26dd   :  { %5929 = vrot.lane.b32.xlu0 %v8996_v62, %s7983_s2 }
0x26e0   :  { %v5737_v43 = vpop.xlane.xlu0 %5736 }
0x26e1   :  { %5925 = vrot.lane.b32.xlu0 %v9010_v55, %s7983_s2  ;;  %7758 = vrcp.f32 %v5737_v43 }
0x26e5   :  { %5923 = vrot.lane.b32.xlu0 %v9022_v9, %s7983_s2  ;;  %v5743_v9 = vpop.permute.xlu1 %5742 }
0x26ee   :  { %v7759_v55 = vpop.eup %7758 }
0x2748   :  { %v7510_v6 = vpop.f32.mrf.mxu1  ;;  %v5734_v46 = vpop.xlane.xlu0 %5733 }
0x2749   :  { %7760 = vrcp.f32 %v5734_v46 }
0x274a   :  { %v5444_v56 = vpop.f32.mrf.mxu1 }
0x274b   :  { %7513 = vmatprep.mubr.msk.f32.mxu1 %vm390_vm1, %v5444_v56 }
0x274c   :  { %7514 = vmatmul.mubr.msk.f32.vlgmr.msra.gmra.mxu1 %vm390_vm1, %v7510_v6  ;;  %v5745_v62 = vpop.permute.xlu0 %5744 }
0x274d   :  { %7517 = vmatpush3.msra.mxu1 %v5538_v5  ;;  %7518 = vmatprep.mubr.msk.f32.mxu1 %vm390_vm1, %v9110_v49  ;;  %v5741_v49 = vmul.f32 %v7759_v55, %v9146_v29 }
0x274e   :  { %7532 = vmatprep.subr.mxu1 %v5749_v47 }
0x2750   :  { %7519 = vmatmul.mubr.msk.f32.vlgmr.msra.gmra.mxu1 %vm390_vm1, %v9108_v24  ;;  %v5836_v53 = vpop.permute.xlu0 %5835  ;;  %v5932_v24 = vpop.permute.xlu1 %5931 }
0x2751   :  { %7533 = vmatpush3.msra.mxu1 %v5749_v47 }
0x2752   :  { %7534 = vmatprep.subr.mxu1 %v5747_v35 }
0x2753   :  { %7535 = vmatpush3.msra.mxu1 %v5747_v35 }
0x2754   :  { %7536 = vmatprep.subr.mxu1 %v5745_v62  ;;  %v5928_v14 = vpop.permute.xlu1 %5927  ;;  %v5930_v57 = vpop.permute.xlu0 %5929 }
0x2755   :  { %7537 = vmatpush3.msra.mxu1 %v5745_v62  ;;  %v7793_v62 = vld [vmem:[#allocation11 + $0x10] sm:$0xff] }
0x2756   :  { %v7761_v44 = vpop.eup %7760  ;;  %7538 = vmatprep.subr.mxu1 %v5743_v9  ;;  %v6224_v55 = vrot.slane %v7793_v62, %v3072_v7 }
0x2757   :  { %7539 = vmatpush3.msra.mxu1 %v5743_v9  ;;  %v5740_v34 = vmul.f32 %v7761_v44, %v7757_v31 }
0x2758   :  { %7543 = vmatprep.subr.mxu1 %v5836_v53  ;;  %v5922_v10 = vpop.permute.xlu1 %5921  ;;  %v5926_v30 = vpop.permute.xlu0 %5925 }
0x2759   :  { %7540 = vmatprep.mubr.msk.f32.mxu1 %vm183_vm0, %v5740_v34 }
0x275a   :  { %7541 = vmatmul.mubr.msk.f32.vlgmr.msra.gmra.mxu1 %vm183_vm0, %v5741_v49 }
0x275b   :  { %7544 = vmatpush3.msra.mxu1 %v5836_v53 }
0x275c   :  { %7548 = vmatprep.subr.msk.mxu1 %vm390_vm1, %v5932_v24  ;;  %v5924_v18 = vpop.permute.xlu0 %5923 }
0x280c   :  { %v7515_v16 = vpop.f32.mrf.mxu1 }
0x280e   :  { %v5528_v38 = vpop.f32.mrf.mxu1 }
0x2810   :  { %v7520_v40 = vpop.f32.mrf.mxu1 }
0x2811   :  { %v5618_v11 = vadd.f32 %v7520_v40, %v7515_v16 }
0x2812   :  { %v5612_v52 = vpop.f32.mrf.mxu1 }
0x2813   :  { %v5613_v54 = vadd.f32 %v5612_v52, %v5528_v38 }
0x281a   :  { %v7542_v2 = vpop.f32.mrf.mxu1 }
0x281c   :  { %v5826_v17 = vpop.f32.mrf.mxu1 }
0x281d   :  { %7545 = vmatprep.mubr.msk.f32.mxu1 %vm390_vm1, %v5826_v17 }
0x281e   :  { %7546 = vmatmul.mubr.msk.f32.vlgmr.msra.gmra.mxu1 %vm390_vm1, %v7542_v2 }
0x281f   :  { %7549 = vmatpush3.xpose.msk.msra.mxu1 %vm390_vm1, %v5932_v24  ;;  %7556 = vmatprep.mubr.msk.f32.mxu1 %vm390_vm1, %v5922_v10 }
0x2820   :  { %7550 = vmatprep.subr.msk.mxu1 %vm390_vm1, %v5930_v57 }
0x2823   :  { %7551 = vmatpush3.xpose.msk.msra.mxu1 %vm390_vm1, %v5930_v57 }
0x2824   :  { %7552 = vmatprep.subr.msk.mxu1 %vm390_vm1, %v5928_v14 }
0x2827   :  { %7553 = vmatpush3.xpose.msk.msra.mxu1 %vm390_vm1, %v5928_v14 }
0x2828   :  { %7554 = vmatprep.subr.msk.mxu1 %vm390_vm1, %v5926_v30 }
0x282b   :  { %7555 = vmatpush3.xpose.msk.msra.mxu1 %vm390_vm1, %v5926_v30  ;;  %v6644_v30 = vld [vmem:[%s9289_s8 + $0x30] sm:$0xff] }
0x282e   :  { %7557 = vmatmul.mubr.msk.f32.vlgmr.msra.gmra.mxu1 %vm390_vm1, %v5924_v18  ;;  %v6643_v18 = vld [vmem:[%s9289_s8 + $0x28] sm:$0xff] }
0x28de   :  { %v7547_v19 = vpop.f32.mrf.mxu1 }
0x28df   :  { %v5920_v13 = vadd.f32 %v7547_v19, %v5618_v11  ;;  %v6642_v19 = vld [vmem:[%s9289_s8 + $0x20] sm:$0xff] }
0x28e0   :  { %v5910_v8 = vpop.f32.mrf.mxu1 }
0x28e1   :  { %v9184_v50 = vadd.f32 %v5910_v8, %v5613_v54  ;;  %v6652_v8 = vld [vmem:[%s9291_s10 + $0x70] sm:$0xff] }
0x28ee   :  { %v7558_v29 = vpop.f32.mrf.mxu1 }
0x28ef   :  { %v6017_v42 = vadd.f32 %v9049_v41, %v7558_v29  ;;  %v6650_v29 = vld [vmem:[%s9291_s10 + $0x60] sm:$0xff] }
0x28f0   :  { %v6011_v36 = vpop.f32.mrf.mxu1 }
0x28f1   :  { %v6012_v26 = vadd.f32 %v9055_v45, %v6011_v36  ;;  %v6023_v37 = vsel %vm183_vm0, %v6017_v42, -inf }
0x28f2   :  { %6024 = vmax.xlane.f32.xlu0 %v6023_v37 }
0x28f3   :  { %v6020_v25 = vsel %vm183_vm0, %v6012_v26, -inf }
0x28f4   :  { %6021 = vmax.xlane.f32.xlu1 %v6020_v25 }
0x2905   :  { %6046 = vrot.lane.b32.xlu1 %v9034_v33, %s7983_s2 }
0x2908   :  { %6048 = vrot.lane.b32.xlu0 %v9030_v58, %s7983_s2 }
0x297b   :  { %v6025_v39 = vpop.xlane.xlu0 %6024 }
0x297c   :  { %v6027_v59 = vsub.f32 %v6017_v42, %v6025_v39 }
0x297d   :  { %v6022_v0 = vpop.xlane.xlu1 %6021 }
0x297e   :  { %v6030_v61 = vmul.f32 1.442695, %v6027_v59  ;;  %v6026_v41 = vsub.f32 %v6012_v26, %v6022_v0  ;;  %v6258_v59 = vrot.slane %v8968_v51, %v8325_v12  ;;  %v6648_v12 = vld [vmem:[%s9291_s10 + $0x50] sm:$0xff] }
0x297f   :  { %v6049_v63 = vpop.permute.xlu0 %6048 }
0x2980   :  { %7762 = vpow2.f32 %v6030_v61  ;;  %v6028_v45 = vmul.f32 1.442695, %v6026_v41  ;;  %7559 = vmatprep.subr.mxu0 %v6049_v63  ;;  %v6264_v41 = vrot.slane %v8968_v51, %v8432_v28  ;;  %v6647_v28 = vld [vmem:[%s9291_s10 + $0x48] sm:$0xff] }
0x2981   :  { %7560 = vmatpush3.msra.mxu0 %v6049_v63  ;;  %v6047_v22 = vpop.permute.xlu1 %6046 }
0x2982   :  { %7764 = vpow2.f32 %v6028_v45  ;;  %7561 = vmatprep.subr.mxu0 %v6047_v22 }
0x2983   :  { %7562 = vmatpush3.msra.mxu0 %v6047_v22 }
0x298d   :  { %v7763_v60 = vpop.eup %7762 }
0x298e   :  { %v6035_v33 = vsel %vm183_vm0, %v7763_v60, 0.0 }
0x298f   :  { %v7765_v5 = vpop.eup %7764  ;;  %6036 = vadd.xlane.f32.xlu1 %v6035_v33 }
0x2990   :  { %v6032_v58 = vsel %vm183_vm0, %v7765_v5, 0.0 }
0x2991   :  { %6033 = vadd.xlane.f32.xlu0 %v6032_v58  ;;  %v6649_v58 = vld [vmem:[%s9291_s10 + $0x58] sm:$0xff] }
0x29a0   :  { %6044 = vrot.lane.b32.xlu1 %v9032_v32, %s7983_s2 }
0x29a4   :  { %6135 = vrot.lane.b32.xlu1 %v8923_v4, %s7976_s11 }
0x29a7   :  { %6042 = vrot.lane.b32.xlu0 %v9038_v23, %s7983_s2 }
0x2a18   :  { %v6037_v31 = vpop.xlane.xlu1 %6036 }
0x2a19   :  { %7766 = vrcp.f32 %v6037_v31  ;;  %v6646_v31 = vld [vmem:[%s9291_s10 + $0x40] sm:$0xff] }
0x2a1a   :  { %v6034_v15 = vpop.xlane.xlu0 %6033 }
0x2a1b   :  { %7768 = vrcp.f32 %v6034_v15  ;;  %v6740_v15 = vld [vmem:[#allocation10 + $0x1] ss:$0 sm:$0xff] }
0x2a1c   :  { %v6045_v43 = vpop.permute.xlu1 %6044 }
0x2a1d   :  { %7563 = vmatprep.subr.mxu0 %v6045_v43 }
0x2a1e   :  { %v6043_v6 = vpop.permute.xlu0 %6042  ;;  %7564 = vmatpush3.msra.mxu0 %v6045_v43 }
0x2a1f   :  { %7565 = vmatprep.subr.mxu0 %v6043_v6 }
0x2a20   :  { %7566 = vmatpush3.msra.mxu0 %v6043_v6  ;;  %v6136_v46 = vpop.permute.xlu1 %6135 }
0x2a21   :  { %7570 = vmatprep.subr.mxu0 %v6136_v46 }
0x2a26   :  { %v7767_v47 = vpop.eup %7766 }
0x2a27   :  { %v6041_v35 = vmul.f32 %v7767_v47, %v7763_v60 }
0x2a28   :  { %v7769_v32 = vpop.eup %7768 }
0x2a29   :  { %v6040_v56 = vmul.f32 %v7769_v32, %v7765_v5 }
0x2a2b   :  { %7567 = vmatprep.mubr.msk.f32.mxu0 %vm183_vm0, %v6040_v56 }
0x2a2c   :  { %7568 = vmatmul.mubr.msk.f32.vlgmr.msra.gmra.mxu0 %vm183_vm0, %v6041_v35  ;;  %v6359_v35 = vrot.slane %v8968_v51, %v8156_v20 }
0x2a2d   :  { %7571 = vmatpush3.msra.mxu0 %v6136_v46 }
0x2aec   :  { %v7569_v4 = vpop.f32.mrf.mxu0 }
0x2aee   :  { %v6126_v23 = vpop.f32.mrf.mxu0 }
0x2aef   :  { %7572 = vmatprep.mubr.msk.f32.mxu0 %vm390_vm1, %v6126_v23 }
0x2af0   :  { %7573 = vmatmul.mubr.msk.f32.vlgmr.msra.gmra.mxu0 %vm390_vm1, %v7569_v4 }
0x2bb0   :  { %v7574_v9 = vpop.f32.mrf.mxu0 }
0x2bb1   :  { %v6220_v44 = vadd.f32 %v7574_v9, %v5920_v13  ;;  %v6653_v13 = vld [vmem:[%s9291_s10 + $0x78] sm:$0xff] }
0x2bb2   :  { %v6210_v53 = vpop.f32.mrf.mxu0  ;;  %7586 = vmatprep.subr.mxu1 %v6653_v13 }
0x2bb3   :  { %v6226_v34 = vadd.f32 %v6224_v55, %v6220_v44  ;;  %v6219_v49 = vadd.f32 %v6210_v53, %v9184_v50  ;;  %7587 = vmatpush3.msra.mxu1 %v6653_v13  ;;  %v6651_v50 = vld [vmem:[%s9291_s10 + $0x68] sm:$0xff]  ;;  %s7984_s10 = smov [#allocation14]  }
0x2bb4   :  { %7588 = vmatprep.subr.mxu1 %v6652_v8  ;;  %s6528_s29 = sshll.u32 %s7984_s10, 4  ;;  %s6529_s29 = int_to_ptr.vmem [resolvable:$true] %s6528_s29 }
0x2bb5   :  { %v6225_v24 = vadd.f32 %v6224_v55, %v6219_v49  ;;  %v6228_v16 = vadd.f32 %v6226_v34, %v8978_v3  ;;  %7589 = vmatpush3.msra.mxu1 %v6652_v8  ;;  %s7934_s18 = scalar_lea.vmem %s6529_s29, 256  ;;  %p7939_p8 = scmp.lt.s32.totalorder %s6529_s29, %s6529_s29 }
0x2bb6   :  { %7590 = vmatprep.subr.mxu1 %v6651_v50  ;;  %p7935_p7 = scmp.ne.s32.totalorder %s6529_s29, %s7934_s18  ;;  %p7940_p9 = scmp.lt.s32.totalorder %s7934_s18, %s7934_s18 }
0x2bb7   :  { %v6232_v38 = vsel %vm183_vm0, %v6228_v16, 0.0  ;;  %v6227_v40 = vadd.f32 %v6225_v24, %v8980_v27  ;;  %v6645_v27 = vld [vmem:[%s9289_s8 + $0x38] sm:$0xff]  ;;  %7591 = vmatpush3.msra.mxu1 %v6651_v50 }
0x2bb8   :  { %6233 = vadd.xlane.f32.xlu1 %v6232_v38  ;;  %7575 = vmatprep.subr.mxu0 %v6645_v27  ;;  %p7941_p10 = por %p7940_p9, %p7939_p8 }
0x2bb9   :  { %v6229_v11 = vsel %vm183_vm0, %v6227_v40, 0.0  ;;  %7576 = vmatpush3.msra.mxu0 %v6645_v27  ;;  %7592 = vmatprep.subr.mxu1 %v6650_v29 }
0x2bba   :  { %6230 = vadd.xlane.f32.xlu0 %v6229_v11  ;;  %7577 = vmatprep.subr.mxu0 %v6644_v30  ;;  %p7942_p11 = pnand %p7941_p10, %p7935_p7 }
0x2bbb   :  { %7578 = vmatpush3.msra.mxu0 %v6644_v30  ;;  %7593 = vmatpush3.msra.mxu1 %v6650_v29 }
0x2bbc   :  { %7579 = vmatprep.subr.mxu0 %v6643_v18  ;;  %7594 = vmatprep.subr.mxu1 %v6649_v58 }
0x2bbd   :  { %7580 = vmatpush3.msra.mxu0 %v6643_v18  ;;  %7595 = vmatpush3.msra.mxu1 %v6649_v58  ;;  %v6478_v18 = vrot.slane %v8968_v51, %v8471_v48 }
0x2bbe   :  { %7581 = vmatprep.subr.mxu0 %v6642_v19  ;;  %7596 = vmatprep.subr.mxu1 %v6648_v12 }
0x2bbf   :  { %7582 = vmatpush3.msra.mxu0 %v6642_v19  ;;  %7597 = vmatpush3.msra.mxu1 %v6648_v12  ;;  %v6745_v12 = vld [vmem:[#allocation13] ss:$0 sm:$0xff] }
0x2bc0   :  { %7598 = vmatprep.subr.mxu1 %v6647_v28 }
0x2bc1   :  { %7599 = vmatpush3.msra.mxu1 %v6647_v28 }
0x2bc2   :  { %7600 = vmatprep.subr.mxu1 %v6646_v31 }
0x2bc3   :  { %7601 = vmatpush3.msra.mxu1 %v6646_v31 }
0x2c41   :  { %v6234_v52 = vpop.xlane.xlu1 %6233 }
0x2c42   :  { %v6236_v1 = vmul.f32 0.03125, %v6234_v52 }
0x2c43   :  { %v6231_v7 = vpop.xlane.xlu0 %6230 }
0x2c44   :  { %v6235_v54 = vmul.f32 0.03125, %v6231_v7  ;;  %v6238_v14 = vsub.f32 %v6228_v16, %v6236_v1 }
0x2c46   :  { %v6237_v2 = vsub.f32 %v6227_v40, %v6235_v54  ;;  %v6240_v57 = vmul.f32 %v6238_v14, %v6238_v14 }
0x2c48   :  { %v6239_v17 = vmul.f32 %v6237_v2, %v6237_v2  ;;  %v6244_v3 = vsel %vm183_vm0, %v6240_v57, 0.0 }
0x2c4a   :  { %v6241_v10 = vsel %vm183_vm0, %v6239_v17, 0.0 }
0x2c4b   :  { %6242 = vadd.xlane.f32.xlu0 %v6241_v10 }
0x2c4f   :  { %6245 = vadd.xlane.f32.xlu0 %v6244_v3  ;;  %v6472_v3 = vrot.slane %v8968_v51, %v8409_v21 }
0x2cd4   :  { %v6243_v42 = vpop.xlane.xlu0 %6242 }
0x2cd5   :  { %v6247_v36 = vmul.f32 0.03125, %v6243_v42 }
0x2cd7   :  { %v6249_v26 = vadd.f32 1e-05, %v6247_v36 }
0x2cd8   :  { %v6246_v37 = vpop.xlane.xlu0 %6245 }
0x2cd9   :  { %7770 = vrsqrt.f32 %v6249_v26  ;;  %v6248_v25 = vmul.f32 0.03125, %v6246_v37 }
0x2cdb   :  { %v6250_v39 = vadd.f32 1e-05, %v6248_v25 }
0x2cdd   :  { %7772 = vrsqrt.f32 %v6250_v39 }
0x2ce6   :  { %v7771_v0 = vpop.eup %7770 }
0x2ce7   :  { %v6253_v61 = vmul.f32 %v7771_v0, %v6237_v2 }
0x2ce9   :  { %v6259_v63 = vmul.f32 %v6258_v59, %v6253_v61 }
0x2cea   :  { %v7773_v45 = vpop.eup %7772 }
0x2ceb   :  { %v6254_v22 = vmul.f32 %v7773_v45, %v6238_v14  ;;  %v6265_v60 = vadd.f32 %v6264_v41, %v6259_v63 }
0x2ced   :  { %v6260_v33 = vmul.f32 %v6258_v59, %v6254_v22  ;;  %7583 = vmatprep.mubr.msk.f32.mxu0 %vm183_vm0, %v6265_v60 }
0x2cef   :  { %v6266_v5 = vadd.f32 %v6264_v41, %v6260_v33 }
0x2cf1   :  { %7584 = vmatmul.mubr.msk.f32.vlgmr.msra.gmra.mxu0 %vm183_vm0, %v6266_v5 }
0x2db1   :  { %v7585_v43 = vpop.f32.mrf.mxu0 }
0x2db2   :  { %v6351_v6 = vadd.f32 %v7585_v43, %v6740_v15 }
0x2db3   :  { %v6345_v46 = vpop.f32.mrf.mxu0 }
0x2db4   :  { %v6346_v47 = vadd.f32 %v6740_v15, %v6345_v46  ;;  %v6355_v56 = vmax.f32 %v6351_v6, 0.0  ;;  %v6746_v15 = vld [vmem:[#allocation13 + $0x1] ss:$0 sm:$0xff] }
0x2db6   :  { %v6354_v32 = vmax.f32 %v6346_v47, 0.0 }
0x2db8   :  { %7602 = vmatprep.mubr.msk.f32.mxu1 %vm3209_vm3, %v6354_v32 }
0x2db9   :  { %7603 = vmatmul.mubr.msk.f32.vlgmr.msra.gmra.mxu1 %vm3209_vm3, %v6355_v56 }
0x2e79   :  { %v7604_v4 = vpop.f32.mrf.mxu1 }
0x2e7a   :  { %v6438_v23 = vadd.f32 %v7604_v4, %v6359_v35 }
0x2e7b   :  { %v6432_v62 = vpop.f32.mrf.mxu1 }
0x2e7c   :  { %v6442_v55 = vadd.f32 %v6438_v23, %v6266_v5  ;;  %v6433_v9 = vadd.f32 %v6432_v62, %v6359_v35 }
0x2e7e   :  { %v6441_v44 = vadd.f32 %v6433_v9, %v6265_v60  ;;  %v6446_v53 = vsel %vm183_vm0, %v6442_v55, 0.0 }
0x2e7f   :  { %6447 = vadd.xlane.f32.xlu0 %v6446_v53 }
0x2e80   :  { %v6443_v34 = vsel %vm183_vm0, %v6441_v44, 0.0 }
0x2e81   :  { %6444 = vadd.xlane.f32.xlu1 %v6443_v34 }
0x2f08   :  { %v6448_v49 = vpop.xlane.xlu0 %6447 }
0x2f09   :  { %v6450_v24 = vmul.f32 0.03125, %v6448_v49 }
0x2f0a   :  { %v6445_v16 = vpop.xlane.xlu1 %6444 }
0x2f0b   :  { %v6452_v38 = vsub.f32 %v6442_v55, %v6450_v24  ;;  %v6449_v40 = vmul.f32 0.03125, %v6445_v16 }
0x2f0d   :  { %v6451_v11 = vsub.f32 %v6441_v44, %v6449_v40  ;;  %v6454_v52 = vmul.f32 %v6452_v38, %v6452_v38 }
0x2f0f   :  { %v6458_v20 = vsel %vm183_vm0, %v6454_v52, 0.0  ;;  %v6453_v1 = vmul.f32 %v6451_v11, %v6451_v11 }
0x2f10   :  { %6459 = vadd.xlane.f32.xlu0 %v6458_v20 }
0x2f11   :  { %v6455_v7 = vsel %vm183_vm0, %v6453_v1, 0.0 }
0x2f12   :  { %6456 = vadd.xlane.f32.xlu1 %v6455_v7 }
0x2f99   :  { %v6460_v54 = vpop.xlane.xlu0 %6459 }
0x2f9a   :  { %v6462_v14 = vmul.f32 0.03125, %v6460_v54 }
0x2f9b   :  { %v6457_v2 = vpop.xlane.xlu1 %6456 }
0x2f9c   :  { %v6464_v17 = vadd.f32 1e-05, %v6462_v14  ;;  %v6461_v10 = vmul.f32 0.03125, %v6457_v2 }
0x2f9e   :  { %7774 = vrsqrt.f32 %v6464_v17  ;;  %v6463_v57 = vadd.f32 1e-05, %v6461_v10 }
0x2fa0   :  { %7776 = vrsqrt.f32 %v6463_v57 }
0x2fab   :  { %v7775_v27 = vpop.eup %7774 }
0x2fac   :  { %v6468_v30 = vmul.f32 %v7775_v27, %v6452_v38 }
0x2fad   :  { %v7777_v19 = vpop.eup %7776 }
0x2fae   :  { %v6474_v13 = vmul.f32 %v6472_v3, %v6468_v30  ;;  %v6467_v8 = vmul.f32 %v7777_v19, %v6451_v11 }
0x2fb0   :  { %v6480_v50 = vadd.f32 %v6478_v18, %v6474_v13  ;;  %v6473_v29 = vmul.f32 %v6472_v3, %v6467_v8 }
0x2fb2   :  { %v6486_v42 = vsel %vm183_vm0, %v6480_v50, 0.0  ;;  %v6479_v36 = vadd.f32 %v6478_v18, %v6473_v29 }
0x2fb3   :  { %6487 = vadd.xlane.f32.xlu0 %v6486_v42 }
0x2fb4   :  { %v6483_v26 = vsel %vm183_vm0, %v6479_v36, 0.0 }
0x2fb5   :  { %6484 = vadd.xlane.f32.xlu1 %v6483_v26 }
0x303c   :  { %v6488_v37 = vpop.xlane.xlu0 %6487 }
0x303d   :  { %v6490_v25 = vmul.f32 0.03125, %v6488_v37 }
0x303e   :  { %v6485_v21 = vpop.xlane.xlu1 %6484 }
0x303f   :  { %v6492_v39 = vsub.f32 %v6480_v50, %v6490_v25  ;;  %v6489_v59 = vmul.f32 0.03125, %v6485_v21 }
0x3041   :  { %v6491_v0 = vsub.f32 %v6479_v36, %v6489_v59  ;;  %v6494_v61 = vmul.f32 %v6492_v39, %v6492_v39 }
0x3043   :  { %v6498_v48 = vsel %vm183_vm0, %v6494_v61, 0.0  ;;  %v6493_v51 = vmul.f32 %v6491_v0, %v6491_v0 }
0x3044   :  { %6499 = vadd.xlane.f32.xlu0 %v6498_v48 }
0x3045   :  { %v6495_v41 = vsel %vm183_vm0, %v6493_v51, 0.0 }
0x3046   :  { %6496 = vadd.xlane.f32.xlu1 %v6495_v41 }
0x30cd   :  { %v6500_v63 = vpop.xlane.xlu0 %6499 }
0x30ce   :  { %v6502_v45 = vmul.f32 0.03125, %v6500_v63 }
0x30cf   :  { %v6497_v22 = vpop.xlane.xlu1 %6496 }
0x30d0   :  { %v6504_v60 = vadd.f32 1e-05, %v6502_v45  ;;  %v6501_v33 = vmul.f32 0.03125, %v6497_v22 }
0x30d2   :  { %7778 = vrsqrt.f32 %v6504_v60  ;;  %v6503_v5 = vadd.f32 1e-05, %v6501_v33 }
0x30d4   :  { %7780 = vrsqrt.f32 %v6503_v5 }
0x30df   :  { %v7779_v58 = vpop.eup %7778 }
0x30e0   :  { %v6508_v28 = vmul.f32 %v7779_v58, %v6492_v39 }
0x30e1   :  { %v7781_v31 = vpop.eup %7780 }
0x30e2   :  { %v6507_v43 = vmul.f32 %v7781_v31, %v6491_v0  ;;  %v6514_v6 = vmul.f32 %v6745_v12, %v6508_v28 }
0x30e4   :  { %v6513_v46 = vmul.f32 %v6745_v12, %v6507_v43  ;;  %v6520_v47 = vadd.f32 %v6746_v15, %v6514_v6 }
0x30e6   :  { %v6519_v32 = vadd.f32 %v6746_v15, %v6513_v46  ;;  %6522 = vst.msk [vmem:[#allocation14 + $0x8] sm:$0xff] %vm183_vm0, %v6520_v47 }
0x30e8   :  { %6521 = vst.msk [vmem:[#allocation14] sm:$0xff] %vm183_vm0, %v6519_v32 }
0x30e9   :  { %7945 = shalt.err (!%p7942_p11)
}
0x30ea   :  { %6534 = dma.vmem_to_hbm [thread:$0]  %s6529_s29, 256, %s9294_s13, [#allocation4], %s7966_s30, %s7966_s30, %s7967_s14  }
0x30eb   :  { %7962 = dma.done.wait [#allocation4], 256  }
0x30ec   :  { %7963 = vsyncadd [#allocation4], 4294967040 }
0x30ed   :  { %6538 = vsyncpa [#allocation3], 1 }
0x30ee   :  { %6539 = vsyncpa [#allocation6], 1 }
0x30ef   :  { %6540 = vsyncpa [#allocation9], 1 }
0x30f0   :  { %6541 = vsyncpa [#allocation12], 1 }
0x30f1   :  { %6542 = vsyncpa [#allocation4], 1 }

</bundles_post_ra>
